<compile_context>
chip_gen: v5e
topology: v5e:2x2
jax: 0.10.0
libtpu: 0.0.40
codegen_flags: <defaults>
</compile_context>

<pallas_src>
import functools

import jax
import jax.numpy as jnp
import numpy as np
from jax.experimental import pallas as pl
from jax.experimental.pallas import tpu as pltpu


def _fused_mixquant_conv_kernel(sw_ref, x_ref, w_ref, o_ref, wmix_ref, *,
                                bits, KH, KW, sh, sv, OH, OW):
    # sw_ref  : (n_bits,)               f32 SMEM  -- softmax(alpha_weight)
    # x_ref   : (1, Hp, Wp, C)          bf16 VMEM -- padded NHWC image for batch n
    # w_ref   : (n_bits, KH, KW, C, TN) f32 VMEM  -- raw per-bit weights, O-tile j
    # o_ref   : (1, OH*OW, TN)          f32 VMEM  -- conv output tile (lane-dense)
    # wmix_ref: (KH, KW, C, TN)         bf16 VMEM scratch -- mixed quantized weight
    n = pl.program_id(1)   # batch index (inner, "arbitrary" axis)

    # ---- (1) per-output-channel asym min/max quant + softmax mixing ------------
    # Computed once per weight tile (first batch step); reused for all batches.
    @pl.when(n == 0)
    def _():
        acc_w = jnp.zeros(wmix_ref.shape, jnp.float32)
        for i, bit in enumerate(bits):
            w = w_ref[i]                                             # (KH, KW, C, TN)
            ch_max = w.max(axis=(0, 1, 2), keepdims=True)            # (1, 1, 1, TN)
            ch_min = w.min(axis=(0, 1, 2), keepdims=True)            # (1, 1, 1, TN)
            ch_range = ch_max - ch_min
            ch_range = jnp.where(ch_range == 0.0, 1.0, ch_range)
            n_steps = float(2 ** bit - 1)
            inv_s = n_steps / ch_range               # exact per-channel reciprocal
            scale = ch_range * (sw_ref[i] / n_steps)  # step size * softmax(alpha)[i]
            acc_w = acc_w + jnp.round(w * inv_s) * scale
        wmix_ref[...] = acc_w.astype(wmix_ref.dtype)

    # ---- (2) conv = sum of KH*KW shifted matmuls on the MXU --------------------
    C = x_ref.shape[-1]
    TN = o_ref.shape[-1]
    acc = jnp.zeros((OH * OW, TN), jnp.float32)
    for kh in range(KH):
        for kw in range(KW):
            if sh == 1 and sv == 1:
                a = x_ref[0, kh:kh + OH, kw:kw + OW, :]              # (OH, OW, C) bf16
            else:
                # stride > 1 path: load full tap window, strided slice on the value
                a = x_ref[0, kh:kh + (OH - 1) * sh + 1,
                          kw:kw + (OW - 1) * sv + 1, :][::sh, ::sv, :]
            a2 = a.reshape(OH * OW, C)                               # bf16 MXU operand
            acc = acc + jnp.dot(a2, wmix_ref[kh, kw],                # (C, TN) bf16
                                preferred_element_type=jnp.float32)
    o_ref[0] = acc                                                   # single store


def mix_quant_chan_conv2d(x, weights, alpha, bits, stride=(1, 1), padding=(1, 1)):
    """Forward pass of MixQuantChanConv2d.

    x:       (N, C, H, W)           f32 activations (NCHW, PyTorch convention)
    weights: (n_bits, O, C, KH, KW) f32, one Conv2d weight per candidate bit width
    alpha:   (n_bits,)              f32 architecture parameters
    returns: (N, O, OH, OW)         f32 (NCHW, matching the PyTorch module)
    """
    nb, O, C, KH, KW = weights.shape
    N, _, H, W = x.shape
    sh, sv = stride
    ph, pw = padding
    OH = (H + 2 * ph - KH) // sh + 1
    OW = (W + 2 * pw - KW) // sv + 1
    Hp, Wp = H + 2 * ph, W + 2 * pw

    TN = 128                                   # output-channel tile (lane width)
    Op = ((O + TN - 1) // TN) * TN
    num_o = Op // TN

    # layout glue (done once, no KH*KW im2col blow-up):
    sw = jax.nn.softmax(alpha.astype(jnp.float32), axis=0)           # (nb,)
    # activations: NCHW -> NHWC, bf16 (cast once; kernel reads half the bytes), pad
    x_nhwc = jnp.transpose(x, (0, 2, 3, 1)).astype(jnp.bfloat16)     # (N, H, W, C)
    xp = jnp.pad(x_nhwc, ((0, 0), (ph, ph), (pw, pw), (0, 0)))       # (N, Hp, Wp, C)
    # weights OIHW -> (nb, KH, KW, C, Op): output channels on the lane axis, zero-padded
    w = jnp.transpose(weights.astype(jnp.float32), (0, 3, 4, 2, 1))
    if Op != O:
        w = jnp.pad(w, ((0, 0), (0, 0), (0, 0), (0, 0), (0, Op - O)))

    kernel = functools.partial(
        _fused_mixquant_conv_kernel,
        bits=tuple(int(b) for b in bits), KH=KH, KW=KW, sh=sh, sv=sv, OH=OH, OW=OW)

    out = pl.pallas_call(
        kernel,
        out_shape=jax.ShapeDtypeStruct((N, OH * OW, Op), jnp.float32),
        grid=(num_o, N),                       # (O tiles, batch)
        in_specs=[
            pl.BlockSpec(memory_space=pltpu.MemorySpace.SMEM),                # sw
            pl.BlockSpec((1, Hp, Wp, C), lambda j, n: (n, 0, 0, 0)),          # image n
            pl.BlockSpec((nb, KH, KW, C, TN), lambda j, n: (0, 0, 0, 0, j)),  # raw W tile
        ],
        out_specs=pl.BlockSpec((1, OH * OW, TN), lambda j, n: (n, 0, j)),
        scratch_shapes=[pltpu.VMEM((KH, KW, C, TN), jnp.bfloat16)],           # mixed W
        compiler_params=pltpu.CompilerParams(
            dimension_semantics=("parallel", "arbitrary"),   # O tiles across cores
            vmem_limit_bytes=48 * 1024 * 1024,               # safe on v5e/v6e/v7x
        ),
    )(sw, xp, w)

    out = out[:, :, :O].reshape(N, OH, OW, O)     # drop O padding (NHWC internally)
    # NHWC is the natural TPU layout; transpose back only to preserve module semantics.
    return jnp.transpose(out, (0, 3, 1, 2))


if __name__ == "__main__":
    key = jax.random.PRNGKey(0)
    bits = (2, 4, 8)
    N, C, H, W = 2, 4, 16, 16
    O, KH, KW = 8, 3, 3
    stride, padding = (1, 1), (1, 1)

    k_w, k_x = jax.random.split(key)
    # one Conv2d weight per candidate bit-width, bias=False (asserted in the module)
    weights = 0.1 * jax.random.normal(k_w, (len(bits), O, C, KH, KW), jnp.float32)
    alpha = jnp.full((len(bits),), 0.01, jnp.float32)    # alpha_weight.data.fill_(0.01)
    x = jax.random.normal(k_x, (N, C, H, W), jnp.float32)

    out = mix_quant_chan_conv2d(x, weights, alpha, bits, stride, padding)
    out = jax.block_until_ready(out)

    # pure-JAX reference mirroring the PyTorch module (f32 end to end)
    sw = jax.nn.softmax(alpha)
    mixed = jnp.zeros((O, C, KH, KW), jnp.float32)
    for i, bit in enumerate(bits):
        wf = weights[i].reshape(O, -1)
        rng = wf.max(1) - wf.min(1)
        rng = jnp.where(rng == 0, 1.0, rng)
        s = (rng / (2 ** bit - 1)).reshape(O, 1, 1, 1)
        mixed = mixed + jnp.round(weights[i] / s) * s * sw[i]
    ref = jax.lax.conv_general_dilated(
        x, mixed, window_strides=stride,
        padding=[(padding[0], padding[0]), (padding[1], padding[1])],
        dimension_numbers=("NCHW", "OIHW", "NCHW"),
        precision=jax.lax.Precision.HIGHEST)
    # tolerance accounts for bf16 MXU operands (f32 accumulation)
    np.testing.assert_allclose(np.asarray(out), np.asarray(ref), atol=2e-2, rtol=2e-2)

    print("KERNEL_OK")
</pallas_src>

<mosaic_0001>
module attributes {stable_mosaic.version = 11 : i64} {
  func.func @_fused_mixquant_conv_kernel(%arg0: i32, %arg1: i32, %arg2: memref<3xf32, #tpu.memory_space<smem>>, %arg3: memref<1x18x18x4xbf16, #tpu.memory_space<vmem>>, %arg4: memref<3x3x3x4x128xf32, #tpu.memory_space<vmem>>, %arg5: memref<1x256x128xf32, #tpu.memory_space<vmem>>, %arg6: memref<3x3x4x128xbf16, #tpu.memory_space<vmem>>) attributes {dimension_semantics = [#tpu.dimension_semantics<parallel>, #tpu.dimension_semantics<arbitrary>], iteration_bounds = array<i64: 1, 2>, scalar_prefetch = 0 : i64, scratch_operands = 1 : i64, tpu.core_type = #tpu.core_type<tc>, window_params = [{transform_indices = @transform_0, window_bounds = array<i64: 3>}, {transform_indices = @transform_1, window_bounds = array<i64: 1, 18, 18, 4>}, {transform_indices = @transform_2, window_bounds = array<i64: 3, 3, 3, 4, 128>}, {transform_indices = @transform_3, window_bounds = array<i64: 1, 256, 128>}]} {
    %c0_i32 = arith.constant 0 : i32
    %0 = arith.cmpi eq, %arg1, %c0_i32 : i32
    %1 = arith.extui %0 : i1 to i32
    %c0_i32_0 = arith.constant 0 : i32
    %2 = arith.cmpi ne, %1, %c0_i32_0 : i32
    scf.if %2 {
      %cst_82 = arith.constant 0.000000e+00 : f32
      %70 = vector.broadcast %cst_82 : f32 to vector<3x3x4x128xf32>
      %c0_83 = arith.constant 0 : index
      %c0_84 = arith.constant 0 : index
      %c0_85 = arith.constant 0 : index
      %c0_86 = arith.constant 0 : index
      %c0_87 = arith.constant 0 : index
      %71 = vector.load %arg4[%c0_83, %c0_84, %c0_85, %c0_86, %c0_87] : memref<3x3x3x4x128xf32, #tpu.memory_space<vmem>>, vector<1x3x3x4x128xf32>
      %72 = vector.shape_cast %71 : vector<1x3x3x4x128xf32> to vector<3x3x4x128xf32>
      %cst_88 = arith.constant dense<0xFF800000> : vector<128xf32>
      %73 = vector.multi_reduction <maximumf>, %72, %cst_88 [0, 1, 2] : vector<3x3x4x128xf32> to vector<128xf32>
      %74 = vector.shape_cast %73 : vector<128xf32> to vector<1x1x1x128xf32>
      %cst_89 = arith.constant dense<0x7F800000> : vector<128xf32>
      %75 = vector.multi_reduction <minimumf>, %72, %cst_89 [0, 1, 2] : vector<3x3x4x128xf32> to vector<128xf32>
      %76 = vector.shape_cast %75 : vector<128xf32> to vector<1x1x1x128xf32>
      %77 = arith.subf %74, %76 : vector<1x1x1x128xf32>
      %cst_90 = arith.constant 0.000000e+00 : f32
      %78 = vector.broadcast %cst_90 : f32 to vector<1x1x1x128xf32>
      %79 = arith.cmpf oeq, %77, %78 : vector<1x1x1x128xf32>
      %cst_91 = arith.constant 1.000000e+00 : f32
      %80 = vector.broadcast %cst_91 : f32 to vector<1x1x1x128xf32>
      %81 = arith.select %79, %80, %77 : vector<1x1x1x128xi1>, vector<1x1x1x128xf32>
      %cst_92 = arith.constant 3.000000e+00 : f32
      %82 = vector.broadcast %cst_92 : f32 to vector<1x1x1x128xf32>
      %83 = arith.divf %82, %81 : vector<1x1x1x128xf32>
      %c0_93 = arith.constant 0 : index
      %84 = memref.load %arg2[%c0_93] : memref<3xf32, #tpu.memory_space<smem>>
      %cst_94 = arith.constant 3.000000e+00 : f32
      %85 = arith.divf %84, %cst_94 : f32
      %86 = vector.broadcast %85 : f32 to vector<1x1x1x128xf32>
      %87 = arith.mulf %81, %86 : vector<1x1x1x128xf32>
      %88 = vector.broadcast %83 : vector<1x1x1x128xf32> to vector<3x3x4x128xf32>
      %89 = arith.mulf %72, %88 : vector<3x3x4x128xf32>
      %90 = math.roundeven %89 : vector<3x3x4x128xf32>
      %91 = vector.broadcast %87 : vector<1x1x1x128xf32> to vector<3x3x4x128xf32>
      %92 = arith.mulf %90, %91 : vector<3x3x4x128xf32>
      %93 = arith.addf %70, %92 : vector<3x3x4x128xf32>
      %c1_95 = arith.constant 1 : index
      %c0_96 = arith.constant 0 : index
      %c0_97 = arith.constant 0 : index
      %c0_98 = arith.constant 0 : index
      %c0_99 = arith.constant 0 : index
      %94 = vector.load %arg4[%c1_95, %c0_96, %c0_97, %c0_98, %c0_99] : memref<3x3x3x4x128xf32, #tpu.memory_space<vmem>>, vector<1x3x3x4x128xf32>
      %95 = vector.shape_cast %94 : vector<1x3x3x4x128xf32> to vector<3x3x4x128xf32>
      %cst_100 = arith.constant dense<0xFF800000> : vector<128xf32>
      %96 = vector.multi_reduction <maximumf>, %95, %cst_100 [0, 1, 2] : vector<3x3x4x128xf32> to vector<128xf32>
      %97 = vector.shape_cast %96 : vector<128xf32> to vector<1x1x1x128xf32>
      %cst_101 = arith.constant dense<0x7F800000> : vector<128xf32>
      %98 = vector.multi_reduction <minimumf>, %95, %cst_101 [0, 1, 2] : vector<3x3x4x128xf32> to vector<128xf32>
      %99 = vector.shape_cast %98 : vector<128xf32> to vector<1x1x1x128xf32>
      %100 = arith.subf %97, %99 : vector<1x1x1x128xf32>
      %cst_102 = arith.constant 0.000000e+00 : f32
      %101 = vector.broadcast %cst_102 : f32 to vector<1x1x1x128xf32>
      %102 = arith.cmpf oeq, %100, %101 : vector<1x1x1x128xf32>
      %cst_103 = arith.constant 1.000000e+00 : f32
      %103 = vector.broadcast %cst_103 : f32 to vector<1x1x1x128xf32>
      %104 = arith.select %102, %103, %100 : vector<1x1x1x128xi1>, vector<1x1x1x128xf32>
      %cst_104 = arith.constant 1.500000e+01 : f32
      %105 = vector.broadcast %cst_104 : f32 to vector<1x1x1x128xf32>
      %106 = arith.divf %105, %104 : vector<1x1x1x128xf32>
      %c1_105 = arith.constant 1 : index
      %107 = memref.load %arg2[%c1_105] : memref<3xf32, #tpu.memory_space<smem>>
      %cst_106 = arith.constant 1.500000e+01 : f32
      %108 = arith.divf %107, %cst_106 : f32
      %109 = vector.broadcast %108 : f32 to vector<1x1x1x128xf32>
      %110 = arith.mulf %104, %109 : vector<1x1x1x128xf32>
      %111 = vector.broadcast %106 : vector<1x1x1x128xf32> to vector<3x3x4x128xf32>
      %112 = arith.mulf %95, %111 : vector<3x3x4x128xf32>
      %113 = math.roundeven %112 : vector<3x3x4x128xf32>
      %114 = vector.broadcast %110 : vector<1x1x1x128xf32> to vector<3x3x4x128xf32>
      %115 = arith.mulf %113, %114 : vector<3x3x4x128xf32>
      %116 = arith.addf %93, %115 : vector<3x3x4x128xf32>
      %c2_107 = arith.constant 2 : index
      %c0_108 = arith.constant 0 : index
      %c0_109 = arith.constant 0 : index
      %c0_110 = arith.constant 0 : index
      %c0_111 = arith.constant 0 : index
      %117 = vector.load %arg4[%c2_107, %c0_108, %c0_109, %c0_110, %c0_111] : memref<3x3x3x4x128xf32, #tpu.memory_space<vmem>>, vector<1x3x3x4x128xf32>
      %118 = vector.shape_cast %117 : vector<1x3x3x4x128xf32> to vector<3x3x4x128xf32>
      %cst_112 = arith.constant dense<0xFF800000> : vector<128xf32>
      %119 = vector.multi_reduction <maximumf>, %118, %cst_112 [0, 1, 2] : vector<3x3x4x128xf32> to vector<128xf32>
      %120 = vector.shape_cast %119 : vector<128xf32> to vector<1x1x1x128xf32>
      %cst_113 = arith.constant dense<0x7F800000> : vector<128xf32>
      %121 = vector.multi_reduction <minimumf>, %118, %cst_113 [0, 1, 2] : vector<3x3x4x128xf32> to vector<128xf32>
      %122 = vector.shape_cast %121 : vector<128xf32> to vector<1x1x1x128xf32>
      %123 = arith.subf %120, %122 : vector<1x1x1x128xf32>
      %cst_114 = arith.constant 0.000000e+00 : f32
      %124 = vector.broadcast %cst_114 : f32 to vector<1x1x1x128xf32>
      %125 = arith.cmpf oeq, %123, %124 : vector<1x1x1x128xf32>
      %cst_115 = arith.constant 1.000000e+00 : f32
      %126 = vector.broadcast %cst_115 : f32 to vector<1x1x1x128xf32>
      %127 = arith.select %125, %126, %123 : vector<1x1x1x128xi1>, vector<1x1x1x128xf32>
      %cst_116 = arith.constant 2.550000e+02 : f32
      %128 = vector.broadcast %cst_116 : f32 to vector<1x1x1x128xf32>
      %129 = arith.divf %128, %127 : vector<1x1x1x128xf32>
      %c2_117 = arith.constant 2 : index
      %130 = memref.load %arg2[%c2_117] : memref<3xf32, #tpu.memory_space<smem>>
      %cst_118 = arith.constant 2.550000e+02 : f32
      %131 = arith.divf %130, %cst_118 : f32
      %132 = vector.broadcast %131 : f32 to vector<1x1x1x128xf32>
      %133 = arith.mulf %127, %132 : vector<1x1x1x128xf32>
      %134 = vector.broadcast %129 : vector<1x1x1x128xf32> to vector<3x3x4x128xf32>
      %135 = arith.mulf %118, %134 : vector<3x3x4x128xf32>
      %136 = math.roundeven %135 : vector<3x3x4x128xf32>
      %137 = vector.broadcast %133 : vector<1x1x1x128xf32> to vector<3x3x4x128xf32>
      %138 = arith.mulf %136, %137 : vector<3x3x4x128xf32>
      %139 = arith.addf %116, %138 : vector<3x3x4x128xf32>
      %140 = arith.truncf %139 : vector<3x3x4x128xf32> to vector<3x3x4x128xbf16>
      %c0_119 = arith.constant 0 : index
      %c0_120 = arith.constant 0 : index
      %c0_121 = arith.constant 0 : index
      %c0_122 = arith.constant 0 : index
      %141 = vector.load %arg6[%c0_119, %c0_120, %c0_121, %c0_122] : memref<3x3x4x128xbf16, #tpu.memory_space<vmem>>, vector<3x3x4x128xbf16>
      tpu.vector_store %arg6[%c0_119, %c0_120, %c0_121, %c0_122], %140 {strides = array<i32>} : memref<3x3x4x128xbf16, #tpu.memory_space<vmem>>, vector<3x3x4x128xbf16>,
    } else {
    }
    %cst = arith.constant 0.000000e+00 : f32
    %3 = vector.broadcast %cst : f32 to vector<256x128xf32>
    %c0 = arith.constant 0 : index
    %c0_1 = arith.constant 0 : index
    %c0_2 = arith.constant 0 : index
    %c0_3 = arith.constant 0 : index
    %4 = vector.load %arg3[%c0, %c0_1, %c0_2, %c0_3] : memref<1x18x18x4xbf16, #tpu.memory_space<vmem>>, vector<1x16x16x4xbf16>
    %5 = vector.shape_cast %4 : vector<1x16x16x4xbf16> to vector<16x16x4xbf16>
    %6 = vector.shape_cast %5 : vector<16x16x4xbf16> to vector<256x4xbf16>
    %c0_4 = arith.constant 0 : index
    %c0_5 = arith.constant 0 : index
    %c0_6 = arith.constant 0 : index
    %c0_7 = arith.constant 0 : index
    %7 = vector.load %arg6[%c0_4, %c0_5, %c0_6, %c0_7] : memref<3x3x4x128xbf16, #tpu.memory_space<vmem>>, vector<1x1x4x128xbf16>
    %8 = vector.shape_cast %7 : vector<1x1x4x128xbf16> to vector<4x128xbf16>
    %cst_8 = arith.constant dense<0.000000e+00> : vector<256x128xf32>
    %9 = tpu.matmul %6, %8, %cst_8 {dimension_numbers = #tpu.dot_dimension_numbers<[1], [0], [0], [1], [0, 0, 1, 1], [], []>} : vector<256x4xbf16>, vector<4x128xbf16>, vector<256x128xf32> -> vector<256x128xf32>
    %10 = arith.addf %3, %9 : vector<256x128xf32>
    %c0_9 = arith.constant 0 : index
    %c0_10 = arith.constant 0 : index
    %c1 = arith.constant 1 : index
    %c0_11 = arith.constant 0 : index
    %11 = vector.load %arg3[%c0_9, %c0_10, %c1, %c0_11] : memref<1x18x18x4xbf16, #tpu.memory_space<vmem>>, vector<1x16x16x4xbf16>
    %12 = vector.shape_cast %11 : vector<1x16x16x4xbf16> to vector<16x16x4xbf16>
    %13 = vector.shape_cast %12 : vector<16x16x4xbf16> to vector<256x4xbf16>
    %c0_12 = arith.constant 0 : index
    %c1_13 = arith.constant 1 : index
    %c0_14 = arith.constant 0 : index
    %c0_15 = arith.constant 0 : index
    %14 = vector.load %arg6[%c0_12, %c1_13, %c0_14, %c0_15] : memref<3x3x4x128xbf16, #tpu.memory_space<vmem>>, vector<1x1x4x128xbf16>
    %15 = vector.shape_cast %14 : vector<1x1x4x128xbf16> to vector<4x128xbf16>
    %cst_16 = arith.constant dense<0.000000e+00> : vector<256x128xf32>
    %16 = tpu.matmul %13, %15, %cst_16 {dimension_numbers = #tpu.dot_dimension_numbers<[1], [0], [0], [1], [0, 0, 1, 1], [], []>} : vector<256x4xbf16>, vector<4x128xbf16>, vector<256x128xf32> -> vector<256x128xf32>
    %17 = arith.addf %10, %16 : vector<256x128xf32>
    %c0_17 = arith.constant 0 : index
    %c0_18 = arith.constant 0 : index
    %c2 = arith.constant 2 : index
    %c0_19 = arith.constant 0 : index
    %18 = vector.load %arg3[%c0_17, %c0_18, %c2, %c0_19] : memref<1x18x18x4xbf16, #tpu.memory_space<vmem>>, vector<1x16x16x4xbf16>
    %19 = vector.shape_cast %18 : vector<1x16x16x4xbf16> to vector<16x16x4xbf16>
    %20 = vector.shape_cast %19 : vector<16x16x4xbf16> to vector<256x4xbf16>
    %c0_20 = arith.constant 0 : index
    %c2_21 = arith.constant 2 : index
    %c0_22 = arith.constant 0 : index
    %c0_23 = arith.constant 0 : index
    %21 = vector.load %arg6[%c0_20, %c2_21, %c0_22, %c0_23] : memref<3x3x4x128xbf16, #tpu.memory_space<vmem>>, vector<1x1x4x128xbf16>
    %22 = vector.shape_cast %21 : vector<1x1x4x128xbf16> to vector<4x128xbf16>
    %cst_24 = arith.constant dense<0.000000e+00> : vector<256x128xf32>
    %23 = tpu.matmul %20, %22, %cst_24 {dimension_numbers = #tpu.dot_dimension_numbers<[1], [0], [0], [1], [0, 0, 1, 1], [], []>} : vector<256x4xbf16>, vector<4x128xbf16>, vector<256x128xf32> -> vector<256x128xf32>
    %24 = arith.addf %17, %23 : vector<256x128xf32>
    %c0_25 = arith.constant 0 : index
    %c1_26 = arith.constant 1 : index
    %c0_27 = arith.constant 0 : index
    %c0_28 = arith.constant 0 : index
    %25 = vector.load %arg3[%c0_25, %c1_26, %c0_27, %c0_28] : memref<1x18x18x4xbf16, #tpu.memory_space<vmem>>, vector<1x16x16x4xbf16>
    %26 = vector.shape_cast %25 : vector<1x16x16x4xbf16> to vector<16x16x4xbf16>
    %27 = vector.shape_cast %26 : vector<16x16x4xbf16> to vector<256x4xbf16>
    %c1_29 = arith.constant 1 : index
    %c0_30 = arith.constant 0 : index
    %c0_31 = arith.constant 0 : index
    %c0_32 = arith.constant 0 : index
    %28 = vector.load %arg6[%c1_29, %c0_30, %c0_31, %c0_32] : memref<3x3x4x128xbf16, #tpu.memory_space<vmem>>, vector<1x1x4x128xbf16>
    %29 = vector.shape_cast %28 : vector<1x1x4x128xbf16> to vector<4x128xbf16>
    %cst_33 = arith.constant dense<0.000000e+00> : vector<256x128xf32>
    %30 = tpu.matmul %27, %29, %cst_33 {dimension_numbers = #tpu.dot_dimension_numbers<[1], [0], [0], [1], [0, 0, 1, 1], [], []>} : vector<256x4xbf16>, vector<4x128xbf16>, vector<256x128xf32> -> vector<256x128xf32>
    %31 = arith.addf %24, %30 : vector<256x128xf32>
    %c0_34 = arith.constant 0 : index
    %c1_35 = arith.constant 1 : index
    %c1_36 = arith.constant 1 : index
    %c0_37 = arith.constant 0 : index
    %32 = vector.load %arg3[%c0_34, %c1_35, %c1_36, %c0_37] : memref<1x18x18x4xbf16, #tpu.memory_space<vmem>>, vector<1x16x16x4xbf16>
    %33 = vector.shape_cast %32 : vector<1x16x16x4xbf16> to vector<16x16x4xbf16>
    %34 = vector.shape_cast %33 : vector<16x16x4xbf16> to vector<256x4xbf16>
    %c1_38 = arith.constant 1 : index
    %c1_39 = arith.constant 1 : index
    %c0_40 = arith.constant 0 : index
    %c0_41 = arith.constant 0 : index
    %35 = vector.load %arg6[%c1_38, %c1_39, %c0_40, %c0_41] : memref<3x3x4x128xbf16, #tpu.memory_space<vmem>>, vector<1x1x4x128xbf16>
    %36 = vector.shape_cast %35 : vector<1x1x4x128xbf16> to vector<4x128xbf16>
    %cst_42 = arith.constant dense<0.000000e+00> : vector<256x128xf32>
    %37 = tpu.matmul %34, %36, %cst_42 {dimension_numbers = #tpu.dot_dimension_numbers<[1], [0], [0], [1], [0, 0, 1, 1], [], []>} : vector<256x4xbf16>, vector<4x128xbf16>, vector<256x128xf32> -> vector<256x128xf32>
    %38 = arith.addf %31, %37 : vector<256x128xf32>
    %c0_43 = arith.constant 0 : index
    %c1_44 = arith.constant 1 : index
    %c2_45 = arith.constant 2 : index
    %c0_46 = arith.constant 0 : index
    %39 = vector.load %arg3[%c0_43, %c1_44, %c2_45, %c0_46] : memref<1x18x18x4xbf16, #tpu.memory_space<vmem>>, vector<1x16x16x4xbf16>
    %40 = vector.shape_cast %39 : vector<1x16x16x4xbf16> to vector<16x16x4xbf16>
    %41 = vector.shape_cast %40 : vector<16x16x4xbf16> to vector<256x4xbf16>
    %c1_47 = arith.constant 1 : index
    %c2_48 = arith.constant 2 : index
    %c0_49 = arith.constant 0 : index
    %c0_50 = arith.constant 0 : index
    %42 = vector.load %arg6[%c1_47, %c2_48, %c0_49, %c0_50] : memref<3x3x4x128xbf16, #tpu.memory_space<vmem>>, vector<1x1x4x128xbf16>
    %43 = vector.shape_cast %42 : vector<1x1x4x128xbf16> to vector<4x128xbf16>
    %cst_51 = arith.constant dense<0.000000e+00> : vector<256x128xf32>
    %44 = tpu.matmul %41, %43, %cst_51 {dimension_numbers = #tpu.dot_dimension_numbers<[1], [0], [0], [1], [0, 0, 1, 1], [], []>} : vector<256x4xbf16>, vector<4x128xbf16>, vector<256x128xf32> -> vector<256x128xf32>
    %45 = arith.addf %38, %44 : vector<256x128xf32>
    %c0_52 = arith.constant 0 : index
    %c2_53 = arith.constant 2 : index
    %c0_54 = arith.constant 0 : index
    %c0_55 = arith.constant 0 : index
    %46 = vector.load %arg3[%c0_52, %c2_53, %c0_54, %c0_55] : memref<1x18x18x4xbf16, #tpu.memory_space<vmem>>, vector<1x16x16x4xbf16>
    %47 = vector.shape_cast %46 : vector<1x16x16x4xbf16> to vector<16x16x4xbf16>
    %48 = vector.shape_cast %47 : vector<16x16x4xbf16> to vector<256x4xbf16>
    %c2_56 = arith.constant 2 : index
    %c0_57 = arith.constant 0 : index
    %c0_58 = arith.constant 0 : index
    %c0_59 = arith.constant 0 : index
    %49 = vector.load %arg6[%c2_56, %c0_57, %c0_58, %c0_59] : memref<3x3x4x128xbf16, #tpu.memory_space<vmem>>, vector<1x1x4x128xbf16>
    %50 = vector.shape_cast %49 : vector<1x1x4x128xbf16> to vector<4x128xbf16>
    %cst_60 = arith.constant dense<0.000000e+00> : vector<256x128xf32>
    %51 = tpu.matmul %48, %50, %cst_60 {dimension_numbers = #tpu.dot_dimension_numbers<[1], [0], [0], [1], [0, 0, 1, 1], [], []>} : vector<256x4xbf16>, vector<4x128xbf16>, vector<256x128xf32> -> vector<256x128xf32>
    %52 = arith.addf %45, %51 : vector<256x128xf32>
    %c0_61 = arith.constant 0 : index
    %c2_62 = arith.constant 2 : index
    %c1_63 = arith.constant 1 : index
    %c0_64 = arith.constant 0 : index
    %53 = vector.load %arg3[%c0_61, %c2_62, %c1_63, %c0_64] : memref<1x18x18x4xbf16, #tpu.memory_space<vmem>>, vector<1x16x16x4xbf16>
    %54 = vector.shape_cast %53 : vector<1x16x16x4xbf16> to vector<16x16x4xbf16>
    %55 = vector.shape_cast %54 : vector<16x16x4xbf16> to vector<256x4xbf16>
    %c2_65 = arith.constant 2 : index
    %c1_66 = arith.constant 1 : index
    %c0_67 = arith.constant 0 : index
    %c0_68 = arith.constant 0 : index
    %56 = vector.load %arg6[%c2_65, %c1_66, %c0_67, %c0_68] : memref<3x3x4x128xbf16, #tpu.memory_space<vmem>>, vector<1x1x4x128xbf16>
    %57 = vector.shape_cast %56 : vector<1x1x4x128xbf16> to vector<4x128xbf16>
    %cst_69 = arith.constant dense<0.000000e+00> : vector<256x128xf32>
    %58 = tpu.matmul %55, %57, %cst_69 {dimension_numbers = #tpu.dot_dimension_numbers<[1], [0], [0], [1], [0, 0, 1, 1], [], []>} : vector<256x4xbf16>, vector<4x128xbf16>, vector<256x128xf32> -> vector<256x128xf32>
    %59 = arith.addf %52, %58 : vector<256x128xf32>
    %c0_70 = arith.constant 0 : index
    %c2_71 = arith.constant 2 : index
    %c2_72 = arith.constant 2 : index
    %c0_73 = arith.constant 0 : index
    %60 = vector.load %arg3[%c0_70, %c2_71, %c2_72, %c0_73] : memref<1x18x18x4xbf16, #tpu.memory_space<vmem>>, vector<1x16x16x4xbf16>
    %61 = vector.shape_cast %60 : vector<1x16x16x4xbf16> to vector<16x16x4xbf16>
    %62 = vector.shape_cast %61 : vector<16x16x4xbf16> to vector<256x4xbf16>
    %c2_74 = arith.constant 2 : index
    %c2_75 = arith.constant 2 : index
    %c0_76 = arith.constant 0 : index
    %c0_77 = arith.constant 0 : index
    %63 = vector.load %arg6[%c2_74, %c2_75, %c0_76, %c0_77] : memref<3x3x4x128xbf16, #tpu.memory_space<vmem>>, vector<1x1x4x128xbf16>
    %64 = vector.shape_cast %63 : vector<1x1x4x128xbf16> to vector<4x128xbf16>
    %cst_78 = arith.constant dense<0.000000e+00> : vector<256x128xf32>
    %65 = tpu.matmul %62, %64, %cst_78 {dimension_numbers = #tpu.dot_dimension_numbers<[1], [0], [0], [1], [0, 0, 1, 1], [], []>} : vector<256x4xbf16>, vector<4x128xbf16>, vector<256x128xf32> -> vector<256x128xf32>
    %66 = arith.addf %59, %65 : vector<256x128xf32>
    %c0_79 = arith.constant 0 : index
    %c0_80 = arith.constant 0 : index
    %c0_81 = arith.constant 0 : index
    %67 = vector.load %arg5[%c0_79, %c0_80, %c0_81] : memref<1x256x128xf32, #tpu.memory_space<vmem>>, vector<1x256x128xf32>
    %68 = vector.shape_cast %67 : vector<1x256x128xf32> to vector<256x128xf32>
    %69 = vector.shape_cast %66 : vector<256x128xf32> to vector<1x256x128xf32>
    tpu.vector_store %arg5[%c0_79, %c0_80, %c0_81], %69 {strides = array<i32>} : memref<1x256x128xf32, #tpu.memory_space<vmem>>, vector<1x256x128xf32>,
    return
  }
  func.func @transform_0(%arg0: i32, %arg1: i32) -> i32 {
    %c0_i32 = arith.constant 0 : i32
    %c0_i32_0 = arith.constant 0 : i32
    return %c0_i32 : i32
  }
  func.func @transform_1(%arg0: i32, %arg1: i32) -> (i32, i32, i32, i32) {
    %c0_i32 = arith.constant 0 : i32
    %c0_i32_0 = arith.constant 0 : i32
    %c0_i32_1 = arith.constant 0 : i32
    %c0_i32_2 = arith.constant 0 : i32
    return %arg1, %c0_i32, %c0_i32_0, %c0_i32_1 : i32, i32, i32, i32
  }
  func.func @transform_2(%arg0: i32, %arg1: i32) -> (i32, i32, i32, i32, i32) {
    %c0_i32 = arith.constant 0 : i32
    %c0_i32_0 = arith.constant 0 : i32
    %c0_i32_1 = arith.constant 0 : i32
    %c0_i32_2 = arith.constant 0 : i32
    %c0_i32_3 = arith.constant 0 : i32
    return %c0_i32, %c0_i32_0, %c0_i32_1, %c0_i32_2, %arg0 : i32, i32, i32, i32, i32
  }
  func.func @transform_3(%arg0: i32, %arg1: i32) -> (i32, i32, i32) {
    %c0_i32 = arith.constant 0 : i32
    %c0_i32_0 = arith.constant 0 : i32
    return %arg1, %c0_i32, %arg0 : i32, i32, i32
  }
}

</mosaic_0001>

<bundles_post_ra>
// kernel: tpu_custom_call.1
= control target key start
LH: loop header
LB: loop body
LE: loop exit
PB: predicated region body
PF: predicated region fallthrough
CT: control target
= control target key end

     0   :  { %8 = vsyncpa [#allocation5], 0  ;;  %s8029_s0 = inlined_call_operand.vmem [shape: f32[3], index: 0, kind: input, shape index: {}]   ;;  %s8030_s1 = inlined_call_operand.vmem [shape: bf16[2,18,18,4], index: 1, kind: input, shape index: {}]   ;;  %s8031_s2 = inlined_call_operand.vmem [shape: f32[3,3,3,4,128], index: 2, kind: input, shape index: {}]   ;;  %s8032_s3 = inlined_call_operand.hbm [shape: f32[2,256,128], index: 3, kind: output, shape index: {}]  }
   0x1   :  { %9 = vsyncpa [#allocation4], 0 }
   0x2   :  { %11 = vsyncpa [#allocation4 + $0x1], 0  ;;  %s5807_s12 = smov 0   ;;  %s5809_s13 = smov 0  }
   0x3   :  { %s5811_s14 = smov 0   ;;  %s5813_s15 = smov 0  }
   0x4   :  { %s5815_s16 = smov 0   ;;  %s5817_s17 = smov 0  }
   0x5 LB: > { %s4662_s18 = sadd.s32 4294967295, %s5779_s17   ;;  %s4663_s19 = sadd.s32 4294967294, %s5779_s17   ;;  %s5779_s17 = sphi %s5817_s17, %s17_s17   ;;  %s5775_s16 = sphi %s5815_s16, %s8172_s16   ;;  %s5771_s15 = sphi %s5813_s15, %s8171_s15   ;;  %s5767_s14 = sphi %s5811_s14, %s8170_s14   ;;  %s5763_s13 = sphi %s5809_s13, %s8169_s13   ;;  %s5759_s12 = sphi %s5807_s12, %s8168_s12  }
   0x6   : > { %s26_s20 = sadd.s32 1, %s5775_s16  ;;  %s111_s21 = sadd.s32 1, %s5767_s14 }
   0x7   : > { %p27_p0 = scmp.ge.s32.totalorder %s26_s20, 2  ;;  %p121_p1 = scmp.ne.s32.totalorder %s5767_s14, %s5763_s13 }
   0x8   : > { %p122_p2 = scmp.eq.s32.totalorder %s4662_s18, 1  ;;  %p127_p3 = scmp.ne.s32.totalorder %s5763_s13, %s5759_s12 }
   0x9   : > { %s8174_s20 = smov (%p27_p0, %s26_s20), 0  ;;  %p128_p5 = scmp.eq.s32.totalorder %s4663_s19, 1 }
   0xa   : > { %p5847_p4 = por %p122_p2, %p121_p1  ;;  %s106_s23 = ssub.s32 %s5775_s16, %s8174_s20 }
   0xb   : > { %p4664_p6 = scmp.ge.s32.totalorder %s5779_s17, 1  ;;  %p109_p7 = scmp.eq.s32.totalorder %s106_s23, 0 }
   0xc   : > { %p5854_p8 = por %p128_p5, %p127_p3  ;;  %p135_p9 = scmp.lt.s32.totalorder %s5779_s17, 3 }
   0xd   : > { %s5860_s25 = scalar_select %p109_p7, %s5767_s14, %s111_s21  }
   0xe   : > { %p136_p10 = pnand %p4664_p6, %p135_p9  ;;  %p5563_p11 = scmp.eq.s32.totalorder %s4662_s18, 0 }
   0xf   : > { %s147_s28 = sshll.u32 %s8029_s0, 4  ;;  %s5781_s29 = smov [#allocation3]   ;;  %s148_s28 = int_to_ptr.vmem [resolvable:$true] %s147_s28 }
  0x10   : > { %p5555_p12 = pneg %p136_p10  ;;  %175 = sbr.rel (%p136_p10) target bundleno = 918 (0x396), region = 32 }
  0x12   : > { %p5556_p13 = pnand %p5563_p11, %p5555_p12 }
  0x14   : > { %5558 = dma.vmem_to_smem (!%p5556_p13), %s148_s28, 16, %s5781_s29, [#allocation5]  }
  0x15   : > { %5750 = dma.done.wait (%p5563_p11), [#allocation5], 16  }
  0x16   : > { %5752 = vsyncadd (%p5563_p11), [#allocation5], 4294967280 }
  0x17   : > { %182 = sfence }
  0x18   : > { %s202_s30 = sand.u32 1, %s5763_s13   ;;  %p205_p0 = scmp.lt.s32.totalorder %s5771_s15, 1 }
  0x19   : > { %s4670_s4 = sshll.u32 %s202_s30, 8  ;;  %p4672_p1 = scmp.ne.s32.totalorder %s5771_s15, 0 }
  0x1a   : > { %s206_s5 = scalar_select %p205_p0, %s5771_s15, 1 }
  0x1b   : > { %s5875_s10 = scalar_lea.vmem [#allocation6], %s4670_s4  ;;  %218 = sbr.rel (%p4672_p1) target bundleno = 176 (0xb0), region = 40 }
  0x1c   : > { %s5326_s6 = smul.u32 216, %s206_s5 }
  0x1e   : > { %s5873_s9 = scalar_lea.vmem %s8030_s1, %s5326_s6 }
  0x20   : > { %v5881_v0 = vld [vmem:[%s8031_s2] sm:$0xf]  ;;  %v5886_v1 = vld [vmem:[%s8031_s2 + $0x4] sm:$0xf]  ;;  %v5891_v2 = vld [vmem:[%s8031_s2 + $0x8] sm:$0xf] }
  0x21   : > { %v5896_v3 = vld [vmem:[%s8031_s2 + $0xc] sm:$0xf]  ;;  %v5901_v4 = vld [vmem:[%s8031_s2 + $0x10] sm:$0xf]  ;;  %v5906_v5 = vld [vmem:[%s8031_s2 + $0x14] sm:$0xf] }
  0x22   : > { %v5911_v6 = vld [vmem:[%s8031_s2 + $0x18] sm:$0xf]  ;;  %v5916_v7 = vld [vmem:[%s8031_s2 + $0x1c] sm:$0xf]  ;;  %vm228_vm0 = vcmask 1043456   ;;  %v5782_v45 = vmov 3.0  }
  0x23   : > { %v5921_v8 = vld [vmem:[%s8031_s2 + $0x20] sm:$0xf]  ;;  %v229_v9 = vsel %vm228_vm0, %v5881_v0, -inf  ;;  %v230_v10 = vsel %vm228_vm0, %v5886_v1, -inf  ;;  %v231_v11 = vsel %vm228_vm0, %v5891_v2, -inf  ;;  %v232_v12 = vsel %vm228_vm0, %v5896_v3, -inf }
  0x24   : > { %v233_v13 = vsel %vm228_vm0, %v5901_v4, -inf  ;;  %v235_v14 = vsel %vm228_vm0, %v5906_v5, -inf  ;;  %v237_v15 = vsel %vm228_vm0, %v5911_v6, -inf  ;;  %v239_v16 = vsel %vm228_vm0, %v5916_v7, -inf  ;;  %v5950_v25 = vld [vmem:[%s8031_s2 + $0x24] sm:$0xf] }
  0x25   : > { %v234_v17 = vmax.f32 %v229_v9, %v233_v13  ;;  %v236_v18 = vmax.f32 %v230_v10, %v235_v14  ;;  %v238_v19 = vmax.f32 %v231_v11, %v237_v15  ;;  %v240_v20 = vmax.f32 %v232_v12, %v239_v16  ;;  %v5959_v30 = vld [vmem:[%s8031_s2 + $0x28] sm:$0xf]  ;;  %v5964_v31 = vld [vmem:[%s8031_s2 + $0x2c] sm:$0xf]  ;;  %v5975_v36 = vld [vmem:[%s8031_s2 + $0x30] sm:$0xf] }
  0x26   : > { %v241_v21 = vsel %vm228_vm0, %v5921_v8, -inf  ;;  %v252_v22 = vsel %vm228_vm0, %v5881_v0, inf  ;;  %v253_v23 = vsel %vm228_vm0, %v5886_v1, inf  ;;  %v254_v24 = vsel %vm228_vm0, %v5891_v2, inf  ;;  %v5980_v41 = vld [vmem:[%s8031_s2 + $0x34] sm:$0xf] }
  0x27   : > { %v242_v26 = vmax.f32 %v234_v17, %v241_v21  ;;  %v244_v27 = vmax.f32 %v238_v19, %v240_v20  ;;  %v255_v28 = vsel %vm228_vm0, %v5896_v3, inf  ;;  %v256_v29 = vsel %vm228_vm0, %v5901_v4, inf  ;;  %v5985_v42 = vld [vmem:[%s8031_s2 + $0x38] sm:$0xf]  ;;  %v5990_v43 = vld [vmem:[%s8031_s2 + $0x3c] sm:$0xf] }
  0x28   : > { %v257_v32 = vmin.f32 %v252_v22, %v256_v29  ;;  %v258_v33 = vsel %vm228_vm0, %v5906_v5, inf  ;;  %v260_v34 = vsel %vm228_vm0, %v5911_v6, inf  ;;  %v262_v35 = vsel %vm228_vm0, %v5916_v7, inf  ;;  %v6001_v51 = vld [vmem:[%s8031_s2 + $0x40] sm:$0xf]  ;;  %s6344_s7 = sld [smem:[#allocation3]] }
  0x29   : > { %v243_v37 = vmax.f32 %v242_v26, %v236_v18  ;;  %v259_v38 = vmin.f32 %v253_v23, %v258_v33  ;;  %v261_v39 = vmin.f32 %v254_v24, %v260_v34  ;;  %v263_v40 = vmin.f32 %v255_v28, %v262_v35  ;;  %v6006_v52 = vld [vmem:[%s8031_s2 + $0x44] sm:$0xf]  ;;  %s6364_s8 = sld [smem:[#allocation3 + $0x1]] }
  0x2a   : > { %v264_v44 = vsel %vm228_vm0, %v5921_v8, inf  ;;  %5620 = vrcp.f32 %v5782_v45  ;;  %v351_v46 = vsel %vm228_vm0, %v5950_v25, -inf  ;;  %v352_v47 = vsel %vm228_vm0, %v5959_v30, -inf  ;;  %s6573_s23 = sld [smem:[#allocation3 + $0x2]] }
  0x2b   : > { %v245_v48 = vmax.f32 %v243_v37, %v244_v27  ;;  %v265_v49 = vmin.f32 %v257_v32, %v264_v44  ;;  %v267_v50 = vmin.f32 %v261_v39, %v263_v40  ;;  %v353_v53 = vsel %vm228_vm0, %v5964_v31, -inf }
  0x2c   : > { %v354_v54 = vsel %vm228_vm0, %v5975_v36, -inf  ;;  %v355_v55 = vsel %vm228_vm0, %v5980_v41, -inf  ;;  %v357_v56 = vsel %vm228_vm0, %v5985_v42, -inf  ;;  %v359_v57 = vsel %vm228_vm0, %v5990_v43, -inf }
  0x2d   : > { %v246_v58 = vrot.slane %v245_v48, 4  ;;  %v266_v59 = vmin.f32 %v265_v49, %v259_v38  ;;  %v356_v60 = vmax.f32 %v351_v46, %v355_v55  ;;  %v358_v61 = vmax.f32 %v352_v47, %v357_v56  ;;  %v6043_v46 = vld [vmem:[%s8031_s2 + $0x48] sm:$0xf]  ;;  %v6053_v56 = vld [vmem:[%s8031_s2 + $0x50] sm:$0xf] }
  0x2e   : > { %v360_v62 = vmax.f32 %v353_v53, %v359_v57  ;;  %v361_v63 = vsel %vm228_vm0, %v6001_v51, -inf  ;;  %v363_v9 = vsel %vm228_vm0, %v6006_v52, -inf  ;;  %v374_v10 = vsel %vm228_vm0, %v5950_v25, inf  ;;  %8053 = vst [vmem:[#allocation9_spill] sm:$0xff] %v6043_v46  ;;  %v6058_v57 = vld [vmem:[%s8031_s2 + $0x58] sm:$0xf] }
  0x2f   : > { %v247_v11 = vmax.f32 %v245_v48, %v246_v58  ;;  %v268_v12 = vmin.f32 %v266_v59, %v267_v50  ;;  %v362_v13 = vmax.f32 %v354_v54, %v361_v63  ;;  %v364_v14 = vmax.f32 %v356_v60, %v363_v9  ;;  %v6048_v50 = vld [vmem:[%s8031_s2 + $0x4c] sm:$0xf]  ;;  %8055 = vst [vmem:[#allocation11_spill] sm:$0xff] %v6053_v56 }
  0x30   : > { %v5621_v15 = vpop.eup %5620  ;;  %v375_v16 = vsel %vm228_vm0, %v5959_v30, inf  ;;  %v376_v17 = vsel %vm228_vm0, %v5964_v31, inf  ;;  %v377_v18 = vsel %vm228_vm0, %v5975_v36, inf  ;;  %v378_v19 = vsel %vm228_vm0, %v5980_v41, inf  ;;  %8054 = vst [vmem:[#allocation10_spill] sm:$0xff] %v6048_v50 }
  0x31   : > { %v248_v20 = vrot.slane %v247_v11, 2  ;;  %v269_v21 = vrot.slane %v268_v12, 4  ;;  %v295_v22 = vmul.f32 3.0, %v5621_v15  ;;  %vm299_vm1 = vweird.f32 %v5621_v15  ;;  %8056 = vst [vmem:[#allocation12_spill] sm:$0xff] %v6058_v57 }
  0x32   : > { %v365_v23 = vmax.f32 %v364_v14, %v358_v61  ;;  %v366_v24 = vmax.f32 %v360_v62, %v362_v13  ;;  %v379_v26 = vmin.f32 %v374_v10, %v378_v19  ;;  %v380_v27 = vsel %vm228_vm0, %v5985_v42, inf  ;;  %v6063_v61 = vld [vmem:[%s8031_s2 + $0x5c] sm:$0xf]  ;;  %v6068_v62 = vld [vmem:[%s8031_s2 + $0x60] sm:$0xf] }
  0x33   : > { %v249_v28 = vmax.f32 %v247_v11, %v248_v20  ;;  %v270_v29 = vmin.f32 %v268_v12, %v269_v21  ;;  %v296_v32 = vsub.f32 1.0, %v295_v22  ;;  %v381_v33 = vmin.f32 %v375_v16, %v380_v27  ;;  %8057 = vst [vmem:[#allocation13_spill] sm:$0xff] %v6063_v61  ;;  %v6076_v12 = vld [vmem:[%s8031_s2 + $0x54] sm:$0xf]  ;;  %v6081_v13 = vld [vmem:[%s8031_s2 + $0x64] sm:$0xf] }
  0x34   : > { %v367_v34 = vmax.f32 %v365_v23, %v366_v24  ;;  %v382_v35 = vsel %vm228_vm0, %v5990_v43, inf  ;;  %v384_v37 = vsel %vm228_vm0, %v6001_v51, inf  ;;  %v386_v38 = vsel %vm228_vm0, %v6006_v52, inf  ;;  %8058 = vst [vmem:[#allocation14_spill] sm:$0xff] %v6068_v62 }
  0x35   : > { %v250_v39 = vrot.slane %v249_v28, 1  ;;  %v271_v40 = vrot.slane %v270_v29, 2  ;;  %v297_v44 = vmul.f32 %v5621_v15, %v296_v32  ;;  %v383_v45 = vmin.f32 %v376_v17, %v382_v35  ;;  %8059 = vst [vmem:[#allocation15_spill] sm:$0xff] %v6076_v12 }
  0x36   : > { %v368_v47 = vrot.slane %v367_v34, 4  ;;  %v385_v48 = vmin.f32 %v377_v18, %v384_v37  ;;  %v387_v49 = vmin.f32 %v379_v26, %v386_v38  ;;  %v5783_v55 = vmov 15.0   ;;  %8060 = vst [vmem:[#allocation16_spill] sm:$0xff] %v6081_v13 }
  0x37   : > { %v272_v53 = vmin.f32 %v270_v29, %v271_v40  ;;  %v298_v54 = vadd.f32 %v5621_v15, %v297_v44  ;;  %5622 = vrcp.f32 %v5783_v55  ;;  %v473_v63 = vsel %vm228_vm0, %v6043_v46, -inf }
  0x38   : > { %v369_v58 = vmax.f32 %v367_v34, %v368_v47  ;;  %v388_v59 = vmin.f32 %v387_v49, %v381_v33  ;;  %v389_v60 = vmin.f32 %v383_v45, %v385_v48  ;;  %v251_v9 = vmax.f32 %v249_v28, %v250_v39 }
  0x39   : > { %v273_v10 = vrot.slane %v272_v53, 1  ;;  %v300_v11 = vsel %vm299_vm1, %v5621_v15, %v298_v54  ;;  %v474_v14 = vsel %vm228_vm0, %v6048_v50, -inf  ;;  %v6088_v15 = vld [vmem:[%s8031_s2 + $0x68] sm:$0xf]  ;;  %v475_v18 = vsel %vm228_vm0, %v6053_v56, -inf }
  0x3a   : > { %5327 = vpush %v300_v11  ;;  %v370_v16 = vrot.slane %v369_v58, 2  ;;  %v390_v17 = vmin.f32 %v388_v59, %v389_v60  ;;  %v477_v19 = vsel %vm228_vm0, %v6058_v57, -inf  ;;  %v479_v22 = vsel %vm228_vm0, %v6063_v61, -inf }
  0x3b   : > { %8061 = vst [vmem:[#allocation17_spill] sm:$0xff] %v6088_v15  ;;  %v274_v20 = vmin.f32 %v272_v53, %v273_v10  ;;  %v478_v21 = vmax.f32 %v473_v63, %v477_v19  ;;  %v481_v23 = vsel %vm228_vm0, %v6068_v62, -inf  ;;  %v476_v27 = vsel %vm228_vm0, %v6076_v12, -inf }
  0x3c   : > { %v371_v24 = vmax.f32 %v369_v58, %v370_v16  ;;  %v391_v26 = vrot.slane %v390_v17, 4  ;;  %v483_v32 = vsel %vm228_vm0, %v6081_v13, -inf  ;;  %v485_v33 = vsel %vm228_vm0, %v6088_v15, -inf }
  0x3d   : > { %v5623_v28 = vpop.eup %5622  ;;  %v275_v29 = vsub.f32 %v251_v9, %v274_v20  ;;  %v480_v37 = vmax.f32 %v474_v14, %v479_v22  ;;  %v482_v38 = vmax.f32 %v475_v18, %v481_v23  ;;  %v484_v40 = vmax.f32 %v476_v27, %v483_v32 }
  0x3e   : > { %v392_v34 = vmin.f32 %v390_v17, %v391_v26  ;;  %v417_v35 = vmul.f32 15.0, %v5623_v28  ;;  %v372_v39 = vrot.slane %v371_v24, 1  ;;  %v486_v44 = vmax.f32 %v478_v21, %v485_v33 }
  0x3f   : > { %vm276_vm2 = vcmp.eq.f32.partialorder %v275_v29, 0.0  ;;  %v496_v49 = vsel %vm228_vm0, %v6043_v46, inf  ;;  %v488_v58 = vmax.f32 %v482_v38, %v484_v40  ;;  %vm421_vm3 = vweird.f32 %v5623_v28 }
  0x40   : > { %v6104_v45 = vsel %vm276_vm2, 1.0, %v275_v29  ;;  %v393_v47 = vrot.slane %v392_v34, 2  ;;  %v418_v48 = vsub.f32 1.0, %v417_v35  ;;  %v487_v55 = vmax.f32 %v486_v44, %v480_v37 }
  0x41   : > { %5624 = vrcp.f32 %v6104_v45  ;;  %v373_v59 = vmax.f32 %v371_v24, %v372_v39  ;;  %v497_v60 = vsel %vm228_vm0, %v6048_v50, inf  ;;  %v500_v11 = vsel %vm228_vm0, %v6058_v57, inf }
  0x42   : > { %v394_v53 = vmin.f32 %v392_v34, %v393_v47  ;;  %v419_v54 = vmul.f32 %v5623_v28, %v418_v48  ;;  %v489_v10 = vmax.f32 %v487_v55, %v488_v58  ;;  %v498_v14 = vsel %vm228_vm0, %v6053_v56, inf }
  0x43   : > { %v499_v16 = vsel %vm228_vm0, %v6076_v12, inf  ;;  %v501_v17 = vmin.f32 %v496_v49, %v500_v11  ;;  %v502_v18 = vsel %vm228_vm0, %v6063_v61, inf  ;;  %v504_v21 = vsel %vm228_vm0, %v6068_v62, inf }
  0x44   : > { %v395_v63 = vrot.slane %v394_v53, 1  ;;  %v420_v9 = vadd.f32 %v5623_v28, %v419_v54  ;;  %v506_v22 = vsel %vm228_vm0, %v6081_v13, inf  ;;  %v490_v24 = vrot.slane %v489_v10, 4 }
  0x45   : > { %v508_v26 = vsel %vm228_vm0, %v6088_v15, inf  ;;  %v289_v29 = vand.u32 2147483648, %v6104_v45  ;;  %v503_v32 = vmin.f32 %v497_v60, %v502_v18  ;;  %v505_v34 = vmin.f32 %v498_v14, %v504_v21 }
  0x46   : > { %v396_v19 = vmin.f32 %v394_v53, %v395_v63  ;;  %v422_v20 = vsel %vm421_vm3, %v5623_v28, %v420_v9  ;;  %v507_v28 = vmin.f32 %v499_v16, %v506_v22  ;;  %v509_v35 = vmin.f32 %v501_v17, %v508_v26 }
  0x47   : > { %v5625_v23 = vpop.eup %5624  ;;  %5401 = vpush %v422_v20  ;;  %vm283_vm4 = vweird.f32 %v6104_v45  ;;  %v287_v38 = vand.u32 2147483647, %v6104_v45  ;;  %v491_v39 = vmax.f32 %v489_v10, %v490_v24  ;;  %v290_v44 = vor.u32 1.1754944e-38, %v289_v29 }
  0x48   : > { %v279_v27 = vmul.f32 %v5625_v23, %v6104_v45  ;;  %v397_v33 = vsub.f32 %v373_v59, %v396_v19  ;;  %vm284_vm5 = vweird.f32 %v5625_v23  ;;  %v510_v47 = vmin.f32 %v509_v35, %v503_v32 }
  0x49   : > { %vm285_vm6 = vmor %vm283_vm4, %vm284_vm5  ;;  %v511_v48 = vmin.f32 %v505_v34, %v507_v28  ;;  %vm288_vm8 = vcmp.eq.f32.partialorder %v287_v38, 8.507059e+37  ;;  %v492_v53 = vrot.slane %v491_v39, 2  ;;  %v5784_v54 = vmov 255.0  }
  0x4a   : > { %v280_v37 = vsub.f32 1.0, %v279_v27  ;;  %vm398_vm7 = vcmp.eq.f32.partialorder %v397_v33, 0.0  ;;  %5626 = vrcp.f32 %v5784_v54 }
  0x4b   : > { %v6129_v58 = vsel %vm398_vm7, 1.0, %v397_v33  ;;  %v512_v60 = vmin.f32 %v510_v47, %v511_v48  ;;  %v493_v9 = vmax.f32 %v491_v39, %v492_v53 }
  0x4c   : > { %v281_v40 = vmul.f32 %v5625_v23, %v280_v37  ;;  %5628 = vrcp.f32 %v6129_v58  ;;  %v411_v19 = vand.u32 2147483648, %v6129_v58  ;;  %vm405_vm9 = vweird.f32 %v6129_v58 }
  0x4d   : > { %v513_v16 = vrot.slane %v512_v60, 4  ;;  %v494_v20 = vrot.slane %v493_v9, 1 }
  0x4e   : > { %v282_v49 = vadd.f32 %v5625_v23, %v281_v40  ;;  %v6156_v27 = vor.u32 1.1754944e-38, %v411_v19 }
  0x4f   : > { %v6158_v29 = vmax.f32 %v493_v9, %v494_v20 }
  0x50   : > { %v286_v55 = vsel %vm285_vm6, %v5625_v23, %v282_v49  ;;  %v6135_v11 = vpop.eup %5626  ;;  %v514_v23 = vmin.f32 %v512_v60, %v513_v16 }
  0x51   : > { %v291_v59 = vsel %vm288_vm8, %v290_v44, %v286_v55  ;;  %v6146_v21 = vmul.f32 255.0, %v6135_v11  ;;  %vm543_vm11 = vweird.f32 %v6135_v11 }
  0x52   : > { %v292_v63 = vmul.f32 3.0, %v291_v59  ;;  %v6148_v22 = vpop.eup %5628  ;;  %v515_v38 = vrot.slane %v514_v23, 2 }
  0x53   : > { %v401_v34 = vmul.f32 %v6148_v22, %v6129_v58  ;;  %v540_v28 = vsub.f32 1.0, %v6146_v21  ;;  %vm406_vm12 = vweird.f32 %v6148_v22 }
  0x54   : > { %v6133_v10 = vmul.f32 %v292_v63, %v5881_v0  ;;  %v6138_v14 = vmul.f32 %v292_v63, %v5886_v1  ;;  %v6141_v17 = vmul.f32 %v292_v63, %v5891_v2  ;;  %v6153_v26 = vmul.f32 %v292_v63, %v5896_v3  ;;  %vm6239_vm2 = vmor %vm405_vm9, %vm406_vm12 }
  0x55   : > { %v409_v2 = vand.u32 2147483647, %v6129_v58  ;;  %v6161_v32 = vmul.f32 %v292_v63, %v5901_v4  ;;  %v6168_v35 = vmul.f32 %v292_v63, %v5906_v5  ;;  %v6171_v3 = vmul.f32 %v292_v63, %v5911_v6 }
  0x56   : > { %v5331_v18 = vcvt.f32.s32 %v6133_v10  ;;  %v5339_v0 = vcvt.f32.s32 %v6138_v14  ;;  %v5347_v1 = vcvt.f32.s32 %v6141_v17  ;;  %v5329_v33 = vand.u32 2147483647, %v6133_v10 }
  0x57   : > { %v6175_v4 = vmul.f32 %v292_v63, %v5916_v7  ;;  %v5334_v40 = vand.u32 2147483648, %v6133_v10  ;;  %v6179_v47 = vmul.f32 %v292_v63, %v5921_v8  ;;  %v5337_v5 = vand.u32 2147483647, %v6138_v14 }
  0x58   : > { %v5332_v24 = vcvt.s32.f32 %v5331_v18  ;;  %v5340_v37 = vcvt.s32.f32 %v5339_v0  ;;  %v5348_v44 = vcvt.s32.f32 %v5347_v1  ;;  %v5345_v48 = vand.u32 2147483647, %v6141_v17 }
  0x59   : > { %8062 = vst [vmem:[#allocation18_spill] sm:$0xff] %v6179_v47  ;;  %v5355_v6 = vcvt.f32.s32 %v6153_v26  ;;  %vm6184_vm10 = vcmp.lt.f32.partialorder %v5329_v33, 8388608.0  ;;  %v5342_v7 = vand.u32 2147483648, %v6138_v14  ;;  %v5350_v53 = vand.u32 2147483648, %v6141_v17 }
  0x5a   : > { %v5333_v39 = vand.u32 2147483647, %v5332_v24  ;;  %v5363_v54 = vcvt.f32.s32 %v6161_v32  ;;  %v5341_v8 = vand.u32 2147483647, %v5340_v37  ;;  %v5353_v55 = vand.u32 2147483647, %v6153_v26 }
  0x5b   : > { %v5361_v59 = vand.u32 2147483647, %v6161_v32  ;;  %vm6195_vm13 = vcmp.eq.f32.partialorder %v409_v2, 8.507059e+37  ;;  %v5349_v9 = vand.u32 2147483647, %v5348_v44  ;;  %v5371_v16 = vcvt.f32.s32 %v6168_v35 }
  0x5c   : > { %v6199_v63 = vor.u32 %v5334_v40, %v5333_v39  ;;  %v5379_v18 = vcvt.f32.s32 %v6171_v3  ;;  %vm6203_vm14 = vcmp.lt.f32.partialorder %v5337_v5, 8388608.0  ;;  %vm6207_vm15 = vcmp.lt.f32.partialorder %v5345_v48, 8388608.0 }
  0x5d   : > { %v5356_v21 = vcvt.s32.f32 %v5355_v6  ;;  %v5387_v0 = vcvt.f32.s32 %v6175_v4  ;;  %v5358_v24 = vand.u32 2147483648, %v6153_v26  ;;  %v5364_v1 = vcvt.s32.f32 %v5363_v54 }
  0x5e   : > { %v5366_v2 = vand.u32 2147483648, %v6161_v32  ;;  %v5395_v33 = vcvt.f32.s32 %v6179_v47  ;;  %v6215_v37 = vor.u32 %v5342_v7, %v5341_v8  ;;  %v5369_v39 = vand.u32 2147483647, %v6168_v35 }
  0x5f   : > { %v402_v40 = vsub.f32 1.0, %v401_v34  ;;  %v516_v44 = vmin.f32 %v514_v23, %v515_v38  ;;  %v6222_v48 = vor.u32 %v5350_v53, %v5349_v9  ;;  %vm6224_vm0 = vcmp.lt.f32.partialorder %v5353_v55, 8388608.0 }
  0x60   : > { %vm6228_vm1 = vcmp.lt.f32.partialorder %v5361_v59, 8388608.0  ;;  %v5372_v7 = vcvt.s32.f32 %v5371_v16  ;;  %v5380_v8 = vcvt.s32.f32 %v5379_v18  ;;  %v5357_v15 = vand.u32 2147483647, %v5356_v21 }
  0x61   : > { %v5388_v34 = vcvt.s32.f32 %v5387_v0  ;;  %v403_v23 = vmul.f32 %v6148_v22, %v402_v40  ;;  %v541_v38 = vmul.f32 %v6135_v11, %v540_v28  ;;  %v5365_v13 = vand.u32 2147483647, %v5364_v1 }
  0x62   : > { %v5374_v53 = vand.u32 2147483648, %v6168_v35  ;;  %v5396_v9 = vcvt.s32.f32 %v5395_v33  ;;  %v517_v59 = vrot.slane %v516_v44, 1  ;;  %v5377_v16 = vand.u32 2147483647, %v6171_v3 }
  0x63   : > { %v5382_v18 = vand.u32 2147483648, %v6171_v3  ;;  %v404_v21 = vadd.f32 %v6148_v22, %v403_v23  ;;  %v542_v28 = vadd.f32 %v6135_v11, %v541_v38  ;;  %v5373_v1 = vand.u32 2147483647, %v5372_v7 }
  0x64   : > { %v5381_v33 = vand.u32 2147483647, %v5380_v8  ;;  %v5385_v40 = vand.u32 2147483647, %v6175_v4  ;;  %v5389_v5 = vand.u32 2147483647, %v5388_v34  ;;  %v518_v8 = vmin.f32 %v516_v44, %v517_v59 }
  0x65   : > { %v5390_v62 = vand.u32 2147483648, %v6175_v4  ;;  %v408_v61 = vsel %vm6239_vm2, %v6148_v22, %v404_v21  ;;  %v544_v23 = vsel %vm543_vm11, %v6135_v11, %v542_v28  ;;  %v5397_v38 = vand.u32 2147483647, %v5396_v9 }
  0x66   : > { %v5398_v57 = vand.u32 2147483648, %v6179_v47  ;;  %v413_v7 = vsel %vm6195_vm13, %v6156_v27, %v408_v61  ;;  %5475 = vpush %v544_v23  ;;  %v6263_v34 = vor.u32 %v5358_v24, %v5357_v15  ;;  %v6265_v0 = vor.u32 %v5366_v2, %v5365_v13 }
  0x67   : > { %v5393_v55 = vand.u32 2147483647, %v6179_v47  ;;  %v414_v22 = vmul.f32 15.0, %v413_v7  ;;  %vm6272_vm3 = vcmp.lt.f32.partialorder %v5369_v39, 8388608.0  ;;  %v6276_v60 = vor.u32 %v5374_v53, %v5373_v1 }
  0x68   : > { %v6278_v61 = vor.u32 %v5382_v18, %v5381_v33  ;;  %v6280_v15 = vor.u32 %v5390_v62, %v5389_v5  ;;  %vm6291_vm4 = vcmp.lt.f32.partialorder %v5377_v16, 8388608.0  ;;  %vm6295_vm5 = vcmp.lt.f32.partialorder %v5385_v40, 8388608.0 }
  0x69   : > { %v6283_v13 = vmul.f32 %v5950_v25, %v414_v22  ;;  %v6286_v27 = vmul.f32 %v5959_v30, %v414_v22  ;;  %v6289_v24 = vmul.f32 %v5964_v31, %v414_v22  ;;  %v6299_v44 = vor.u32 %v5398_v57, %v5397_v38 }
  0x6a   : > { %v519_v62 = vsub.f32 %v6158_v29, %v518_v8  ;;  %vm6310_vm6 = vcmp.lt.f32.partialorder %v5393_v55, 8388608.0  ;;  %v6320_v29 = vmul.f32 %v5975_v36, %v414_v22  ;;  %v6323_v53 = vmul.f32 %v5980_v41, %v414_v22 }
  0x6b   : > { %8079 = vst [vmem:[#allocation19_spill] sm:$0xff] %v6283_v13  ;;  %v5405_v5 = vcvt.f32.s32 %v6283_v13  ;;  %v5413_v59 = vcvt.f32.s32 %v6286_v27  ;;  %v5421_v28 = vcvt.f32.s32 %v6289_v24  ;;  %v6340_v41 = vmul.f32 %v5985_v42, %v414_v22  ;;  %s6385_s11 = spop %5327 }
  0x6c   : > { %8080 = vst [vmem:[#allocation20_spill] sm:$0xff] %v6286_v27  ;;  %vm520_vm7 = vcmp.eq.f32.partialorder %v519_v62, 0.0  ;;  %v5403_v33 = vand.u32 2147483647, %v6283_v13  ;;  %v5408_v23 = vand.u32 2147483648, %v6283_v13  ;;  %v5416_v8 = vand.u32 2147483648, %v6286_v27  ;;  %s302_s18 = smul.f32 %s6385_s11, %s6344_s7 }
  0x6d   : > { %v5406_v21 = vcvt.s32.f32 %v5405_v5  ;;  %v5414_v1 = vcvt.s32.f32 %v5413_v59  ;;  %v5422_v38 = vcvt.s32.f32 %v5421_v28  ;;  %v5429_v55 = vcvt.f32.s32 %v6320_v29 }
  0x6e   : > { %v5437_v5 = vcvt.f32.s32 %v6323_v53  ;;  %v6350_v42 = vmul.f32 %v5990_v43, %v414_v22  ;;  %v5411_v59 = vand.u32 2147483647, %v6286_v27  ;;  %v5419_v36 = vand.u32 2147483647, %v6289_v24 }
  0x6f   : > { %v5407_v40 = vand.u32 2147483647, %v5406_v21  ;;  %v5415_v7 = vand.u32 2147483647, %v5414_v1  ;;  %v6354_v21 = vsel %vm520_vm7, 1.0, %v519_v62  ;;  %v6357_v28 = vmul.f32 %v6001_v51, %v414_v22 }
  0x70   : > { %v6360_v1 = vmul.f32 %v6006_v52, %v414_v22  ;;  %v5424_v18 = vand.u32 2147483648, %v6289_v24  ;;  %v5427_v16 = vand.u32 2147483647, %v6320_v29  ;;  %v5423_v57 = vand.u32 2147483647, %v5422_v38 }
  0x71   : > { %v6366_v43 = vor.u32 %v5408_v23, %v5407_v40  ;;  %v5435_v30 = vand.u32 2147483647, %v6323_v53  ;;  %v5445_v62 = vcvt.f32.s32 %v6340_v41  ;;  %vm6370_vm8 = vcmp.lt.f32.partialorder %v5403_v33, 8388608.0 }
  0x72   : > { %v8088_v25 = vmov 0  ;;  %v6374_v51 = vor.u32 %v5416_v8, %v5415_v7  ;;  %v5430_v52 = vcvt.s32.f32 %v5429_v55  ;;  %v5438_v22 = vcvt.s32.f32 %v5437_v5 }
  0x73   : > { %8087 = vst [vmem:[#allocation21_spill] sm:$0xff] %v6366_v43  ;;  %v8089_v25 = vsel %vm6370_vm8, 4294967295, %v8088_v25  ;;  %vm6376_vm9 = vcmp.lt.f32.partialorder %v5411_v59, 8388608.0  ;;  %v8092_v11 = vmov 0  ;;  %vm6380_vm11 = vcmp.lt.f32.partialorder %v5419_v36, 8388608.0  ;;  %v8129_v39 = vld [vmem:[#allocation20_spill] sm:$0xff] }
  0x74   : > { %8090 = vst [vmem:[#allocation22_spill] sm:$0xff] %v8089_v25  ;;  %v8093_v11 = vsel %vm6376_vm9, 4294967295, %v8092_v11  ;;  %v5432_v23 = vand.u32 2147483648, %v6320_v29  ;;  %v5446_v38 = vcvt.s32.f32 %v5445_v62  ;;  %vm6387_vm12 = vcmp.lt.f32.partialorder %v5427_v16, 8388608.0 }
  0x75   : > { %8091 = vst [vmem:[#allocation23_spill] sm:$0xff] %v6374_v51  ;;  %v5440_v7 = vand.u32 2147483648, %v6323_v53  ;;  %v5443_v8 = vand.u32 2147483647, %v6340_v41  ;;  %v5453_v36 = vcvt.f32.s32 %v6350_v42  ;;  %v6398_v5 = vor.u32 %v5424_v18, %v5423_v57 }
  0x76   : > { %8094 = vst [vmem:[#allocation24_spill] sm:$0xff] %v8093_v11  ;;  %vm6400_vm13 = vcmp.lt.f32.partialorder %v5435_v30, 8388608.0  ;;  %v5461_v16 = vcvt.f32.s32 %v6357_v28  ;;  %v5431_v12 = vand.u32 2147483647, %v5430_v52  ;;  %v5439_v56 = vand.u32 2147483647, %v5438_v22 }
  0x77   : > { %v5454_v50 = vcvt.s32.f32 %v5453_v36  ;;  %v5447_v57 = vand.u32 2147483647, %v5446_v38  ;;  %v5448_v30 = vand.u32 2147483648, %v6340_v41  ;;  %v5469_v55 = vcvt.f32.s32 %v6360_v1 }
  0x78   : > { %s6411_s19 = spop %5401  ;;  %v5462_v18 = vcvt.s32.f32 %v5461_v16  ;;  %vm6415_vm2 = vcmp.lt.f32.partialorder %v5443_v8, 8388608.0  ;;  %v5456_v52 = vand.u32 2147483648, %v6350_v42  ;;  %5630 = vrcp.f32 %v6354_v21 }
  0x79   : > { %v5455_v11 = vand.u32 2147483647, %v5454_v50  ;;  %v5451_v22 = vand.u32 2147483647, %v6350_v42  ;;  %v5464_v62 = vand.u32 2147483648, %v6357_v28  ;;  %v5470_v38 = vcvt.s32.f32 %v5469_v55  ;;  %s424_s21 = smul.f32 %s6411_s19, %s6364_s8 }
  0x7a   : > { %v5463_v36 = vand.u32 2147483647, %v5462_v18  ;;  %v5433_v27 = vor.u32 %v5432_v23, %v5431_v12  ;;  %v5441_v16 = vor.u32 %v5440_v7, %v5439_v56  ;;  %v5459_v51 = vand.u32 2147483647, %v6357_v28 }
  0x7b   : > { %v303_v8 = vstv %s302_s18  ;;  %v5449_v13 = vor.u32 %v5448_v30, %v5447_v57  ;;  %v5467_v43 = vand.u32 2147483647, %v6360_v1  ;;  %v5471_v50 = vand.u32 2147483647, %v5470_v38 }
  0x7c   : > { %v5472_v25 = vand.u32 2147483648, %v6360_v1  ;;  %v5426_v18 = vsel %vm6380_vm11, %v6398_v5, %v6289_v24  ;;  %v5457_v47 = vor.u32 %v5456_v52, %v5455_v11  ;;  %v531_v55 = vand.u32 2147483647, %v6354_v21  ;;  %v8128_v2 = vld [vmem:[#allocation23_spill] sm:$0xff] }
  0x7d   : > { %v533_v12 = vand.u32 2147483648, %v6354_v21  ;;  %vm6434_vm7 = vcmp.lt.f32.partialorder %v5451_v22, 8388608.0  ;;  %v5465_v23 = vor.u32 %v5464_v62, %v5463_v36  ;;  %v304_v7 = vmul.f32 %v303_v8, %v6104_v45 }
  0x7e   : > { %v425_v57 = vstv %s424_s21  ;;  %v5631_v30 = vpop.eup %5630  ;;  %v5434_v38 = vsel %vm6387_vm12, %v5433_v27, %v6320_v29  ;;  %v5442_v11 = vsel %vm6400_vm13, %v5441_v16, %v6323_v53  ;;  %vm6445_vm11 = vcmp.lt.f32.partialorder %v5459_v51, 8388608.0 }
  0x7f   : > { %vm527_vm9 = vweird.f32 %v6354_v21  ;;  %v5450_v45 = vsel %vm6415_vm2, %v5449_v13, %v6340_v41  ;;  %vm6453_vm8 = vcmp.lt.f32.partialorder %v5467_v43, 8388608.0  ;;  %v5473_v33 = vor.u32 %v5472_v25, %v5471_v50 }
  0x80   : > { %v523_v27 = vmul.f32 %v5631_v30, %v6354_v21  ;;  %v5458_v29 = vsel %vm6434_vm7, %v5457_v47, %v6350_v42  ;;  %vm6461_vm12 = vcmp.eq.f32.partialorder %v531_v55, 8.507059e+37  ;;  %v534_v51 = vor.u32 1.1754944e-38, %v533_v12 }
  0x81   : > { %v426_v5 = vmul.f32 %v425_v57, %v6129_v58  ;;  %v5466_v46 = vsel %vm6445_vm11, %v5465_v23, %v6357_v28  ;;  %vm528_vm13 = vweird.f32 %v5631_v30  ;;  %v8111_v25 = vsel %vm6184_vm10, %v6199_v63, %v6133_v10 }
  0x82   : > { %v524_v13 = vsub.f32 1.0, %v523_v27  ;;  %v323_v41 = vmul.f32 %v8111_v25, %v304_v7  ;;  %v8112_v47 = vsel %vm6203_vm14, %v6215_v37, %v6138_v14  ;;  %v8113_v58 = vsel %vm6207_vm15, %v6222_v48, %v6141_v17  ;;  %vm529_vm10 = vmor %vm527_vm9, %vm528_vm13  ;;  %v8137_v25 = vld [vmem:[#allocation14_spill] sm:$0xff] }
  0x83   : > { %v324_v42 = vmul.f32 %v8112_v47, %v304_v7  ;;  %v325_v28 = vmul.f32 %v8113_v58, %v304_v7  ;;  %v8114_v49 = vsel %vm6224_vm0, %v6263_v34, %v6153_v26  ;;  %v8115_v10 = vsel %vm6228_vm1, %v6265_v0, %v6161_v32  ;;  %v8121_v0 = vld [vmem:[#allocation22_spill] sm:$0xff]  ;;  %v8123_v34 = vld [vmem:[#allocation21_spill] sm:$0xff]  ;;  %v8138_v47 = vld [vmem:[#allocation16_spill] sm:$0xff] }
  0x84   : > { %v326_v43 = vmul.f32 %v8114_v49, %v304_v7  ;;  %v327_v63 = vmul.f32 %v8115_v10, %v304_v7  ;;  %v5474_v14 = vsel %vm6453_vm8, %v5473_v33, %v6360_v1  ;;  %v525_v19 = vmul.f32 %v5631_v30, %v524_v13  ;;  %v8133_v33 = vld [vmem:[#allocation11_spill] sm:$0xff]  ;;  %v8139_v58 = vld [vmem:[#allocation17_spill] sm:$0xff] }
  0x85   : > { %v8116_v17 = vsel %vm6272_vm3, %v6276_v60, %v6168_v35  ;;  %v8117_v26 = vsel %vm6291_vm4, %v6278_v61, %v6171_v3  ;;  %v8118_v32 = vsel %vm6295_vm5, %v6280_v15, %v6175_v4  ;;  %v8119_v35 = vld [vmem:[#allocation18_spill] sm:$0xff]  ;;  %vm8122_vm14 = vnez %v8121_v0  ;;  %v8124_v3 = vld [vmem:[#allocation19_spill] sm:$0xff]  ;;  %v8126_v61 = vld [vmem:[#allocation24_spill] sm:$0xff] }
  0x86   : > { %v328_v20 = vmul.f32 %v8116_v17, %v304_v7  ;;  %v329_v37 = vmul.f32 %v8117_v26, %v304_v7  ;;  %v330_v48 = vmul.f32 %v8118_v32, %v304_v7  ;;  %v8120_v6 = vsel %vm6310_vm6, %v6299_v44, %v8119_v35 }
  0x87   : > { %v331_v54 = vmul.f32 %v8120_v6, %v304_v7  ;;  %v8125_v9 = vsel %vm8122_vm14, %v8123_v34, %v8124_v3  ;;  %vm8127_vm15 = vnez %v8126_v61  ;;  %v526_v4 = vadd.f32 %v5631_v30, %v525_v19 }
  0x88   : > { %v445_v60 = vmul.f32 %v8125_v9, %v426_v5  ;;  %v8130_v1 = vsel %vm8127_vm15, %v8128_v2, %v8129_v39  ;;  %v447_v15 = vmul.f32 %v5426_v18, %v426_v5  ;;  %v448_v62 = vmul.f32 %v5434_v38, %v426_v5 }
  0x89   : > { %v446_v59 = vmul.f32 %v8130_v1, %v426_v5  ;;  %v449_v31 = vmul.f32 %v5442_v11, %v426_v5  ;;  %v450_v52 = vmul.f32 %v5450_v45, %v426_v5  ;;  %v451_v22 = vmul.f32 %v5458_v29, %v426_v5  ;;  %v8131_v11 = vld [vmem:[#allocation9_spill] sm:$0xff]  ;;  %v8132_v45 = vld [vmem:[#allocation10_spill] sm:$0xff]  ;;  %v8134_v29 = vld [vmem:[#allocation15_spill] sm:$0xff] }
  0x8a   : > { %v452_v44 = vmul.f32 %v5466_v46, %v426_v5  ;;  %v453_v36 = vmul.f32 %v5474_v14, %v426_v5  ;;  %v530_v16 = vsel %vm529_vm10, %v5631_v30, %v526_v4  ;;  %v6531_v50 = vadd.f32 %v445_v60, %v323_v41  ;;  %v8136_v46 = vld [vmem:[#allocation13_spill] sm:$0xff] }
  0x8b   : > { %v535_v8 = vsel %vm6461_vm12, %v534_v51, %v530_v16  ;;  %v6533_v55 = vadd.f32 %v446_v59, %v324_v42  ;;  %v6535_v56 = vadd.f32 %v447_v15, %v325_v28  ;;  %v6537_v23 = vadd.f32 %v448_v62, %v326_v43  ;;  %v8135_v51 = vld [vmem:[#allocation12_spill] sm:$0xff] }
  0x8c   : > { %v536_v12 = vmul.f32 255.0, %v535_v8  ;;  %v6539_v18 = vadd.f32 %v449_v31, %v327_v63  ;;  %v6541_v7 = vadd.f32 %v450_v52, %v328_v20  ;;  %v6543_v57 = vadd.f32 %v451_v22, %v329_v37 }
  0x8d   : > { %v6545_v38 = vadd.f32 %v452_v44, %v330_v48  ;;  %v6547_v30 = vadd.f32 %v453_v36, %v331_v54 }
  0x8e   : > { %v6550_v24 = vmul.f32 %v8131_v11, %v536_v12  ;;  %v6553_v40 = vmul.f32 %v8132_v45, %v536_v12  ;;  %v6556_v27 = vmul.f32 %v8133_v33, %v536_v12  ;;  %v6559_v53 = vmul.f32 %v8134_v29, %v536_v12 }
  0x8f   : > { %v6562_v5 = vmul.f32 %v8135_v51, %v536_v12  ;;  %v6565_v13 = vmul.f32 %v8136_v46, %v536_v12  ;;  %v6568_v41 = vmul.f32 %v8137_v25, %v536_v12  ;;  %v6571_v42 = vmul.f32 %v8138_v47, %v536_v12 }
  0x90   : > { %v6576_v28 = vmul.f32 %v8139_v58, %v536_v12  ;;  %v5477_v49 = vand.u32 2147483647, %v6550_v24  ;;  %v5479_v43 = vcvt.f32.s32 %v6550_v24  ;;  %v5482_v10 = vand.u32 2147483648, %v6550_v24 }
  0x91   : > { %v5485_v63 = vand.u32 2147483647, %v6553_v40  ;;  %v5487_v14 = vcvt.f32.s32 %v6553_v40  ;;  %v5490_v19 = vand.u32 2147483648, %v6553_v40  ;;  %v5493_v17 = vand.u32 2147483647, %v6556_v27 }
  0x92   : > { %vm6585_vm0 = vcmp.lt.f32.partialorder %v5477_v49, 8388608.0  ;;  %v5480_v26 = vcvt.s32.f32 %v5479_v43  ;;  %v5495_v37 = vcvt.f32.s32 %v6556_v27  ;;  %v5498_v32 = vand.u32 2147483648, %v6556_v27 }
  0x93   : > { %vm6591_vm1 = vcmp.lt.f32.partialorder %v5485_v63, 8388608.0  ;;  %v5488_v35 = vcvt.s32.f32 %v5487_v14  ;;  %vm6595_vm3 = vcmp.lt.f32.partialorder %v5493_v17, 8388608.0  ;;  %v5501_v54 = vand.u32 2147483647, %v6559_v53 }
  0x94   : > { %v5481_v0 = vand.u32 2147483647, %v5480_v26  ;;  %v5496_v34 = vcvt.s32.f32 %v5495_v37  ;;  %v5503_v3 = vcvt.f32.s32 %v6559_v53  ;;  %v5506_v9 = vand.u32 2147483648, %v6559_v53 }
  0x95   : > { %v5489_v60 = vand.u32 2147483647, %v5488_v35  ;;  %vm6602_vm4 = vcmp.lt.f32.partialorder %v5501_v54, 8388608.0  ;;  %v5509_v2 = vand.u32 2147483647, %v6562_v5  ;;  %v5511_v39 = vcvt.f32.s32 %v6562_v5 }
  0x96   : > { %v5483_v1 = vor.u32 %v5482_v10, %v5481_v0  ;;  %v5497_v59 = vand.u32 2147483647, %v5496_v34  ;;  %v5504_v4 = vcvt.s32.f32 %v5503_v3  ;;  %v5514_v15 = vand.u32 2147483648, %v6562_v5 }
  0x97   : > { %v5491_v62 = vor.u32 %v5490_v19, %v5489_v60  ;;  %vm6609_vm5 = vcmp.lt.f32.partialorder %v5509_v2, 8388608.0  ;;  %v5512_v52 = vcvt.s32.f32 %v5511_v39  ;;  %v5517_v22 = vand.u32 2147483647, %v6565_v13  ;;  %s5476_s26 = spop %5475 }
  0x98   : > { %v5484_v44 = vsel %vm6585_vm0, %v5483_v1, %v6550_v24  ;;  %v5499_v36 = vor.u32 %v5498_v32, %v5497_v59  ;;  %v5505_v16 = vand.u32 2147483647, %v5504_v4  ;;  %v5519_v8 = vcvt.f32.s32 %v6565_v13  ;;  %s546_s27 = smul.f32 %s5476_s26, %s6573_s23 }
  0x99   : > { %v5492_v12 = vsel %vm6591_vm1, %v5491_v62, %v6553_v40  ;;  %v5513_v11 = vand.u32 2147483647, %v5512_v52  ;;  %vm6622_vm6 = vcmp.lt.f32.partialorder %v5517_v22, 8388608.0  ;;  %v5522_v33 = vand.u32 2147483648, %v6565_v13 }
  0x9a   : > { %v5500_v24 = vsel %vm6595_vm3, %v5499_v36, %v6556_v27  ;;  %v5507_v29 = vor.u32 %v5506_v9, %v5505_v16  ;;  %v5520_v51 = vcvt.s32.f32 %v5519_v8  ;;  %v5525_v46 = vand.u32 2147483647, %v6568_v41 }
  0x9b   : > { %v547_v25 = vstv %s546_s27  ;;  %v5515_v47 = vor.u32 %v5514_v15, %v5513_v11  ;;  %v5527_v58 = vcvt.f32.s32 %v6568_v41  ;;  %v5530_v40 = vand.u32 2147483648, %v6568_v41 }
  0x9c   : > { %v548_v49 = vmul.f32 %v547_v25, %v6354_v21  ;;  %v5508_v43 = vsel %vm6602_vm4, %v5507_v29, %v6559_v53  ;;  %v5521_v10 = vand.u32 2147483647, %v5520_v51  ;;  %vm6637_vm8 = vcmp.lt.f32.partialorder %v5525_v46, 8388608.0 }
  0x9d   : > { %v5516_v27 = vsel %vm6609_vm5, %v5515_v47, %v6562_v5  ;;  %v5528_v14 = vcvt.s32.f32 %v5527_v58  ;;  %v5533_v19 = vand.u32 2147483647, %v6571_v42  ;;  %v5535_v17 = vcvt.f32.s32 %v6571_v42 }
  0x9e   : > { %v5523_v20 = vor.u32 %v5522_v33, %v5521_v10  ;;  %v5538_v21 = vand.u32 2147483648, %v6571_v42  ;;  %v5541_v26 = vand.u32 2147483647, %v6576_v28  ;;  %v5543_v53 = vcvt.f32.s32 %v6576_v28 }
  0x9f   : > { %v5529_v37 = vand.u32 2147483647, %v5528_v14  ;;  %vm6649_vm9 = vcmp.lt.f32.partialorder %v5533_v19, 8388608.0  ;;  %v5536_v48 = vcvt.s32.f32 %v5535_v17  ;;  %v5546_v5 = vand.u32 2147483648, %v6576_v28 }
  0xa0   : > { %v5524_v35 = vsel %vm6622_vm6, %v5523_v20, %v6565_v13  ;;  %vm6657_vm2 = vcmp.lt.f32.partialorder %v5541_v26, 8388608.0  ;;  %v5544_v54 = vcvt.s32.f32 %v5543_v53  ;;  %v567_v0 = vmul.f32 %v5484_v44, %v548_v49 }
  0xa1   : > { %v5531_v34 = vor.u32 %v5530_v40, %v5529_v37  ;;  %v5537_v3 = vand.u32 2147483647, %v5536_v48  ;;  %v568_v9 = vmul.f32 %v5492_v12, %v548_v49  ;;  %v569_v60 = vmul.f32 %v5500_v24, %v548_v49 }
  0xa2   : > { %v5545_v61 = vand.u32 2147483647, %v5544_v54  ;;  %v570_v2 = vmul.f32 %v5508_v43, %v548_v49  ;;  %v571_v39 = vmul.f32 %v5516_v27, %v548_v49  ;;  %v572_v1 = vmul.f32 %v5524_v35, %v548_v49 }
  0xa3   : > { %v5532_v59 = vsel %vm6637_vm8, %v5531_v34, %v6568_v41  ;;  %v5539_v4 = vor.u32 %v5538_v21, %v5537_v3  ;;  %v576_v13 = vadd.f32 %v567_v0, %v6531_v50  ;;  %v577_v15 = vadd.f32 %v568_v9, %v6533_v55 }
  0xa4   : > { %v5547_v62 = vor.u32 %v5546_v5, %v5545_v61  ;;  %v573_v31 = vmul.f32 %v5532_v59, %v548_v49  ;;  %v578_v52 = vadd.f32 %v569_v60, %v6535_v56  ;;  %v579_v22 = vadd.f32 %v570_v2, %v6537_v23 }
  0xa5   : > { %v5540_v44 = vsel %vm6649_vm9, %v5539_v4, %v6571_v42  ;;  %v580_v36 = vadd.f32 %v571_v39, %v6539_v18  ;;  %v581_v16 = vadd.f32 %v572_v1, %v6541_v7  ;;  %v585_v41 = vpack.c.bf16 %v576_v13, %v576_v13 }
  0xa6   : > { %v5548_v50 = vsel %vm6657_vm2, %v5547_v62, %v6576_v28  ;;  %v574_v55 = vmul.f32 %v5540_v44, %v548_v49  ;;  %v582_v8 = vadd.f32 %v573_v31, %v6543_v57  ;;  %v586_v12 = vpack.c.bf16 %v577_v15, %v577_v15 }
  0xa7   : > { %v575_v56 = vmul.f32 %v5548_v50, %v548_v49  ;;  %v587_v11 = vpack.c.bf16 %v578_v52, %v578_v52  ;;  %v588_v23 = vpack.c.bf16 %v579_v22, %v579_v22  ;;  %v589_v45 = vpack.c.bf16 %v580_v36, %v580_v36  ;;  %594 = vst [vmem:[#allocation2] sm:$0x3] %v585_v41 }
  0xa8   : > { %v583_v42 = vadd.f32 %v574_v55, %v6545_v38  ;;  %v590_v33 = vpack.c.bf16 %v581_v16, %v581_v16  ;;  %595 = vst [vmem:[#allocation2 + $0x2] sm:$0x3] %v586_v12  ;;  %v591_v7 = vpack.c.bf16 %v582_v8, %v582_v8 }
  0xa9   : > { %v584_v18 = vadd.f32 %v575_v56, %v6547_v30  ;;  %596 = vst [vmem:[#allocation2 + $0x4] sm:$0x3] %v587_v11 }
  0xaa   : > { %v592_v24 = vpack.c.bf16 %v583_v42, %v583_v42  ;;  %597 = vst [vmem:[#allocation2 + $0x6] sm:$0x3] %v588_v23 }
  0xab   : > { %v593_v28 = vpack.c.bf16 %v584_v18, %v584_v18  ;;  %598 = vst [vmem:[#allocation2 + $0x8] sm:$0x3] %v589_v45 }
  0xac   : > { %599 = vst [vmem:[#allocation2 + $0xa] sm:$0x3] %v590_v33 }
  0xad   : > { %600 = vst [vmem:[#allocation2 + $0xc] sm:$0x3] %v591_v7 }
  0xae   : > { %601 = vst [vmem:[#allocation2 + $0xe] sm:$0x3] %v592_v24 }
  0xaf   : > { %602 = vst [vmem:[#allocation2 + $0x10] sm:$0x3] %v593_v28 }
  0xb0 PF: > { %v1040_v57 = vld [vmem:[#allocation2 + $0x2] sm:$0x3]  ;;  %vm1138_vm7 = vcmask 1041408   ;;  %v611_v38 = vld [vmem:[%s5873_s9 + $0x30] sm:$0xf]  ;;  %vm1089_vm13 = vcmask 31744  }
  0xb1   : > { %v1140_v30 = vsel %vm1138_vm7, %v1040_v57, 0  ;;  %v612_v29 = vld [vmem:[%s5873_s9 + $0x34] sm:$0xf]  ;;  %v640_v51 = vld [vmem:[%s5873_s9 + $0x38] sm:$0x1]  ;;  %v752_v46 = vshrl.u32 %v611_v38, 16 }
  0xb2   : > { %5323 = vmatpush.bf16.msra.mxu1 %v1140_v30  ;;  %5324 = vmatpush.bf16.msra.mxu2 %v1140_v30  ;;  %vm652_vm11 = vsmask.f32 3328  ;;  %vm653_vm12 = vsmask.f32 7440  ;;  %v755_v25 = vshll.u32 %v611_v38, 16  ;;  %v761_v47 = vshll.u32 %v612_v29, 16 }
  0xb3   : > { %5325 = vmatpush.bf16.msra.mxu3 %v1140_v30  ;;  %1149 = vmatpush.bf16.msra.mxu0 %v1140_v30  ;;  %v754_v58 = vrot.slane %v752_v46, 4  ;;  %v765_v40 = vshrl.u32 %v612_v29, 16  ;;  %v771_v49 = vshll.u32 %v640_v51, 16  ;;  %v619_v43 = vld [vmem:[%s5873_s9 + $0x60] sm:$0xf]  ;;  %vm6689_vm10 = vmor %vm652_vm11, %vm653_vm12  ;;  %vm1499_vm14 = vcmask 1042432  }
  0xb4   : > { %v757_v10 = vrot.slane %v755_v25, 5  ;;  %v763_v63 = vrot.slane %v761_v47, 5  ;;  %v620_v27 = vld [vmem:[%s5873_s9 + $0x64] sm:$0xf]  ;;  %v644_v14 = vld [vmem:[%s5873_s9 + $0x68] sm:$0x1] }
  0xb5   : > { %v767_v19 = vrot.slane %v765_v40, 4  ;;  %v848_v17 = vshrl.u32 %v619_v43, 16  ;;  %v851_v20 = vshll.u32 %v619_v43, 16  ;;  %v857_v26 = vshll.u32 %v620_v27, 16  ;;  %v627_v32 = vld [vmem:[%s5873_s9 + $0x90] sm:$0xf] }
  0xb6   : > { %v758_v21 = vor.u32 %v757_v10, %v754_v58  ;;  %v861_v53 = vshrl.u32 %v620_v27, 16  ;;  %v867_v37 = vshll.u32 %v644_v14, 16  ;;  %v773_v35 = vrot.slane %v771_v49, 5  ;;  %v628_v0 = vld [vmem:[%s5873_s9 + $0x94] sm:$0xf]  ;;  %s4560_s5 = sshll.u32 %s5875_s10, 4  ;;  %s4561_s5 = int_to_ptr.vmem [resolvable:$true] %s4560_s5 }
  0xb7   : > { %v768_v5 = vor.u32 %v767_v19, %v763_v63  ;;  %v850_v6 = vrot.slane %v848_v17, 4  ;;  %v853_v54 = vrot.slane %v851_v20, 5  ;;  %v859_v3 = vrot.slane %v857_v26, 5  ;;  %v648_v13 = vld [vmem:[%s5873_s9 + $0x98] sm:$0x1]  ;;  %s5717_s19 = scalar_lea.hbm %s8032_s3, 512 }
  0xb8   : > { %v759_v34 = vrot.slane %v758_v21, 4  ;;  %v863_v9 = vrot.slane %v861_v53, 4  ;;  %v869_v60 = vrot.slane %v867_v37, 5  ;;  %v944_v39 = vshrl.u32 %v627_v32, 16  ;;  %v1615_v55 = vld [vmem:[#allocation2 + $0x4] sm:$0x3] }
  0xb9   : > { %v769_v61 = vrot.slane %v768_v5, 4  ;;  %v854_v2 = vor.u32 %v853_v54, %v850_v6  ;;  %v947_v1 = vshll.u32 %v627_v32, 16  ;;  %v953_v15 = vshll.u32 %v628_v0, 16  ;;  %v603_v11 = vld [vmem:[%s5873_s9] sm:$0xf] }
  0xba   : > { %v764_v59 = vsel %vm6689_vm10, %v759_v34, %v763_v63  ;;  %v864_v4 = vor.u32 %v863_v9, %v859_v3  ;;  %v957_v62 = vshrl.u32 %v628_v0, 16  ;;  %v946_v44 = vrot.slane %v944_v39, 4  ;;  %v6703_v23 = vld [vmem:[%s5873_s9 + $0x4] sm:$0xf]  ;;  %v6708_v7 = vld [vmem:[%s5873_s9 + $0x8] sm:$0x1] }
  0xbb   : > { %v774_v31 = vsel %vm6689_vm10, %v769_v61, %v773_v35  ;;  %v1049_v52 = vunpack.c.l.b16 %v764_v59  ;;  %v855_v22 = vrot.slane %v854_v2, 4  ;;  %v949_v41 = vrot.slane %v947_v1, 5  ;;  %v1870_v30 = vld [vmem:[#allocation2 + $0x6] sm:$0x3]  ;;  %v635_v47 = vld [vmem:[#allocation2] sm:$0x3] }
  0xbc   : > { %v1050_v36 = vunpack.c.l.b16 %v774_v31  ;;  %v865_v16 = vrot.slane %v864_v4, 4  ;;  %v955_v50 = vrot.slane %v953_v15, 5  ;;  %v959_v12 = vrot.slane %v957_v62, 4  ;;  %v2556_v10 = vld [vmem:[#allocation2 + $0x8] sm:$0x3] }
  0xbd   : > { %v860_v8 = vsel %vm6689_vm10, %v855_v22, %v859_v3  ;;  %v963_v56 = vshll.u32 %v648_v13, 16  ;;  %v950_v18 = vor.u32 %v949_v41, %v946_v44  ;;  %v1713_v38 = vsel %vm1138_vm7, %v1615_v55, 0  ;;  %v613_v17 = vld [vmem:[%s5873_s9 + $0x3c] sm:$0xf]  ;;  %v6722_v53 = vld [vmem:[%s5873_s9 + $0x40] sm:$0xf] }
  0xbe   : > { %v1077_v45 = vpack.c.b16 %v1050_v36, %v1049_v52  ;;  %v870_v42 = vsel %vm6689_vm10, %v865_v16, %v869_v60  ;;  %v1057_v33 = vunpack.c.l.b16 %v860_v8  ;;  %v960_v28 = vor.u32 %v959_v12, %v955_v50  ;;  %1722 = vmatpush.bf16.msrb.mxu2 %v1713_v38  ;;  %v6726_v6 = vld [vmem:[%s5873_s9 + $0x44] sm:$0x1]  ;;  %v621_v9 = vld [vmem:[%s5873_s9 + $0x6c] sm:$0xf]  ;;  %v622_v15 = vld [vmem:[%s5873_s9 + $0x70] sm:$0xf] }
  0xbf   : > { %v1058_v24 = vunpack.c.l.b16 %v870_v42  ;;  %v965_v57 = vrot.slane %v963_v56, 5  ;;  %v951_v29 = vrot.slane %v950_v18, 4  ;;  %v656_v51 = vshrl.u32 %v603_v11, 16  ;;  %v645_v22 = vld [vmem:[%s5873_s9 + $0x74] sm:$0x1] }
  0xc0   : > { %4697 = vmatmul.msk.bf16.vlgmr.msra.gmra.mxu1 %vm1089_vm13, %v1077_v45  ;;  %v659_v46 = vshll.u32 %v603_v11, 16  ;;  %v665_v25 = vshll.u32 %v6703_v23, 16  ;;  %v961_v40 = vrot.slane %v960_v28, 4  ;;  %v669_v49 = vshrl.u32 %v6703_v23, 16  ;;  %v629_v18 = vld [vmem:[%s5873_s9 + $0x9c] sm:$0xf] }
  0xc1   : > { %v1081_v58 = vpack.c.b16 %v1058_v24, %v1057_v33  ;;  %v675_v43 = vshll.u32 %v6708_v7, 16  ;;  %v956_v63 = vsel %vm6689_vm10, %v951_v29, %v955_v50  ;;  %v658_v27 = vrot.slane %v656_v51, 4  ;;  %v630_v38 = vld [vmem:[%s5873_s9 + $0xa0] sm:$0xf] }
  0xc2   : > { %v661_v14 = vrot.slane %v659_v46, 5  ;;  %v667_v19 = vrot.slane %v665_v25, 5  ;;  %v966_v20 = vsel %vm6689_vm10, %v961_v40, %v965_v57  ;;  %v1065_v21 = vunpack.c.l.b16 %v956_v63 }
  0xc3   : > { %4701 = vmatmul.msk.bf16.vlgmr.msra.gmra.mxu2 %vm1089_vm13, %v1081_v58  ;;  %v671_v26 = vrot.slane %v669_v49, 4  ;;  %v1066_v37 = vunpack.c.l.b16 %v966_v20  ;;  %v677_v5 = vrot.slane %v675_v43, 5  ;;  %v2000_v35 = vsel %vm1138_vm7, %v1870_v30, 0  ;;  %v649_v58 = vld [vmem:[%s5873_s9 + $0xa4] sm:$0x1] }
  0xc4   : > { %v662_v32 = vor.u32 %v661_v14, %v658_v27  ;;  %2009 = vmatpush.bf16.msrb.mxu3 %v2000_v35  ;;  %v1360_v0 = vsel %vm1138_vm7, %v635_v47, 0  ;;  %v2654_v34 = vsel %vm1138_vm7, %v2556_v10, 0  ;;  %v776_v3 = vshrl.u32 %v613_v17, 16 }
  0xc5   : > { %v672_v54 = vor.u32 %v671_v26, %v667_v19  ;;  %v1085_v60 = vpack.c.b16 %v1066_v37, %v1065_v21  ;;  %1369 = vmatpush.bf16.msrb.mxu1 %v1360_v0  ;;  %2663 = vmatpush.bf16.msrb.mxu0 %v2654_v34  ;;  %v779_v2 = vshll.u32 %v613_v17, 16  ;;  %v785_v39 = vshll.u32 %v6722_v53, 16  ;;  %v6753_v34 = vld [vmem:[%s5873_s9 + $0x10] sm:$0xf] }
  0xc6   : > { %v663_v61 = vrot.slane %v662_v32, 4  ;;  %v778_v59 = vrot.slane %v776_v3, 4  ;;  %v789_v4 = vshrl.u32 %v6722_v53, 16  ;;  %v795_v13 = vshll.u32 %v6726_v6, 16  ;;  %v6756_v3 = vld [vmem:[%s5873_s9 + $0x14] sm:$0x1] }
  0xc7   : > { %v673_v1 = vrot.slane %v672_v54, 4  ;;  %4705 = vmatmul.msk.bf16.vlgmr.msra.gmra.mxu3 %vm1089_vm13, %v1085_v60  ;;  %v781_v31 = vrot.slane %v779_v2, 5  ;;  %v787_v52 = vrot.slane %v785_v39, 5  ;;  %v872_v44 = vshrl.u32 %v621_v9, 16 }
  0xc8   : > { %v668_v62 = vsel %vm6689_vm10, %v663_v61, %v667_v19  ;;  %v791_v41 = vrot.slane %v789_v4, 4  ;;  %v797_v50 = vrot.slane %v795_v13, 5  ;;  %v875_v56 = vshll.u32 %v621_v9, 16 }
  0xc9   : > { %v678_v36 = vsel %vm6689_vm10, %v673_v1, %v677_v5  ;;  %v1041_v16 = vunpack.c.l.b16 %v668_v62  ;;  %v782_v8 = vor.u32 %v781_v31, %v778_v59  ;;  %v874_v12 = vrot.slane %v872_v44, 4  ;;  %v605_v5 = vld [vmem:[%s5873_s9 + $0xc] sm:$0xf] }
  0xca   : > { %v1042_v55 = vunpack.c.l.b16 %v678_v36  ;;  %v792_v11 = vor.u32 %v791_v41, %v787_v52  ;;  %v881_v45 = vshll.u32 %v622_v15, 16  ;;  %v885_v42 = vshrl.u32 %v622_v15, 16  ;;  %v6768_v41 = vld [vmem:[%s5873_s9 + $0x4c] sm:$0xf] }
  0xcb   : > { %v891_v33 = vshll.u32 %v645_v22, 16  ;;  %v783_v28 = vrot.slane %v782_v8, 4  ;;  %v877_v57 = vrot.slane %v875_v56, 5  ;;  %v968_v40 = vshrl.u32 %v629_v18, 16 }
  0xcc   : > { %v1073_v24 = vpack.c.b16 %v1042_v55, %v1041_v16  ;;  %v793_v30 = vrot.slane %v792_v11, 4  ;;  %v883_v29 = vrot.slane %v881_v45, 5  ;;  %v887_v51 = vrot.slane %v885_v42, 4  ;;  %v6772_v45 = vld [vmem:[%s5873_s9 + $0x50] sm:$0x1] }
  0xcd   : > { %v893_v46 = vrot.slane %v891_v33, 5  ;;  %v788_v25 = vsel %vm6689_vm10, %v783_v28, %v787_v52  ;;  %v878_v47 = vor.u32 %v877_v57, %v874_v12  ;;  %v971_v49 = vshll.u32 %v629_v18, 16  ;;  %v615_v52 = vld [vmem:[%s5873_s9 + $0x48] sm:$0xf] }
  0xce   : > { %4693 = vmatmul.msk.bf16.vlgmr.msra.gmra.mxu0 %vm1089_vm13, %v1073_v24  ;;  %v798_v43 = vsel %vm6689_vm10, %v793_v30, %v797_v50  ;;  %v1051_v10 = vunpack.c.l.b16 %v788_v25  ;;  %v888_v63 = vor.u32 %v887_v51, %v883_v29  ;;  %v977_v27 = vshll.u32 %v630_v38, 16 }
  0xcf   : > { %v1052_v14 = vunpack.c.l.b16 %v798_v43  ;;  %v879_v19 = vrot.slane %v878_v47, 4  ;;  %v970_v17 = vrot.slane %v968_v40, 4  ;;  %v973_v20 = vrot.slane %v971_v49, 5 }
  0xd0   : > { %v889_v21 = vrot.slane %v888_v63, 4  ;;  %v979_v26 = vrot.slane %v977_v27, 5  ;;  %v981_v37 = vshrl.u32 %v630_v38, 16  ;;  %v987_v32 = vshll.u32 %v649_v58, 16  ;;  %v623_v38 = vld [vmem:[%s5873_s9 + $0x78] sm:$0xf] }
  0xd1   : > { %v1078_v35 = vpack.c.b16 %v1052_v14, %v1051_v10  ;;  %v884_v54 = vsel %vm6689_vm10, %v879_v19, %v883_v29  ;;  %v974_v0 = vor.u32 %v973_v20, %v970_v17  ;;  %v680_v59 = vshrl.u32 %v605_v5, 16  ;;  %v624_v63 = vld [vmem:[%s5873_s9 + $0x7c] sm:$0xf]  ;;  %v646_v27 = vld [vmem:[%s5873_s9 + $0x80] sm:$0x1] }
  0xd2   : > { %v894_v9 = vsel %vm6689_vm10, %v889_v21, %v893_v46  ;;  %v1059_v60 = vunpack.c.l.b16 %v884_v54  ;;  %v983_v61 = vrot.slane %v981_v37, 4  ;;  %v989_v2 = vrot.slane %v987_v32, 5 }
  0xd3   : > { %4698 = vmatmul.msk.bf16.gmra.mxu1 %vm1089_vm13, %v1078_v35  ;;  %v1060_v39 = vunpack.c.l.b16 %v894_v9  ;;  %v975_v1 = vrot.slane %v974_v0, 4  ;;  %v683_v4 = vshll.u32 %v605_v5, 16  ;;  %v689_v15 = vshll.u32 %v6753_v34, 16 }
  0xd4   : > { %v984_v13 = vor.u32 %v983_v61, %v979_v26  ;;  %v693_v62 = vshrl.u32 %v6753_v34, 16  ;;  %v699_v31 = vshll.u32 %v6756_v3, 16  ;;  %v682_v36 = vrot.slane %v680_v59, 4 }
  0xd5   : > { %v1082_v22 = vpack.c.b16 %v1060_v39, %v1059_v60  ;;  %v980_v44 = vsel %vm6689_vm10, %v975_v1, %v979_v26  ;;  %v685_v16 = vrot.slane %v683_v4, 5  ;;  %v691_v8 = vrot.slane %v689_v15, 5  ;;  %v631_v60 = vld [vmem:[%s5873_s9 + $0xa8] sm:$0xf]  ;;  %v632_v1 = vld [vmem:[%s5873_s9 + $0xac] sm:$0xf] }
  0xd6   : > { %v985_v50 = vrot.slane %v984_v13, 4  ;;  %v1067_v55 = vunpack.c.l.b16 %v980_v44  ;;  %v695_v12 = vrot.slane %v693_v62, 4  ;;  %v701_v11 = vrot.slane %v699_v31, 5  ;;  %v650_v62 = vld [vmem:[%s5873_s9 + $0xb0] sm:$0x1] }
  0xd7   : > { %4702 = vmatmul.msk.bf16.gmra.mxu2 %vm1089_vm13, %v1082_v22  ;;  %v686_v56 = vor.u32 %v685_v16, %v682_v36  ;;  %v800_v42 = vshrl.u32 %v615_v52, 16  ;;  %v803_v33 = vshll.u32 %v615_v52, 16  ;;  %v809_v28 = vshll.u32 %v6768_v41, 16 }
  0xd8   : > { %v990_v18 = vsel %vm6689_vm10, %v985_v50, %v989_v2  ;;  %v696_v24 = vor.u32 %v695_v12, %v691_v8  ;;  %v813_v57 = vshrl.u32 %v6768_v41, 16  ;;  %v819_v40 = vshll.u32 %v6772_v45, 16 }
  0xd9   : > { %v1068_v30 = vunpack.c.l.b16 %v990_v18  ;;  %v687_v29 = vrot.slane %v686_v56, 4  ;;  %v802_v51 = vrot.slane %v800_v42, 4  ;;  %v805_v46 = vrot.slane %v803_v33, 5 }
  0xda   : > { %v697_v25 = vrot.slane %v696_v24, 4  ;;  %v811_v47 = vrot.slane %v809_v28, 5  ;;  %v815_v58 = vrot.slane %v813_v57, 4  ;;  %v896_v14 = vshrl.u32 %v623_v38, 16  ;;  %v6797_v57 = vld [vmem:[%s5873_s9 + $0x1c] sm:$0xf] }
  0xdb   : > { %v1086_v49 = vpack.c.b16 %v1068_v30, %v1067_v55  ;;  %v692_v43 = vsel %vm6689_vm10, %v687_v29, %v691_v8  ;;  %v806_v10 = vor.u32 %v805_v46, %v802_v51  ;;  %v821_v21 = vrot.slane %v819_v40, 5  ;;  %v607_v8 = vld [vmem:[%s5873_s9 + $0x18] sm:$0xf]  ;;  %v6803_v29 = vld [vmem:[%s5873_s9 + $0x20] sm:$0x1] }
  0xdc   : > { %v702_v19 = vsel %vm6689_vm10, %v697_v25, %v701_v11  ;;  %v1043_v17 = vunpack.c.l.b16 %v692_v43  ;;  %v816_v20 = vor.u32 %v815_v58, %v811_v47  ;;  %v898_v32 = vrot.slane %v896_v14, 4  ;;  %v617_v40 = vld [vmem:[%s5873_s9 + $0x54] sm:$0xf] }
  0xdd   : > { %4706 = vmatmul.msk.bf16.gmra.mxu3 %vm1089_vm13, %v1086_v49  ;;  %v1044_v26 = vunpack.c.l.b16 %v702_v19  ;;  %v807_v37 = vrot.slane %v806_v10, 4  ;;  %v899_v5 = vshll.u32 %v623_v38, 16  ;;  %v905_v54 = vshll.u32 %v624_v63, 16 }
  0xde   : > { %v817_v35 = vrot.slane %v816_v20, 4  ;;  %v909_v0 = vshrl.u32 %v624_v63, 16  ;;  %v915_v9 = vshll.u32 %v646_v27, 16  ;;  %v992_v44 = vshrl.u32 %v631_v60, 16 }
  0xdf   : > { %v1074_v61 = vpack.c.b16 %v1044_v26, %v1043_v17  ;;  %v812_v2 = vsel %vm6689_vm10, %v807_v37, %v811_v47  ;;  %v901_v39 = vrot.slane %v899_v5, 5  ;;  %v907_v13 = vrot.slane %v905_v54, 5  ;;  %v6812_v37 = vld [vmem:[%s5873_s9 + $0x58] sm:$0xf] }
  0xe0   : > { %v822_v59 = vsel %vm6689_vm10, %v817_v35, %v821_v21  ;;  %v1053_v4 = vunpack.c.l.b16 %v812_v2  ;;  %v911_v15 = vrot.slane %v909_v0, 4  ;;  %v917_v22 = vrot.slane %v915_v9, 5  ;;  %v6819_v9 = vld [vmem:[%s5873_s9 + $0x5c] sm:$0x1] }
  0xe1   : > { %4694 = vmatmul.msk.bf16.gmra.mxu0 %vm1089_vm13, %v1074_v61  ;;  %v1054_v31 = vunpack.c.l.b16 %v822_v59  ;;  %v902_v52 = vor.u32 %v901_v39, %v898_v32  ;;  %v995_v16 = vshll.u32 %v631_v60, 16  ;;  %v1001_v50 = vshll.u32 %v632_v1, 16  ;;  %v625_v60 = vld [vmem:[%s5873_s9 + $0x84] sm:$0xf] }
  0xe2   : > { %v912_v36 = vor.u32 %v911_v15, %v907_v13  ;;  %v1005_v55 = vshrl.u32 %v632_v1, 16  ;;  %v994_v11 = vrot.slane %v992_v44, 4  ;;  %v1011_v42 = vshll.u32 %v650_v62, 16 }
  0xe3   : > { %v1079_v12 = vpack.c.b16 %v1054_v31, %v1053_v4  ;;  %v903_v56 = vrot.slane %v902_v52, 4  ;;  %v997_v18 = vrot.slane %v995_v16, 5  ;;  %v1003_v24 = vrot.slane %v1001_v50, 5 }
  0xe4   : > { %v913_v33 = vrot.slane %v912_v36, 4  ;;  %v1007_v28 = vrot.slane %v1005_v55, 4  ;;  %v1013_v30 = vrot.slane %v1011_v42, 5  ;;  %v704_v51 = vshrl.u32 %v607_v8, 16  ;;  %v626_v55 = vld [vmem:[%s5873_s9 + $0x88] sm:$0xf] }
  0xe5   : > { %4699 = vmatmul.msk.bf16.gmra.mxu1 %vm1089_vm13, %v1079_v12  ;;  %v908_v38 = vsel %vm6689_vm10, %v903_v56, %v907_v13  ;;  %v998_v47 = vor.u32 %v997_v18, %v994_v11  ;;  %v707_v10 = vshll.u32 %v607_v8, 16  ;;  %v713_v63 = vshll.u32 %v6797_v57, 16  ;;  %v647_v56 = vld [vmem:[%s5873_s9 + $0x8c] sm:$0x1] }
  0xe6   : > { %v918_v46 = vsel %vm6689_vm10, %v913_v33, %v917_v22  ;;  %v1061_v25 = vunpack.c.l.b16 %v908_v38  ;;  %v1008_v58 = vor.u32 %v1007_v28, %v1003_v24  ;;  %v706_v43 = vrot.slane %v704_v51, 4 }
  0xe7   : > { %v1062_v49 = vunpack.c.l.b16 %v918_v46  ;;  %v999_v27 = vrot.slane %v998_v47, 4  ;;  %v717_v19 = vshrl.u32 %v6797_v57, 16  ;;  %v723_v17 = vshll.u32 %v6803_v29, 16 }
  0xe8   : > { %v1009_v14 = vrot.slane %v1008_v58, 4  ;;  %v709_v21 = vrot.slane %v707_v10, 5  ;;  %v715_v26 = vrot.slane %v713_v63, 5  ;;  %v824_v32 = vshrl.u32 %v617_v40, 16 }
  0xe9   : > { %v1083_v20 = vpack.c.b16 %v1062_v49, %v1061_v25  ;;  %v1004_v5 = vsel %vm6689_vm10, %v999_v27, %v1003_v24  ;;  %v719_v54 = vrot.slane %v717_v19, 4  ;;  %v725_v0 = vrot.slane %v723_v17, 5  ;;  %v633_v25 = vld [vmem:[%s5873_s9 + $0xb4] sm:$0xf]  ;;  %v634_v27 = vld [vmem:[%s5873_s9 + $0xb8] sm:$0xf] }
  0xea   : > { %v1014_v35 = vsel %vm6689_vm10, %v1009_v14, %v1013_v30  ;;  %v1069_v61 = vunpack.c.l.b16 %v1004_v5  ;;  %v710_v39 = vor.u32 %v709_v21, %v706_v43  ;;  %v826_v1 = vrot.slane %v824_v32, 4 }
  0xeb   : > { %4703 = vmatmul.msk.bf16.gmra.mxu2 %vm1089_vm13, %v1083_v20  ;;  %v1070_v2 = vunpack.c.l.b16 %v1014_v35  ;;  %v720_v59 = vor.u32 %v719_v54, %v715_v26  ;;  %v827_v4 = vshll.u32 %v617_v40, 16  ;;  %v833_v13 = vshll.u32 %v6812_v37, 16  ;;  %v651_v20 = vld [vmem:[%s5873_s9 + $0xbc] sm:$0x1] }
  0xec   : > { %v837_v15 = vshrl.u32 %v6812_v37, 16  ;;  %v711_v31 = vrot.slane %v710_v39, 4  ;;  %v843_v52 = vshll.u32 %v6819_v9, 16  ;;  %v920_v22 = vshrl.u32 %v625_v60, 16 }
  0xed   : > { %v1087_v62 = vpack.c.b16 %v1070_v2, %v1069_v61  ;;  %v721_v44 = vrot.slane %v720_v59, 4  ;;  %v829_v36 = vrot.slane %v827_v4, 5  ;;  %v835_v16 = vrot.slane %v833_v13, 5  ;;  %v609_v2 = vld [vmem:[%s5873_s9 + $0x24] sm:$0xf] }
  0xee   : > { %v839_v50 = vrot.slane %v837_v15, 4  ;;  %v716_v8 = vsel %vm6689_vm10, %v711_v31, %v715_v26  ;;  %v845_v12 = vrot.slane %v843_v52, 5  ;;  %v922_v11 = vrot.slane %v920_v22, 4  ;;  %v6845_v13 = vld [vmem:[%s5873_s9 + $0x28] sm:$0xf] }
  0xef   : > { %4707 = vmatmul.msk.bf16.gmra.mxu3 %vm1089_vm13, %v1087_v62  ;;  %v923_v42 = vshll.u32 %v625_v60, 16  ;;  %v726_v33 = vsel %vm6689_vm10, %v721_v44, %v725_v0  ;;  %v1045_v18 = vunpack.c.l.b16 %v716_v8  ;;  %v830_v24 = vor.u32 %v829_v36, %v826_v1  ;;  %v6848_v22 = vld [vmem:[%s5873_s9 + $0x2c] sm:$0x1] }
  0xf0   : > { %v840_v28 = vor.u32 %v839_v50, %v835_v16  ;;  %v1046_v38 = vunpack.c.l.b16 %v726_v33  ;;  %v929_v51 = vshll.u32 %v626_v55, 16  ;;  %v933_v46 = vshrl.u32 %v626_v55, 16 }
  0xf1   : > { %v925_v30 = vrot.slane %v923_v42, 5  ;;  %v831_v47 = vrot.slane %v830_v24, 4  ;;  %v939_v40 = vshll.u32 %v647_v56, 16  ;;  %v1016_v21 = vshrl.u32 %v633_v25, 16 }
  0xf2   : > { %v841_v58 = vrot.slane %v840_v28, 4  ;;  %v1075_v49 = vpack.c.b16 %v1046_v38, %v1045_v18  ;;  %v931_v10 = vrot.slane %v929_v51, 5  ;;  %v935_v63 = vrot.slane %v933_v46, 4  ;;  %v4933_v51 = vld [vmem:[%s5873_s9 + $0xc] sm:$0xf] }
  0xf3   : > { %v926_v43 = vor.u32 %v925_v30, %v922_v11  ;;  %v836_v14 = vsel %vm6689_vm10, %v831_v47, %v835_v16  ;;  %v941_v17 = vrot.slane %v939_v40, 5  ;;  %v1018_v54 = vrot.slane %v1016_v21, 4 }
  0xf4   : > { %v846_v19 = vsel %vm6689_vm10, %v841_v58, %v845_v12  ;;  %4695 = vmatmul.msk.bf16.gmra.mxu0 %vm1089_vm13, %v1075_v49  ;;  %v1055_v26 = vunpack.c.l.b16 %v836_v14  ;;  %v936_v35 = vor.u32 %v935_v63, %v931_v10  ;;  %v1019_v0 = vshll.u32 %v633_v25, 16  ;;  %v3209_v58 = vld [vmem:[#allocation2 + $0xc] sm:$0x3] }
  0xf5   : > { %v1056_v32 = vunpack.c.l.b16 %v846_v19  ;;  %v927_v5 = vrot.slane %v926_v43, 4  ;;  %v1025_v60 = vshll.u32 %v634_v27, 16  ;;  %v1029_v61 = vshrl.u32 %v634_v27, 16 }
  0xf6   : > { %v937_v59 = vrot.slane %v936_v35, 4  ;;  %v1035_v4 = vshll.u32 %v651_v20, 16  ;;  %v1021_v62 = vrot.slane %v1019_v0, 5  ;;  %v1507_v44 = vrot.slane %v6708_v7, 5  ;;  %v1451_v7 = vld [vmem:[%s5873_s9] sm:$0xe] }
  0xf7   : > { %v1080_v39 = vpack.c.b16 %v1056_v32, %v1055_v26  ;;  %v932_v1 = vsel %vm6689_vm10, %v927_v5, %v931_v10  ;;  %v1027_v31 = vrot.slane %v1025_v60, 5  ;;  %v1031_v52 = vrot.slane %v1029_v61, 4  ;;  %v4934_v10 = vld [vmem:[%s5873_s9 + $0x10] sm:$0xf] }
  0xf8   : > { %v1063_v15 = vunpack.c.l.b16 %v932_v1  ;;  %v942_v36 = vsel %vm6689_vm10, %v937_v59, %v941_v17  ;;  %v1037_v16 = vrot.slane %v1035_v4, 5  ;;  %v728_v50 = vshrl.u32 %v609_v2, 16 }
  0xf9   : > { %4700 = vmatmul.msk.bf16.gmra.mxu1 %vm1089_vm13, %v1080_v39  ;;  %v1064_v55 = vunpack.c.l.b16 %v942_v36  ;;  %v1022_v8 = vor.u32 %v1021_v62, %v1018_v54  ;;  %v1032_v12 = vor.u32 %v1031_v52, %v1027_v31  ;;  %v731_v56 = vshll.u32 %v609_v2, 16  ;;  %v4935_v39 = vld [vmem:[%s5873_s9 + $0x14] sm:$0x1] }
  0xfa   : > { %v730_v11 = vrot.slane %v728_v50, 4  ;;  %v737_v42 = vshll.u32 %v6845_v13, 16  ;;  %v741_v33 = vshrl.u32 %v6845_v13, 16  ;;  %v747_v18 = vshll.u32 %v6848_v22, 16 }
  0xfb   : > { %v1084_v24 = vpack.c.b16 %v1064_v55, %v1063_v15  ;;  %v1023_v28 = vrot.slane %v1022_v8, 4  ;;  %v1033_v38 = vrot.slane %v1032_v12, 4  ;;  %v733_v30 = vrot.slane %v731_v56, 5  ;;  %v3895_v15 = vld [vmem:[#allocation2 + $0xe] sm:$0x3] }
  0xfc   : > { %v739_v46 = vrot.slane %v737_v42, 5  ;;  %v743_v25 = vrot.slane %v741_v33, 4  ;;  %v749_v47 = vrot.slane %v747_v18, 5  ;;  %vm1500_vm15 = vcmask 1046532   ;;  %v2954_v12 = vld [vmem:[#allocation2 + $0xa] sm:$0x3] }
  0xfd   : > { %4704 = vmatmul.msk.bf16.gmra.mxu2 %vm1089_vm13, %v1084_v24  ;;  %v1028_v40 = vsel %vm6689_vm10, %v1023_v28, %v1027_v31  ;;  %v1038_v49 = vsel %vm6689_vm10, %v1033_v38, %v1037_v16  ;;  %v734_v43 = vor.u32 %v733_v30, %v730_v11  ;;  %vm6865_vm0 = vmor %vm1499_vm14, %vm1500_vm15  ;;  %v4789_v17 = vrot.slane %v1451_v7, 9  ;;  %v5274_v16 = vld [vmem:[%s5873_s9] sm:$0xff]  ;;  %v4293_v56 = vld [vmem:[#allocation2 + $0x10] sm:$0x3] }
  0xfe   : > { %v1071_v63 = vunpack.c.l.b16 %v1028_v40  ;;  %v1072_v27 = vunpack.c.l.b16 %v1038_v49  ;;  %v744_v14 = vor.u32 %v743_v25, %v739_v46  ;;  %v1504_v21 = vrot.slane %v6703_v23, 5  ;;  %v4936_v30 = vld [vmem:[%s5873_s9 + $0x18] sm:$0xf]  ;;  %v4937_v25 = vld [vmem:[%s5873_s9 + $0x1c] sm:$0xf] }
  0xff   : > { %v735_v20 = vrot.slane %v734_v43, 4  ;;  %v3339_v26 = vsel %vm1138_vm7, %v3209_v58, 0  ;;  %v2172_v32 = vshrl.u32 %v4933_v51, 16  ;;  %v2175_v54 = vshll.u32 %v4933_v51, 16  ;;  %v1452_v40 = vld [vmem:[%s5873_s9 + $0xc] sm:$0xe] }
 0x100   : > { %v1088_v5 = vpack.c.b16 %v1072_v27, %v1071_v63  ;;  %v745_v35 = vrot.slane %v744_v14, 4  ;;  %3348 = vmatpush.bf16.msra.mxu2 %v3339_v26  ;;  %v2181_v0 = vshll.u32 %v4934_v10, 16  ;;  %v1505_v61 = vsel %vm6865_vm0, %v4789_v17, %v1504_v21  ;;  %v5290_v14 = vld [vmem:[%s5873_s9 + $0xc] sm:$0xff] }
 0x101   : > { %v740_v60 = vsel %vm6689_vm10, %v735_v20, %v739_v46  ;;  %v1506_v2 = vrot.slane %v1504_v21, 4  ;;  %v2174_v1 = vrot.slane %v2172_v32, 4  ;;  %v2177_v4 = vrot.slane %v2175_v54, 5 }
 0x102   : > { %4708 = vmatmul.msk.bf16.gmra.mxu3 %vm1089_vm13, %v1088_v5  ;;  %v750_v23 = vsel %vm6689_vm10, %v745_v35, %v749_v47  ;;  %v1047_v59 = vunpack.c.l.b16 %v740_v60  ;;  %v2183_v52 = vrot.slane %v2181_v0, 5  ;;  %v2185_v36 = vshrl.u32 %v4934_v10, 16  ;;  %v4938_v0 = vld [vmem:[%s5873_s9 + $0x20] sm:$0x1] }
 0x103   : > { %v1048_v62 = vunpack.c.l.b16 %v750_v23  ;;  %v1508_v31 = vsel %vm6865_vm0, %v1506_v2, %v1507_v44  ;;  %v1616_v50 = vunpack.c.l.b16 %v1505_v61  ;;  %v2178_v55 = vor.u32 %v2177_v4, %v2174_v1 }
 0x104   : > { %v2191_v8 = vshll.u32 %v4935_v39, 16  ;;  %v1617_v42 = vunpack.c.l.b16 %v1508_v31  ;;  %v2187_v33 = vrot.slane %v2185_v36, 4  ;;  %v3993_v18 = vsel %vm1138_vm7, %v3895_v15, 0 }
 0x105   : > { %v1076_v11 = vpack.c.b16 %v1048_v62, %v1047_v59  ;;  %4002 = vmatpush.bf16.msra.mxu3 %v3993_v18  ;;  %v2179_v44 = vrot.slane %v2178_v55, 4  ;;  %v3052_v24 = vsel %vm1138_vm7, %v2954_v12, 0  ;;  %v4391_v28 = vsel %vm1138_vm7, %v4293_v56, 0  ;;  %v1453_v55 = vld [vmem:[%s5873_s9 + $0x18] sm:$0xe] }
 0x106   : > { %v2188_v7 = vor.u32 %v2187_v33, %v2183_v52  ;;  %v2193_v38 = vrot.slane %v2191_v8, 5  ;;  %4400 = vmatpush.bf16.msra.mxu0 %v4391_v28  ;;  %v1648_v51 = vpack.c.b16 %v1617_v42, %v1616_v50  ;;  %3061 = vmatpush.bf16.msra.mxu1 %v3052_v24  ;;  %v1511_v47 = vrot.slane %v6753_v34, 5  ;;  %v5291_v18 = vld [vmem:[%s5873_s9 + $0x18] sm:$0xff] }
 0x107   : > { %4696 = vmatmul.msk.bf16.gmra.mxu0 %vm1089_vm13, %v1076_v11  ;;  %v2184_v58 = vsel %vm6689_vm10, %v2179_v44, %v2183_v52  ;;  %v2196_v49 = vshrl.u32 %v4936_v30, 16  ;;  %v2199_v10 = vshll.u32 %v4936_v30, 16  ;;  %v2205_v63 = vshll.u32 %v4937_v25, 16  ;;  %v4939_v52 = vld [vmem:[%s5873_s9 + $0x24] sm:$0xf] }
 0x108   : > { %v2189_v46 = vrot.slane %v2188_v7, 4  ;;  %v2209_v27 = vshrl.u32 %v4937_v25, 16  ;;  %v4790_v17 = vrot.slane %v1452_v40, 9  ;;  %v1513_v20 = vrot.slane %v1511_v47, 4  ;;  %v4941_v25 = vld [vmem:[%s5873_s9 + $0x2c] sm:$0x1] }
 0x109   : > { %4773 = vmatmul.msk.bf16.vlgmr.msrb.gmra.mxu1 %vm1089_vm13, %v5274_v16  ;;  %v1514_v34 = vrot.slane %v6756_v3, 5  ;;  %v2557_v21 = vunpack.c.l.b16 %v2184_v58  ;;  %v2198_v32 = vrot.slane %v2196_v49, 4  ;;  %v2201_v5 = vrot.slane %v2199_v10, 5  ;;  %v5275_v3 = vld [vmem:[%s5873_s9 + $0xc] sm:$0xff]  ;;  %v4940_v16 = vld [vmem:[%s5873_s9 + $0x28] sm:$0xf] }
 0x10a   : > { %v2194_v43 = vsel %vm6689_vm10, %v2189_v46, %v2193_v38  ;;  %v2207_v35 = vrot.slane %v2205_v63, 5  ;;  %v2211_v54 = vrot.slane %v2209_v27, 4  ;;  %v1512_v60 = vsel %vm6865_vm0, %v4790_v17, %v1511_v47 }
 0x10b   : > { %v2558_v26 = vunpack.c.l.b16 %v2194_v43  ;;  %v1515_v61 = vsel %vm6865_vm0, %v1513_v20, %v1514_v34  ;;  %v2202_v39 = vor.u32 %v2201_v5, %v2198_v32  ;;  %v2215_v23 = vshll.u32 %v4938_v0, 16  ;;  %v4942_v34 = vld [vmem:[%s5873_s9 + $0x30] sm:$0xf] }
 0x10c   : > { %v2212_v1 = vor.u32 %v2211_v54, %v2207_v35  ;;  %v1618_v59 = vunpack.c.l.b16 %v1512_v60  ;;  %v1619_v4 = vunpack.c.l.b16 %v1515_v61  ;;  %v1518_v50 = vrot.slane %v6797_v57, 5 }
 0x10d   : > { %4805 = vmatmul.msk.bf16.vlgmr.msrb.gmra.mxu2 %vm1089_vm13, %v1648_v51  ;;  %v2589_v2 = vpack.c.b16 %v2558_v26, %v2557_v21  ;;  %v2203_v15 = vrot.slane %v2202_v39, 4  ;;  %v2217_v31 = vrot.slane %v2215_v23, 5  ;;  %v2220_v8 = vshrl.u32 %v4939_v52, 16  ;;  %v4943_v26 = vld [vmem:[%s5873_s9 + $0x34] sm:$0xf] }
 0x10e   : > { %v2213_v62 = vrot.slane %v2212_v1, 4  ;;  %v1649_v36 = vpack.c.b16 %v1619_v4, %v1618_v59  ;;  %v2223_v12 = vshll.u32 %v4939_v52, 16  ;;  %v2229_v42 = vshll.u32 %v4940_v16, 16  ;;  %v4944_v52 = vld [vmem:[%s5873_s9 + $0x38] sm:$0x1] }
 0x10f   : > { %v2208_v56 = vsel %vm6689_vm10, %v2203_v15, %v2207_v35  ;;  %v2233_v33 = vshrl.u32 %v4940_v16, 16  ;;  %v4791_v44 = vrot.slane %v1453_v55, 9  ;;  %v1520_v7 = vrot.slane %v1518_v50, 4  ;;  %v1454_v35 = vld [vmem:[%s5873_s9 + $0x24] sm:$0xe] }
 0x110   : > { %v2218_v11 = vsel %vm6689_vm10, %v2213_v62, %v2217_v31  ;;  %v1521_v57 = vrot.slane %v6803_v29, 5  ;;  %v2559_v24 = vunpack.c.l.b16 %v2208_v56  ;;  %v2222_v38 = vrot.slane %v2220_v8, 4  ;;  %v5276_v29 = vld [vmem:[%s5873_s9 + $0x18] sm:$0xff] }
 0x111   : > { %v2560_v28 = vunpack.c.l.b16 %v2218_v11  ;;  %v2225_v30 = vrot.slane %v2223_v12, 5  ;;  %v2231_v51 = vrot.slane %v2229_v42, 5  ;;  %v2235_v46 = vrot.slane %v2233_v33, 4  ;;  %v4945_v42 = vld [vmem:[%s5873_s9 + $0x3c] sm:$0xf] }
 0x112   : > { %4917 = vmatmul.msk.bf16.vlgmr.msrb.gmra.mxu3 %vm1089_vm13, %v5290_v14  ;;  %v1519_v47 = vsel %vm6865_vm0, %v4791_v44, %v1518_v50  ;;  %v1522_v58 = vsel %vm6865_vm0, %v1520_v7, %v1521_v57  ;;  %v2239_v10 = vshll.u32 %v4941_v25, 16  ;;  %v1525_v32 = vrot.slane %v6845_v13, 5  ;;  %v4946_v33 = vld [vmem:[%s5873_s9 + $0x40] sm:$0xf] }
 0x113   : > { %v2590_v40 = vpack.c.b16 %v2560_v28, %v2559_v24  ;;  %v2226_v49 = vor.u32 %v2225_v30, %v2222_v38  ;;  %v2236_v43 = vor.u32 %v2235_v46, %v2231_v51  ;;  %v1620_v63 = vunpack.c.l.b16 %v1519_v47  ;;  %v5632_v24 = vld [vmem:[%s5873_s9 + $0x34] sm:$0xf]  ;;  %v1455_v38 = vld [vmem:[%s5873_s9 + $0x30] sm:$0xe] }
 0x114   : > { %v1621_v27 = vunpack.c.l.b16 %v1522_v58  ;;  %v2241_v20 = vrot.slane %v2239_v10, 5  ;;  %v2244_v54 = vshrl.u32 %v4942_v34, 16  ;;  %v2247_v60 = vshll.u32 %v4942_v34, 16 }
 0x115   : > { %v2227_v14 = vrot.slane %v2226_v49, 4  ;;  %v2237_v17 = vrot.slane %v2236_v43, 4  ;;  %v2253_v61 = vshll.u32 %v4943_v26, 16  ;;  %v4792_v39 = vrot.slane %v1454_v35, 9  ;;  %v5633_v43 = vld [vmem:[%s5873_s9 + $0x38] sm:$0x1] }
 0x116   : > { %v1650_v21 = vpack.c.b16 %v1621_v27, %v1620_v63  ;;  %v1527_v1 = vrot.slane %v1525_v32, 4  ;;  %v1528_v13 = vrot.slane %v6848_v22, 5  ;;  %v2246_v4 = vrot.slane %v2244_v54, 4  ;;  %v5277_v22 = vld [vmem:[%s5873_s9 + $0x24] sm:$0xff]  ;;  %v5293_v63 = vld [vmem:[%s5873_s9 + $0x30] sm:$0xff] }
 0x117   : > { %4981 = vmatmul.msk.bf16.vlgmr.msrb.gmra.mxu0 %vm1089_vm13, %v2589_v2  ;;  %v2232_v5 = vsel %vm6689_vm10, %v2227_v14, %v2231_v51  ;;  %v2242_v0 = vsel %vm6689_vm10, %v2237_v17, %v2241_v20  ;;  %v2257_v2 = vshrl.u32 %v4943_v26, 16  ;;  %v2249_v15 = vrot.slane %v2247_v60, 5  ;;  %v4947_v26 = vld [vmem:[%s5873_s9 + $0x44] sm:$0x1] }
 0x118   : > { %v2561_v23 = vunpack.c.l.b16 %v2232_v5  ;;  %v2562_v59 = vunpack.c.l.b16 %v2242_v0  ;;  %v2255_v62 = vrot.slane %v2253_v61, 5  ;;  %v1529_v16 = vsel %vm6865_vm0, %v1527_v1, %v1528_v13  ;;  %v5278_v61 = vld [vmem:[%s5873_s9 + $0x30] sm:$0xff] }
 0x119   : > { %4774 = vmatmul.msk.bf16.gmra.mxu1 %vm1089_vm13, %v5275_v3  ;;  %v5292_v3 = vld [vmem:[%s5873_s9 + $0x24] sm:$0xff]  ;;  %v2259_v31 = vrot.slane %v2257_v2, 4  ;;  %v2250_v55 = vor.u32 %v2249_v15, %v2246_v4  ;;  %v2263_v12 = vshll.u32 %v4944_v52, 16  ;;  %v1623_v11 = vunpack.c.l.b16 %v1529_v16  ;;  %v4949_v15 = vld [vmem:[%s5873_s9 + $0x4c] sm:$0xf] }
 0x11a   : > { %v2591_v50 = vpack.c.b16 %v2562_v59, %v2561_v23  ;;  %v1532_v28 = vrot.slane %v5632_v24, 5  ;;  %v2268_v30 = vshrl.u32 %v4945_v42, 16  ;;  %v2271_v51 = vshll.u32 %v4945_v42, 16  ;;  %v4948_v4 = vld [vmem:[%s5873_s9 + $0x48] sm:$0xf]  ;;  %v5294_v42 = vld [vmem:[%s5873_s9 + $0x3c] sm:$0xff] }
 0x11b   : > { %v2260_v8 = vor.u32 %v2259_v31, %v2255_v62  ;;  %v2265_v7 = vrot.slane %v2263_v12, 5  ;;  %v2277_v46 = vshll.u32 %v4946_v33, 16  ;;  %v2281_v25 = vshrl.u32 %v4946_v33, 16 }
 0x11c   : > { %v4793_v49 = vrot.slane %v1455_v38, 9  ;;  %v1535_v10 = vrot.slane %v5633_v43, 5  ;;  %v2270_v27 = vrot.slane %v2268_v30, 4  ;;  %v2273_v14 = vrot.slane %v2271_v51, 5  ;;  %v4950_v51 = vld [vmem:[%s5873_s9 + $0x50] sm:$0x1] }
 0x11d   : > { %4806 = vmatmul.msk.bf16.gmra.mxu2 %vm1089_vm13, %v1649_v36  ;;  %v1526_v36 = vsel %vm6865_vm0, %v4792_v39, %v1525_v32  ;;  %v2261_v44 = vrot.slane %v2260_v8, 4  ;;  %v2279_v17 = vrot.slane %v2277_v46, 5  ;;  %v2283_v20 = vrot.slane %v2281_v25, 4  ;;  %v5279_v43 = vld [vmem:[%s5873_s9 + $0x3c] sm:$0xff] }
 0x11e   : > { %v1622_v56 = vunpack.c.l.b16 %v1526_v36  ;;  %v1533_v32 = vsel %vm6865_vm0, %v4793_v49, %v1532_v28  ;;  %v2274_v35 = vor.u32 %v2273_v14, %v2270_v27  ;;  %v2287_v0 = vshll.u32 %v4947_v26, 16 }
 0x11f   : > { %v2284_v54 = vor.u32 %v2283_v20, %v2279_v17  ;;  %v1624_v2 = vunpack.c.l.b16 %v1533_v32  ;;  %v1539_v16 = vrot.slane %v6722_v53, 5  ;;  %v2295_v8 = vshll.u32 %v4948_v4, 16  ;;  %v4951_v32 = vld [vmem:[%s5873_s9 + $0x54] sm:$0xf] }
 0x120   : > { %v1651_v57 = vpack.c.b16 %v1623_v11, %v1622_v56  ;;  %v2275_v13 = vrot.slane %v2274_v35, 4  ;;  %v2289_v59 = vrot.slane %v2287_v0, 5  ;;  %v2301_v12 = vshll.u32 %v4949_v15, 16 }
 0x121   : > { %v2285_v23 = vrot.slane %v2284_v54, 4  ;;  %v2305_v56 = vshrl.u32 %v4949_v15, 16  ;;  %v1546_v35 = vrot.slane %v6768_v41, 5  ;;  %v1549_v41 = vrot.slane %v6772_v45, 5 }
 0x122   : > { %4918 = vmatmul.msk.bf16.gmra.mxu3 %vm1089_vm13, %v5291_v18  ;;  %v2251_v18 = vrot.slane %v2250_v55, 4  ;;  %v2280_v52 = vsel %vm6689_vm10, %v2275_v13, %v2279_v17  ;;  %v2292_v55 = vshrl.u32 %v4948_v4, 16  ;;  %v2303_v38 = vrot.slane %v2301_v12, 5 }
 0x123   : > { %v2290_v36 = vsel %vm6689_vm10, %v2285_v23, %v2289_v59  ;;  %v2565_v11 = vunpack.c.l.b16 %v2280_v52  ;;  %v2307_v30 = vrot.slane %v2305_v56, 4  ;;  %v5295_v59 = vld [vmem:[%s5873_s9 + $0x48] sm:$0xff]  ;;  %v1548_v15 = vrot.slane %v1546_v35, 4  ;;  %v4953_v56 = vld [vmem:[%s5873_s9 + $0x5c] sm:$0x1] }
 0x124   : > { %v2256_v58 = vsel %vm6689_vm10, %v2251_v18, %v2255_v62  ;;  %v2566_v33 = vunpack.c.l.b16 %v2290_v36  ;;  %v2294_v24 = vrot.slane %v2292_v55, 4 }
 0x125   : > { %v2563_v34 = vunpack.c.l.b16 %v2256_v58  ;;  %v2308_v49 = vor.u32 %v2307_v30, %v2303_v38  ;;  %v1550_v45 = vsel %vm6865_vm0, %v1548_v15, %v1549_v41  ;;  %v4954_v30 = vld [vmem:[%s5873_s9 + $0x60] sm:$0xf]  ;;  %v4956_v15 = vld [vmem:[%s5873_s9 + $0x68] sm:$0x1] }
 0x126   : > { %v2593_v58 = vpack.c.b16 %v2566_v33, %v2565_v11 }
 0x127   : > { %4982 = vmatmul.msk.bf16.gmra.mxu0 %vm1089_vm13, %v2590_v40  ;;  %v2266_v40 = vsel %vm6689_vm10, %v2261_v44, %v2265_v7  ;;  %v1541_v44 = vrot.slane %v1539_v16, 4  ;;  %v1542_v7 = vrot.slane %v6726_v6, 5  ;;  %v2309_v17 = vrot.slane %v2308_v49, 4 }
 0x129   : > { %4775 = vmatmul.msk.bf16.gmra.mxu1 %vm1089_vm13, %v5276_v29  ;;  %v1534_v29 = vrot.slane %v1532_v28, 4  ;;  %v2297_v28 = vrot.slane %v2295_v8, 5  ;;  %v1543_v25 = vsel %vm6865_vm0, %v1541_v44, %v1542_v7 }
 0x12a   : > { %v1627_v27 = vunpack.c.l.b16 %v1543_v25 }
 0x12b   : > { %v1536_v5 = vsel %vm6865_vm0, %v1534_v29, %v1535_v10  ;;  %v2311_v29 = vshll.u32 %v4950_v51, 16  ;;  %v4955_v51 = vld [vmem:[%s5873_s9 + $0x64] sm:$0xf] }
 0x12d   : > { %4807 = vmatmul.msk.bf16.gmra.mxu2 %vm1089_vm13, %v1650_v21  ;;  %v2564_v21 = vunpack.c.l.b16 %v2266_v40  ;;  %v2298_v40 = vor.u32 %v2297_v28, %v2294_v24  ;;  %v2313_v20 = vrot.slane %v2311_v29, 5  ;;  %v2335_v24 = vshll.u32 %v4953_v56, 16  ;;  %v5281_v56 = vld [vmem:[%s5873_s9 + $0x54] sm:$0xff] }
 0x12f   : > { %v2592_v60 = vpack.c.b16 %v2564_v21, %v2563_v34  ;;  %v2299_v14 = vrot.slane %v2298_v40, 4  ;;  %v2314_v0 = vsel %vm6689_vm10, %v2309_v17, %v2313_v20  ;;  %v2337_v49 = vrot.slane %v2335_v24, 5 }
 0x130   : > { %v2568_v52 = vunpack.c.l.b16 %v2314_v0  ;;  %v2353_v17 = vshrl.u32 %v4955_v51, 16 }
 0x131   : > { %v2304_v54 = vsel %vm6689_vm10, %v2299_v14, %v2303_v38  ;;  %v1629_v38 = vunpack.c.l.b16 %v1550_v45  ;;  %v1553_v14 = vrot.slane %v6812_v37, 5 }
 0x132   : > { %4919 = vmatmul.msk.bf16.gmra.mxu3 %vm1089_vm13, %v5292_v3  ;;  %v1625_v3 = vunpack.c.l.b16 %v1536_v5  ;;  %v4952_v5 = vld [vmem:[%s5873_s9 + $0x58] sm:$0xf] }
 0x133   : > { %v2329_v13 = vshrl.u32 %v4952_v5, 16 }
 0x134   : > { %v1652_v31 = vpack.c.b16 %v1625_v3, %v1624_v2  ;;  %v2319_v2 = vshll.u32 %v4951_v32, 16  ;;  %v2325_v3 = vshll.u32 %v4952_v5, 16 }
 0x135   : > { %v2331_v8 = vrot.slane %v2329_v13, 4  ;;  %v2355_v13 = vrot.slane %v2353_v17, 4 }
 0x136   : > { %v2327_v55 = vrot.slane %v2325_v3, 5  ;;  %v1556_v3 = vrot.slane %v6819_v9, 5 }
 0x137   : > { %4983 = vmatmul.msk.bf16.gmra.mxu0 %vm1089_vm13, %v2591_v50 }
 0x138   : > { %v2332_v7 = vor.u32 %v2331_v8, %v2327_v55 }
 0x139   : > { %4776 = vmatmul.msk.bf16.gmra.mxu1 %vm1089_vm13, %v5277_v22  ;;  %v1456_v22 = vld [vmem:[%s5873_s9 + $0x3c] sm:$0xe] }
 0x13a   : > { %v4794_v18 = vrot.slane %v1456_v22, 9  ;;  %v2321_v22 = vrot.slane %v2319_v2, 5  ;;  %v2333_v40 = vrot.slane %v2332_v7, 4  ;;  %v1555_v2 = vrot.slane %v1553_v14, 4 }
 0x13c   : > { %v1540_v46 = vsel %vm6865_vm0, %v4794_v18, %v1539_v16  ;;  %v5280_v18 = vld [vmem:[%s5873_s9 + $0x48] sm:$0xff]  ;;  %v2338_v5 = vsel %vm6689_vm10, %v2333_v40, %v2337_v49  ;;  %v5634_v49 = vld [vmem:[%s5873_s9 + $0x64] sm:$0xf] }
 0x13d   : > { %v6951_v47 = vpop.f32.mrf.mxu1  ;;  %4808 = vmatmul.msk.bf16.gmra.mxu2 %vm1089_vm13, %v1651_v57 }
 0x142   : > { %4920 = vmatmul.msk.bf16.gmra.mxu3 %vm1089_vm13, %v5293_v63  ;;  %v1626_v63 = vunpack.c.l.b16 %v1540_v46 }
 0x144   : > { %v1653_v21 = vpack.c.b16 %v1627_v27, %v1626_v63  ;;  %v2343_v63 = vshll.u32 %v4954_v30, 16  ;;  %v2349_v27 = vshll.u32 %v4955_v51, 16 }
 0x145   : > { %v6969_v1 = vpop.f32.mrf.mxu1 }
 0x146   : > { %v6967_v39 = vpop.f32.mrf.mxu2  ;;  %v2345_v0 = vrot.slane %v2343_v63, 5  ;;  %v1459_v63 = vld [vmem:[%s5873_s9 + $0x60] sm:$0xe] }
 0x147   : > { %4984 = vmatmul.msk.bf16.gmra.mxu0 %vm1089_vm13, %v2592_v60  ;;  %v1457_v60 = vld [vmem:[%s5873_s9 + $0x48] sm:$0xe] }
 0x148   : > { %v4795_v4 = vrot.slane %v1457_v60, 9  ;;  %v2351_v60 = vrot.slane %v2349_v27, 5 }
 0x149   : > { %4777 = vmatmul.msk.bf16.gmra.mxu1 %vm1089_vm13, %v5278_v61  ;;  %v2316_v61 = vshrl.u32 %v4951_v32, 16 }
 0x14a   : > { %v6982_v50 = vpop.f32.mrf.mxu3  ;;  %v1547_v11 = vsel %vm6865_vm0, %v4795_v4, %v1546_v35  ;;  %v2570_v4 = vunpack.c.l.b16 %v2338_v5  ;;  %v2356_v9 = vor.u32 %v2355_v13, %v2351_v60 }
 0x14b   : > { %v6975_v62 = vpop.f32.mrf.mxu0  ;;  %v2318_v16 = vrot.slane %v2316_v61, 4  ;;  %v1628_v28 = vunpack.c.l.b16 %v1547_v11  ;;  %v5296_v61 = vld [vmem:[%s5873_s9 + $0x54] sm:$0xff] }
 0x14c   : > { %v2357_v7 = vrot.slane %v2356_v9, 4 }
 0x14d   : > { %4809 = vmatmul.msk.bf16.gmra.mxu2 %vm1089_vm13, %v1652_v31  ;;  %v2567_v31 = vunpack.c.l.b16 %v2304_v54  ;;  %v2322_v44 = vor.u32 %v2321_v22, %v2318_v16  ;;  %v1654_v29 = vpack.c.b16 %v1629_v38, %v1628_v28  ;;  %v1557_v22 = vsel %vm6865_vm0, %v1555_v2, %v1556_v3  ;;  %v4957_v28 = vld [vmem:[%s5873_s9 + $0x6c] sm:$0xf]  ;;  %v4958_v38 = vld [vmem:[%s5873_s9 + $0x70] sm:$0xf] }
 0x14e   : > { %v6988_v57 = vpop.f32.mrf.mxu2  ;;  %v2364_v27 = vshrl.u32 %v4957_v28, 16  ;;  %v2373_v17 = vshll.u32 %v4958_v38, 16 }
 0x150   : > { %v6990_v53 = vpop.f32.mrf.mxu1  ;;  %v2366_v3 = vrot.slane %v2364_v27, 4  ;;  %v4961_v27 = vld [vmem:[%s5873_s9 + $0x7c] sm:$0xf] }
 0x152   : > { %4921 = vmatmul.msk.bf16.gmra.mxu3 %vm1089_vm13, %v5294_v42  ;;  %v7001_v10 = vpop.f32.mrf.mxu3  ;;  %v2594_v42 = vpack.c.b16 %v2568_v52, %v2567_v31 }
 0x153   : > { %v6998_v6 = vpop.f32.mrf.mxu0 }
 0x157   : > { %4985 = vmatmul.msk.bf16.gmra.mxu0 %vm1089_vm13, %v2593_v58  ;;  %v2323_v58 = vrot.slane %v2322_v44, 4 }
 0x158   : > { %v7004_v34 = vpop.f32.mrf.mxu1 }
 0x159   : > { %4778 = vmatmul.msk.bf16.gmra.mxu1 %vm1089_vm13, %v5279_v43  ;;  %v2340_v43 = vshrl.u32 %v4954_v30, 16  ;;  %v2328_v32 = vsel %vm6689_vm10, %v2323_v58, %v2327_v55  ;;  %v2359_v55 = vshll.u32 %v4956_v15, 16 }
 0x15a   : > { %v7007_v26 = vpop.f32.mrf.mxu2 }
 0x15b   : > { %v2342_v54 = vrot.slane %v2340_v43, 4  ;;  %v2361_v24 = vrot.slane %v2359_v55, 5 }
 0x15d   : > { %4810 = vmatmul.msk.bf16.gmra.mxu2 %vm1089_vm13, %v1653_v21  ;;  %v1458_v21 = vld [vmem:[%s5873_s9 + $0x54] sm:$0xe]  ;;  %v2346_v52 = vor.u32 %v2345_v0, %v2342_v54  ;;  %v2362_v40 = vsel %vm6689_vm10, %v2357_v7, %v2361_v24  ;;  %v5297_v0 = vld [vmem:[%s5873_s9 + $0x60] sm:$0xff] }
 0x15e   : > { %v7017_v23 = vpop.f32.mrf.mxu0  ;;  %v4796_v37 = vrot.slane %v1458_v21, 9  ;;  %v2377_v21 = vshrl.u32 %v4958_v38, 16 }
 0x15f   : > { %v2347_v44 = vrot.slane %v2346_v52, 4  ;;  %v4959_v52 = vld [vmem:[%s5873_s9 + $0x74] sm:$0x1] }
 0x160   : > { %v7022_v36 = vpop.f32.mrf.mxu3  ;;  %v1554_v16 = vsel %vm6865_vm0, %v4796_v37, %v1553_v14  ;;  %v2367_v14 = vshll.u32 %v4957_v28, 16  ;;  %v4797_v37 = vrot.slane %v1459_v63, 9  ;;  %v4960_v63 = vld [vmem:[%s5873_s9 + $0x78] sm:$0xf] }
 0x161   : > { %v1630_v45 = vunpack.c.l.b16 %v1554_v16  ;;  %v2352_v58 = vsel %vm6689_vm10, %v2347_v44, %v2351_v60 }
 0x162   : > { %v7024_v12 = vpop.f32.mrf.mxu1  ;;  %4922 = vmatmul.msk.bf16.gmra.mxu3 %vm1089_vm13, %v5295_v59  ;;  %v7032_v33 = vpop.f32.mrf.mxu2  ;;  %v2569_v59 = vunpack.c.l.b16 %v2328_v32  ;;  %v5635_v32 = vld [vmem:[%s5873_s9 + $0x68] sm:$0x1]  ;;  %v2571_v60 = vunpack.c.l.b16 %v2352_v58  ;;  %v2369_v13 = vrot.slane %v2367_v14, 5  ;;  %v5636_v14 = vld [vmem:[%s5873_s9 + $0x70] sm:$0xf] }
 0x163   : > { %v1563_v5 = vrot.slane %v5635_v32, 5  ;;  %v1460_v32 = vld [vmem:[%s5873_s9 + $0x6c] sm:$0xe] }
 0x164   : > { %v2595_v8 = vpack.c.b16 %v2570_v4, %v2569_v59  ;;  %v2375_v59 = vrot.slane %v2373_v17, 5  ;;  %v2379_v4 = vrot.slane %v2377_v21, 4  ;;  %v2370_v55 = vor.u32 %v2369_v13, %v2366_v3  ;;  %v5637_v13 = vld [vmem:[%s5873_s9 + $0x74] sm:$0x1] }
 0x165   : > { %v1567_v17 = vrot.slane %v5636_v14, 5 }
 0x166   : > { %v7038_v46 = vpop.f32.mrf.mxu0 }
 0x167   : > { %4986 = vmatmul.msk.bf16.gmra.mxu0 %vm1089_vm13, %v2594_v42  ;;  %v1631_v42 = vunpack.c.l.b16 %v1557_v22 }
 0x168   : > { %v7040_v25 = vpop.f32.mrf.mxu3 }
 0x169   : > { %4779 = vmatmul.msk.bf16.gmra.mxu1 %vm1089_vm13, %v5280_v18  ;;  %v1655_v30 = vpack.c.b16 %v1631_v42, %v1630_v45  ;;  %v5282_v42 = vld [vmem:[%s5873_s9 + $0x60] sm:$0xff] }
 0x16a   : > { %v7044_v20 = vpop.f32.mrf.mxu1 }
 0x16d   : > { %4811 = vmatmul.msk.bf16.gmra.mxu2 %vm1089_vm13, %v1654_v29  ;;  %v1560_v29 = vrot.slane %v5634_v49, 5 }
 0x16e   : > { %v7052_v35 = vpop.f32.mrf.mxu2 }
 0x16f   : > { %v1562_v2 = vrot.slane %v1560_v29, 4  ;;  %v1561_v16 = vsel %vm6865_vm0, %v4797_v37, %v1560_v29  ;;  %v2401_v37 = vshrl.u32 %v4961_v27, 16 }
 0x170   : > { %v1632_v24 = vunpack.c.l.b16 %v1561_v16  ;;  %v4798_v16 = vrot.slane %v1460_v32, 9 }
 0x171   : > { %v7057_v41 = vpop.f32.mrf.mxu0  ;;  %v1564_v22 = vsel %vm6865_vm0, %v1562_v2, %v1563_v5 }
 0x172   : > { %v7059_v31 = vpop.f32.mrf.mxu3  ;;  %4923 = vmatmul.msk.bf16.gmra.mxu3 %vm1089_vm13, %v5296_v61  ;;  %v2572_v61 = vunpack.c.l.b16 %v2362_v40  ;;  %v1633_v28 = vunpack.c.l.b16 %v1564_v22  ;;  %v1569_v22 = vrot.slane %v1567_v17, 4 }
 0x174   : > { %v2596_v9 = vpack.c.b16 %v2572_v61, %v2571_v60  ;;  %v1656_v29 = vpack.c.b16 %v1633_v28, %v1632_v24  ;;  %v2391_v60 = vshll.u32 %v4960_v63, 16  ;;  %v2397_v61 = vshll.u32 %v4961_v27, 16 }
 0x175   : > { %v2403_v24 = vrot.slane %v2401_v37, 4 }
 0x176   : > { %v7067_v11 = vpop.f32.mrf.mxu1  ;;  %v7069_v18 = vpop.f32.mrf.mxu2 }
 0x177   : > { %4987 = vmatmul.msk.bf16.gmra.mxu0 %vm1089_vm13, %v2595_v8  ;;  %v2380_v8 = vor.u32 %v2379_v4, %v2375_v59  ;;  %v1570_v4 = vrot.slane %v5637_v13, 5 }
 0x179   : > { %4780 = vmatmul.msk.bf16.gmra.mxu1 %vm1089_vm13, %v5281_v56  ;;  %v7075_v51 = vpop.f32.mrf.mxu0  ;;  %v2383_v56 = vshll.u32 %v4959_v52, 16  ;;  %v2381_v58 = vrot.slane %v2380_v8, 4  ;;  %v5298_v52 = vld [vmem:[%s5873_s9 + $0x6c] sm:$0xff] }
 0x17a   : > { %v7082_v43 = vpop.f32.mrf.mxu3 }
 0x17b   : > { %v2385_v40 = vrot.slane %v2383_v56, 5 }
 0x17d   : > { %4812 = vmatmul.msk.bf16.gmra.mxu2 %vm1089_vm13, %v1655_v30  ;;  %v2371_v30 = vrot.slane %v2370_v55, 4 }
 0x17e   : > { %v7087_v54 = vpop.f32.mrf.mxu1 }
 0x17f   : > { %v2376_v21 = vsel %vm6689_vm10, %v2371_v30, %v2375_v59  ;;  %v4962_v30 = vld [vmem:[%s5873_s9 + $0x80] sm:$0x1] }
 0x180   : > { %v7090_v15 = vpop.f32.mrf.mxu2 }
 0x182   : > { %4924 = vmatmul.msk.bf16.gmra.mxu3 %vm1089_vm13, %v5297_v0  ;;  %v2388_v0 = vshrl.u32 %v4960_v63, 16  ;;  %v5283_v63 = vld [vmem:[%s5873_s9 + $0x6c] sm:$0xff] }
 0x184   : > { %v7098_v45 = vpop.f32.mrf.mxu0  ;;  %v2390_v56 = vrot.slane %v2388_v0, 4 }
 0x185   : > { %v7101_v44 = vpop.f32.mrf.mxu3 }
 0x186   : > { %v1371_v7 = vpop.f32.mrf.mxu1 }
 0x187   : > { %v1372_v38 = vadd.f32 %v1371_v7, %v6975_v62  ;;  %4988 = vmatmul.msk.bf16.gmra.mxu0 %vm1089_vm13, %v2596_v9  ;;  %v2386_v62 = vsel %vm6689_vm10, %v2381_v58, %v2385_v40  ;;  %v2573_v9 = vunpack.c.l.b16 %v2376_v21  ;;  %v2399_v7 = vrot.slane %v2397_v61, 5 }
 0x188   : > { %v7105_v49 = vpop.f32.mrf.mxu2  ;;  %v2574_v55 = vunpack.c.l.b16 %v2386_v62  ;;  %v1568_v58 = vsel %vm6865_vm0, %v4798_v16, %v1567_v17  ;;  %v2407_v21 = vshll.u32 %v4962_v30, 16 }
 0x189   : > { %4781 = vmatmul.msk.bf16.gmra.mxu1 %vm1089_vm13, %v5282_v42  ;;  %v2393_v42 = vrot.slane %v2391_v60, 5  ;;  %v2404_v14 = vor.u32 %v2403_v24, %v2399_v7 }
 0x18a   : > { %v2597_v40 = vpack.c.b16 %v2574_v55, %v2573_v9  ;;  %v2409_v13 = vrot.slane %v2407_v21, 5  ;;  %v4964_v9 = vld [vmem:[%s5873_s9 + $0x88] sm:$0xf]  ;;  %v5638_v55 = vld [vmem:[%s5873_s9 + $0x7c] sm:$0xf] }
 0x18b   : > { %v2394_v27 = vor.u32 %v2393_v42, %v2390_v56  ;;  %v1461_v56 = vld [vmem:[%s5873_s9 + $0x78] sm:$0xe] }
 0x18c   : > { %v7116_v5 = vpop.f32.mrf.mxu0 }
 0x18d   : > { %v7118_v2 = vpop.f32.mrf.mxu3  ;;  %4813 = vmatmul.msk.bf16.gmra.mxu2 %vm1089_vm13, %v1656_v29  ;;  %v2395_v37 = vrot.slane %v2394_v27, 4 }
 0x18e   : > { %v1373_v3 = vpop.f32.mrf.mxu1 }
 0x18f   : > { %v1374_v59 = vadd.f32 %v1373_v3, %v6998_v6  ;;  %v1571_v6 = vsel %vm6865_vm0, %v1569_v22, %v1570_v4  ;;  %v2405_v3 = vrot.slane %v2404_v14, 4  ;;  %v4963_v4 = vld [vmem:[%s5873_s9 + $0x84] sm:$0xf]  ;;  %v5299_v14 = vld [vmem:[%s5873_s9 + $0x78] sm:$0xff] }
 0x190   : > { %v1724_v8 = vpop.f32.mrf.mxu2  ;;  %v1635_v0 = vunpack.c.l.b16 %v1571_v6  ;;  %v2415_v42 = vshll.u32 %v4963_v4, 16  ;;  %v2425_v6 = vshrl.u32 %v4964_v9, 16 }
 0x191   : > { %v1804_v28 = vadd.f32 %v1724_v8, %v1372_v38  ;;  %v1634_v38 = vunpack.c.l.b16 %v1568_v58  ;;  %v1574_v8 = vrot.slane %v5638_v55, 5  ;;  %v2410_v30 = vsel %vm6689_vm10, %v2405_v3, %v2409_v13 }
 0x192   : > { %4925 = vmatmul.msk.bf16.gmra.mxu3 %vm1089_vm13, %v5298_v52  ;;  %v2421_v58 = vshll.u32 %v4964_v9, 16  ;;  %v2427_v3 = vrot.slane %v2425_v6, 4 }
 0x193   : > { %v1657_v22 = vpack.c.b16 %v1635_v0, %v1634_v38 }
 0x194   : > { %v2665_v29 = vpop.f32.mrf.mxu0 }
 0x195   : > { %v2011_v62 = vpop.f32.mrf.mxu3 }
 0x196   : > { %v1376_v32 = vpop.f32.mrf.mxu1  ;;  %v2091_v60 = vadd.f32 %v2011_v62, %v1804_v28  ;;  %v2400_v28 = vsel %vm6689_vm10, %v2395_v37, %v2399_v7  ;;  %v4799_v62 = vrot.slane %v1461_v56, 9  ;;  %v2576_v7 = vunpack.c.l.b16 %v2410_v30 }
 0x197   : > { %v1377_v17 = vadd.f32 %v1376_v32, %v7017_v23  ;;  %4989 = vmatmul.msk.bf16.gmra.mxu0 %vm1089_vm13, %v2597_v40  ;;  %v2412_v23 = vshrl.u32 %v4963_v4, 16  ;;  %v5639_v40 = vld [vmem:[%s5873_s9 + $0x80] sm:$0x1]  ;;  %v1576_v32 = vrot.slane %v1574_v8, 4  ;;  %v2575_v38 = vunpack.c.l.b16 %v2400_v28 }
 0x198   : > { %v1726_v61 = vpop.f32.mrf.mxu2  ;;  %v7135_v52 = vadd.f32 %v2665_v29, %v2091_v60  ;;  %v1577_v29 = vrot.slane %v5639_v40, 5  ;;  %v2417_v60 = vrot.slane %v2415_v42, 5  ;;  %v2423_v37 = vrot.slane %v2421_v58, 5 }
 0x199   : > { %4782 = vmatmul.msk.bf16.gmra.mxu1 %vm1089_vm13, %v5283_v63  ;;  %v1805_v16 = vadd.f32 %v1726_v61, %v1374_v59  ;;  %v2414_v0 = vrot.slane %v2412_v23, 4  ;;  %v2598_v9 = vpack.c.b16 %v2576_v7, %v2575_v38  ;;  %v5284_v23 = vld [vmem:[%s5873_s9 + $0x78] sm:$0xff]  ;;  %v4967_v38 = vld [vmem:[%s5873_s9 + $0x94] sm:$0xf]  ;;  %v5640_v7 = vld [vmem:[%s5873_s9 + $0x88] sm:$0xf] }
 0x19a   : > { %v2428_v42 = vor.u32 %v2427_v3, %v2423_v37 }
 0x19b   : > { %v2418_v55 = vor.u32 %v2417_v60, %v2414_v0  ;;  %v1581_v0 = vrot.slane %v5640_v7, 5  ;;  %v1462_v60 = vld [vmem:[%s5873_s9 + $0x84] sm:$0xe] }
 0x19c   : > { %v2667_v24 = vpop.f32.mrf.mxu0 }
 0x19d   : > { %v2013_v59 = vpop.f32.mrf.mxu3  ;;  %4814 = vmatmul.msk.bf16.gmra.mxu2 %vm1089_vm13, %v1657_v22  ;;  %v4965_v22 = vld [vmem:[%s5873_s9 + $0x8c] sm:$0x1]  ;;  %v2419_v40 = vrot.slane %v2418_v55, 4 }
 0x19e   : > { %v1378_v63 = vpop.f32.mrf.mxu1  ;;  %v2092_v27 = vadd.f32 %v2013_v59, %v1805_v16  ;;  %v1575_v16 = vsel %vm6865_vm0, %v4799_v62, %v1574_v8  ;;  %v2431_v28 = vshll.u32 %v4965_v22, 16  ;;  %v2429_v59 = vrot.slane %v2428_v42, 4  ;;  %v5300_v42 = vld [vmem:[%s5873_s9 + $0x84] sm:$0xff] }
 0x19f   : > { %v1379_v21 = vadd.f32 %v1378_v63, %v7038_v46  ;;  %v1578_v46 = vsel %vm6865_vm0, %v1576_v32, %v1577_v29 }
 0x1a0   : > { %v1729_v61 = vpop.f32.mrf.mxu2  ;;  %v7148_v13 = vadd.f32 %v2667_v24, %v2092_v27  ;;  %v1637_v58 = vunpack.c.l.b16 %v1578_v46  ;;  %v2433_v63 = vrot.slane %v2431_v28, 5  ;;  %v4966_v27 = vld [vmem:[%s5873_s9 + $0x90] sm:$0xf]  ;;  %v2449_v46 = vshrl.u32 %v4967_v38, 16 }
 0x1a1   : > { %v1806_v4 = vadd.f32 %v1729_v61, %v1377_v17  ;;  %v1636_v17 = vunpack.c.l.b16 %v1575_v16  ;;  %v2436_v61 = vshrl.u32 %v4966_v27, 16  ;;  %v2439_v22 = vshll.u32 %v4966_v27, 16 }
 0x1a2   : > { %4926 = vmatmul.msk.bf16.gmra.mxu3 %vm1089_vm13, %v5299_v14  ;;  %v2445_v16 = vshll.u32 %v4967_v38, 16  ;;  %v4800_v28 = vrot.slane %v1462_v60, 9 }
 0x1a3   : > { %v1658_v32 = vpack.c.b16 %v1637_v58, %v1636_v17  ;;  %v2438_v58 = vrot.slane %v2436_v61, 4 }
 0x1a4   : > { %v2670_v56 = vpop.f32.mrf.mxu0 }
 0x1a5   : > { %v2016_v30 = vpop.f32.mrf.mxu3 }
 0x1a6   : > { %v1381_v24 = vpop.f32.mrf.mxu1  ;;  %v2093_v6 = vadd.f32 %v2016_v30, %v1806_v4  ;;  %v2434_v4 = vsel %vm6689_vm10, %v2429_v59, %v2433_v63  ;;  %v1583_v30 = vrot.slane %v1581_v0, 4  ;;  %v2451_v59 = vrot.slane %v2449_v46, 4 }
 0x1a7   : > { %v1382_v8 = vadd.f32 %v1381_v24, %v7057_v41  ;;  %4990 = vmatmul.msk.bf16.gmra.mxu0 %vm1089_vm13, %v2598_v9  ;;  %v2424_v41 = vsel %vm6689_vm10, %v2419_v40, %v2423_v37  ;;  %v5641_v9 = vld [vmem:[%s5873_s9 + $0x8c] sm:$0x1]  ;;  %v2578_v17 = vunpack.c.l.b16 %v2434_v4  ;;  %v2441_v40 = vrot.slane %v2439_v22, 5 }
 0x1a8   : > { %v1731_v29 = vpop.f32.mrf.mxu2  ;;  %v7161_v14 = vadd.f32 %v2670_v56, %v2093_v6  ;;  %v1584_v55 = vrot.slane %v5641_v9, 5  ;;  %v2577_v24 = vunpack.c.l.b16 %v2424_v41  ;;  %v5285_v41 = vld [vmem:[%s5873_s9 + $0x84] sm:$0xff] }
 0x1a9   : > { %4783 = vmatmul.msk.bf16.gmra.mxu1 %vm1089_vm13, %v5284_v23  ;;  %v1807_v62 = vadd.f32 %v1731_v29, %v1379_v21  ;;  %v2447_v29 = vrot.slane %v2445_v16, 5  ;;  %v2442_v60 = vor.u32 %v2441_v40, %v2438_v58  ;;  %v1463_v40 = vld [vmem:[%s5873_s9 + $0x90] sm:$0xe] }
 0x1aa   : > { %v2599_v38 = vpack.c.b16 %v2578_v17, %v2577_v24  ;;  %v4970_v24 = vld [vmem:[%s5873_s9 + $0xa0] sm:$0xf] }
 0x1ab   : > { %v2452_v61 = vor.u32 %v2451_v59, %v2447_v29 }
 0x1ac   : > { %v2672_v3 = vpop.f32.mrf.mxu0 }
 0x1ad   : > { %v2018_v21 = vpop.f32.mrf.mxu3  ;;  %4815 = vmatmul.msk.bf16.gmra.mxu2 %vm1089_vm13, %v1658_v32  ;;  %v4968_v32 = vld [vmem:[%s5873_s9 + $0x98] sm:$0x1] }
 0x1ae   : > { %v1383_v56 = vpop.f32.mrf.mxu1  ;;  %v2094_v23 = vadd.f32 %v2018_v21, %v1807_v62  ;;  %v1585_v62 = vsel %vm6865_vm0, %v1583_v30, %v1584_v55  ;;  %v2455_v4 = vshll.u32 %v4968_v32, 16  ;;  %v2443_v21 = vrot.slane %v2442_v60, 4 }
 0x1af   : > { %v1384_v37 = vadd.f32 %v1383_v56, %v7075_v51  ;;  %v1582_v51 = vsel %vm6865_vm0, %v4800_v28, %v1581_v0  ;;  %v1639_v16 = vunpack.c.l.b16 %v1585_v62  ;;  %v4969_v0 = vld [vmem:[%s5873_s9 + $0x9c] sm:$0xf]  ;;  %v2453_v56 = vrot.slane %v2452_v61, 4 }
 0x1b0   : > { %v1734_v6 = vpop.f32.mrf.mxu2  ;;  %v7174_v63 = vadd.f32 %v2672_v3, %v2094_v23  ;;  %v2457_v23 = vrot.slane %v2455_v4, 5  ;;  %v2460_v17 = vshrl.u32 %v4969_v0, 16  ;;  %v2463_v58 = vshll.u32 %v4969_v0, 16 }
 0x1b1   : > { %v1808_v27 = vadd.f32 %v1734_v6, %v1382_v8  ;;  %v1638_v8 = vunpack.c.l.b16 %v1582_v51  ;;  %v5642_v6 = vld [vmem:[%s5873_s9 + $0x94] sm:$0xf]  ;;  %v2469_v51 = vshll.u32 %v4970_v24, 16  ;;  %v2473_v62 = vshrl.u32 %v4970_v24, 16 }
 0x1b2   : > { %4927 = vmatmul.msk.bf16.gmra.mxu3 %vm1089_vm13, %v5300_v42  ;;  %v2458_v32 = vsel %vm6689_vm10, %v2453_v56, %v2457_v23  ;;  %v2462_v60 = vrot.slane %v2460_v17, 4  ;;  %v2465_v61 = vrot.slane %v2463_v58, 5 }
 0x1b3   : > { %v1659_v30 = vpack.c.b16 %v1639_v16, %v1638_v8  ;;  %v4801_v8 = vrot.slane %v1463_v40, 9 }
 0x1b4   : > { %v2675_v7 = vpop.f32.mrf.mxu0  ;;  %v2466_v24 = vor.u32 %v2465_v61, %v2462_v60  ;;  %v4973_v60 = vld [vmem:[%s5873_s9 + $0xac] sm:$0xf] }
 0x1b5   : > { %v2021_v22 = vpop.f32.mrf.mxu3 }
 0x1b6   : > { %v1386_v3 = vpop.f32.mrf.mxu1  ;;  %v2095_v46 = vadd.f32 %v2021_v22, %v1808_v27  ;;  %v2448_v27 = vsel %vm6689_vm10, %v2443_v21, %v2447_v29  ;;  %v5301_v22 = vld [vmem:[%s5873_s9 + $0x90] sm:$0xff]  ;;  %v2475_v21 = vrot.slane %v2473_v62, 4 }
 0x1b7   : > { %v1387_v9 = vadd.f32 %v1386_v3, %v7098_v45  ;;  %4991 = vmatmul.msk.bf16.gmra.mxu0 %vm1089_vm13, %v2599_v38  ;;  %v1588_v45 = vrot.slane %v5642_v6, 5  ;;  %v5643_v38 = vld [vmem:[%s5873_s9 + $0x98] sm:$0x1]  ;;  %v2579_v16 = vunpack.c.l.b16 %v2448_v27  ;;  %v5286_v6 = vld [vmem:[%s5873_s9 + $0x90] sm:$0xff] }
 0x1b8   : > { %v1736_v55 = vpop.f32.mrf.mxu2  ;;  %v7187_v42 = vadd.f32 %v2675_v7, %v2095_v46  ;;  %v1591_v7 = vrot.slane %v5643_v38, 5  ;;  %v2580_v46 = vunpack.c.l.b16 %v2458_v32  ;;  %v2467_v38 = vrot.slane %v2466_v24, 4  ;;  %v5645_v24 = vld [vmem:[%s5873_s9 + $0xa4] sm:$0x1] }
 0x1b9   : > { %4784 = vmatmul.msk.bf16.gmra.mxu1 %vm1089_vm13, %v5285_v41  ;;  %v1809_v28 = vadd.f32 %v1736_v55, %v1384_v37  ;;  %v1590_v29 = vrot.slane %v1588_v45, 4  ;;  %v2471_v55 = vrot.slane %v2469_v51, 5 }
 0x1ba   : > { %v2600_v17 = vpack.c.b16 %v2580_v46, %v2579_v16  ;;  %v5644_v16 = vld [vmem:[%s5873_s9 + $0xa0] sm:$0xf] }
 0x1bb   : > { %v2476_v40 = vor.u32 %v2475_v21, %v2471_v55  ;;  %v1595_v46 = vrot.slane %v5644_v16, 5  ;;  %v1464_v21 = vld [vmem:[%s5873_s9 + $0x9c] sm:$0xe] }
 0x1bc   : > { %v2677_v59 = vpop.f32.mrf.mxu0 }
 0x1bd   : > { %v2023_v37 = vpop.f32.mrf.mxu3  ;;  %4816 = vmatmul.msk.bf16.gmra.mxu2 %vm1089_vm13, %v1659_v30  ;;  %v4971_v30 = vld [vmem:[%s5873_s9 + $0xa4] sm:$0x1] }
 0x1be   : > { %v1388_v41 = vpop.f32.mrf.mxu1  ;;  %v2096_v4 = vadd.f32 %v2023_v37, %v1809_v28  ;;  %v1589_v28 = vsel %vm6865_vm0, %v4801_v8, %v1588_v45  ;;  %v2479_v27 = vshll.u32 %v4971_v30, 16  ;;  %v4972_v37 = vld [vmem:[%s5873_s9 + $0xa8] sm:$0xf]  ;;  %v2497_v30 = vshrl.u32 %v4973_v60, 16 }
 0x1bf   : > { %v1389_v3 = vadd.f32 %v1388_v41, %v7116_v5  ;;  %v1592_v5 = vsel %vm6865_vm0, %v1590_v29, %v1591_v7  ;;  %v2477_v7 = vrot.slane %v2476_v40, 4  ;;  %v2484_v8 = vshrl.u32 %v4972_v37, 16 }
 0x1c0   : > { %v1739_v0 = vpop.f32.mrf.mxu2  ;;  %v7200_v56 = vadd.f32 %v2677_v59, %v2096_v4  ;;  %v1641_v51 = vunpack.c.l.b16 %v1592_v5  ;;  %v2481_v41 = vrot.slane %v2479_v27, 5  ;;  %v2472_v29 = vsel %vm6689_vm10, %v2467_v38, %v2471_v55  ;;  %v5302_v27 = vld [vmem:[%s5873_s9 + $0x9c] sm:$0xff] }
 0x1c1   : > { %v1810_v23 = vadd.f32 %v1739_v0, %v1387_v9  ;;  %v1640_v9 = vunpack.c.l.b16 %v1589_v28  ;;  %v2487_v0 = vshll.u32 %v4972_v37, 16  ;;  %v2486_v55 = vrot.slane %v2484_v8, 4 }
 0x1c2   : > { %4928 = vmatmul.msk.bf16.gmra.mxu3 %vm1089_vm13, %v5301_v22  ;;  %v2482_v5 = vsel %vm6689_vm10, %v2477_v7, %v2481_v41  ;;  %v4974_v41 = vld [vmem:[%s5873_s9 + $0xb0] sm:$0x1] }
 0x1c3   : > { %v1660_v22 = vpack.c.b16 %v1641_v51, %v1640_v9  ;;  %v1597_v9 = vrot.slane %v1595_v46, 4  ;;  %v2489_v51 = vrot.slane %v2487_v0, 5  ;;  %v2582_v38 = vunpack.c.l.b16 %v2482_v5 }
 0x1c4   : > { %v2680_v58 = vpop.f32.mrf.mxu0 }
 0x1c5   : > { %v2026_v59 = vpop.f32.mrf.mxu3  ;;  %v2490_v8 = vor.u32 %v2489_v51, %v2486_v55 }
 0x1c6   : > { %v1391_v32 = vpop.f32.mrf.mxu1  ;;  %v2097_v62 = vadd.f32 %v2026_v59, %v1810_v23  ;;  %v2493_v23 = vshll.u32 %v4973_v60, 16  ;;  %v4802_v59 = vrot.slane %v1464_v21, 9  ;;  %v5287_v21 = vld [vmem:[%s5873_s9 + $0x9c] sm:$0xff] }
 0x1c7   : > { %4992 = vmatmul.msk.bf16.gmra.mxu0 %vm1089_vm13, %v2600_v17  ;;  %v1598_v17 = vrot.slane %v5645_v24, 5 }
 0x1c8   : > { %v1741_v45 = vpop.f32.mrf.mxu2  ;;  %v7213_v61 = vadd.f32 %v2680_v58, %v2097_v62  ;;  %v2581_v58 = vunpack.c.l.b16 %v2472_v29  ;;  %v1392_v62 = vadd.f32 %v1391_v32, %v6951_v47  ;;  %v2495_v37 = vrot.slane %v2493_v23, 5 }
 0x1c9   : > { %4785 = vmatmul.msk.bf16.gmra.mxu1 %vm1089_vm13, %v5286_v6  ;;  %v1811_v4 = vadd.f32 %v1741_v45, %v1389_v3  ;;  %v2499_v45 = vrot.slane %v2497_v30, 4  ;;  %v2503_v29 = vshll.u32 %v4974_v41, 16 }
 0x1ca   : > { %v2601_v47 = vpack.c.b16 %v2582_v38, %v2581_v58  ;;  %v4975_v58 = vld [vmem:[%s5873_s9 + $0xb4] sm:$0xf] }
 0x1cb   : > { %v2500_v32 = vor.u32 %v2499_v45, %v2495_v37  ;;  %v2505_v55 = vrot.slane %v2503_v29, 5  ;;  %v2511_v41 = vshll.u32 %v4975_v58, 16 }
 0x1cc   : > { %v2682_v28 = vpop.f32.mrf.mxu0 }
 0x1cd   : > { %v2028_v3 = vpop.f32.mrf.mxu3  ;;  %4817 = vmatmul.msk.bf16.gmra.mxu2 %vm1089_vm13, %v1660_v22  ;;  %v1599_v22 = vsel %vm6865_vm0, %v1597_v9, %v1598_v17  ;;  %v2501_v17 = vrot.slane %v2500_v32, 4 }
 0x1ce   : > { %v1393_v6 = vpop.f32.mrf.mxu1  ;;  %v2098_v40 = vadd.f32 %v2028_v3, %v1811_v4  ;;  %v1596_v4 = vsel %vm6865_vm0, %v4802_v59, %v1595_v46  ;;  %v1643_v5 = vunpack.c.l.b16 %v1599_v22  ;;  %v2491_v3 = vrot.slane %v2490_v8, 4  ;;  %v5647_v8 = vld [vmem:[%s5873_s9 + $0xb0] sm:$0x1] }
 0x1cf   : > { %v1394_v46 = vadd.f32 %v1393_v6, %v6969_v1  ;;  %v2508_v1 = vshrl.u32 %v4975_v58, 16  ;;  %v2506_v6 = vsel %vm6689_vm10, %v2501_v17, %v2505_v55 }
 0x1d0   : > { %v1744_v7 = vpop.f32.mrf.mxu2  ;;  %v7226_v60 = vadd.f32 %v2682_v28, %v2098_v40  ;;  %v1642_v28 = vunpack.c.l.b16 %v1596_v4  ;;  %v2496_v45 = vsel %vm6689_vm10, %v2491_v3, %v2495_v37 }
 0x1d1   : > { %v1812_v16 = vadd.f32 %v1744_v7, %v1392_v62  ;;  %v5646_v62 = vld [vmem:[%s5873_s9 + $0xac] sm:$0xf]  ;;  %v1465_v7 = vld [vmem:[%s5873_s9 + $0xa8] sm:$0xe] }
 0x1d2   : > { %4929 = vmatmul.msk.bf16.gmra.mxu3 %vm1089_vm13, %v5302_v27  ;;  %v4976_v27 = vld [vmem:[%s5873_s9 + $0xb8] sm:$0xf]  ;;  %v1661_v51 = vpack.c.b16 %v1643_v5, %v1642_v28  ;;  %v1602_v38 = vrot.slane %v5646_v62, 5  ;;  %v2583_v28 = vunpack.c.l.b16 %v2496_v45  ;;  %v2584_v5 = vunpack.c.l.b16 %v2506_v6  ;;  %v4977_v62 = vld [vmem:[%s5873_s9 + $0xbc] sm:$0x1] }
 0x1d3   : > { %v2521_v4 = vshrl.u32 %v4976_v27, 16 }
 0x1d4   : > { %v2685_v0 = vpop.f32.mrf.mxu0 }
 0x1d5   : > { %v2031_v23 = vpop.f32.mrf.mxu3  ;;  %v2523_v55 = vrot.slane %v2521_v4, 4 }
 0x1d6   : > { %v1396_v30 = vpop.f32.mrf.mxu1  ;;  %v2099_v24 = vadd.f32 %v2031_v23, %v1812_v16  ;;  %v2517_v16 = vshll.u32 %v4976_v27, 16  ;;  %v5303_v23 = vld [vmem:[%s5873_s9 + $0xa8] sm:$0xff] }
 0x1d7   : > { %4993 = vmatmul.msk.bf16.gmra.mxu0 %vm1089_vm13, %v2601_v47  ;;  %v1605_v47 = vrot.slane %v5647_v8, 5  ;;  %v1397_v3 = vadd.f32 %v1396_v30, %v6990_v53  ;;  %v2602_v53 = vpack.c.b16 %v2584_v5, %v2583_v28 }
 0x1d8   : > { %v1746_v40 = vpop.f32.mrf.mxu2  ;;  %v7239_v59 = vadd.f32 %v2685_v0, %v2099_v24  ;;  %v4803_v0 = vrot.slane %v1465_v7, 9  ;;  %v2510_v24 = vrot.slane %v2508_v1, 4  ;;  %v7251_v17 = vrot.slane %v2517_v16, 5  ;;  %v5288_v1 = vld [vmem:[%s5873_s9 + $0xa8] sm:$0xff] }
 0x1d9   : > { %4786 = vmatmul.msk.bf16.gmra.mxu1 %vm1089_vm13, %v5287_v21  ;;  %v1813_v9 = vadd.f32 %v1746_v40, %v1394_v46  ;;  %v1604_v21 = vrot.slane %v1602_v38, 4  ;;  %v2513_v46 = vrot.slane %v2511_v41, 5  ;;  %v2527_v16 = vshll.u32 %v4977_v62, 16 }
 0x1da   : > { %v2524_v45 = vor.u32 %v2523_v55, %v7251_v17 }
 0x1db   : > { %v2514_v30 = vor.u32 %v2513_v46, %v2510_v24  ;;  %v2529_v24 = vrot.slane %v2527_v16, 5 }
 0x1dc   : > { %v2687_v22 = vpop.f32.mrf.mxu0 }
 0x1dd   : > { %v2033_v32 = vpop.f32.mrf.mxu3  ;;  %4818 = vmatmul.msk.bf16.gmra.mxu2 %vm1089_vm13, %v1661_v51  ;;  %v1603_v51 = vsel %vm6865_vm0, %v4803_v0, %v1602_v38  ;;  %v4978_v38 = vld [vmem:[%s5873_s9 + $0xc0] sm:$0xf]  ;;  %v5648_v0 = vld [vmem:[%s5873_s9 + $0x10] sm:$0xf] }
 0x1de   : > { %v1398_v29 = vpop.f32.mrf.mxu1  ;;  %v2100_v37 = vadd.f32 %v2033_v32, %v1813_v9  ;;  %v1606_v9 = vsel %vm6865_vm0, %v1604_v21, %v1605_v47  ;;  %v1644_v6 = vunpack.c.l.b16 %v1603_v51  ;;  %v4979_v32 = vld [vmem:[%s5873_s9 + $0xc4] sm:$0xf]  ;;  %v2843_v47 = vrot.slane %v5648_v0, 5 }
 0x1df   : > { %v1645_v41 = vunpack.c.l.b16 %v1606_v9  ;;  %v1399_v21 = vadd.f32 %v1398_v29, %v7004_v34  ;;  %v2535_v46 = vshll.u32 %v4978_v38, 16  ;;  %v5649_v9 = vld [vmem:[%s5873_s9 + $0xb8] sm:$0xf]  ;;  %v1466_v29 = vld [vmem:[%s5873_s9 + $0xb4] sm:$0xe] }
 0x1e0   : > { %v1749_v58 = vpop.f32.mrf.mxu2  ;;  %v7253_v40 = vadd.f32 %v2687_v22, %v2100_v37  ;;  %v2515_v37 = vrot.slane %v2514_v30, 4  ;;  %v1609_v62 = vrot.slane %v5649_v9, 5  ;;  %v2845_v30 = vrot.slane %v2843_v47, 4  ;;  %v5304_v9 = vld [vmem:[%s5873_s9 + $0xb4] sm:$0xff] }
 0x1e1   : > { %v1814_v27 = vadd.f32 %v1749_v58, %v1397_v3  ;;  %v1662_v5 = vpack.c.b16 %v1645_v41, %v1644_v6  ;;  %v2532_v3 = vshrl.u32 %v4978_v38, 16  ;;  %v2541_v58 = vshll.u32 %v4979_v32, 16 }
 0x1e2   : > { %4930 = vmatmul.msk.bf16.gmra.mxu3 %vm1089_vm13, %v5303_v23  ;;  %v2525_v23 = vrot.slane %v2524_v45, 4  ;;  %v5651_v45 = vld [vmem:[%s5873_s9 + $0x14] sm:$0x1]  ;;  %v2520_v6 = vsel %vm6689_vm10, %v2515_v37, %v7251_v17 }
 0x1e3   : > { %v2534_v38 = vrot.slane %v2532_v3, 4  ;;  %v2585_v37 = vunpack.c.l.b16 %v2520_v6 }
 0x1e4   : > { %v2690_v7 = vpop.f32.mrf.mxu0  ;;  %v2530_v41 = vsel %vm6689_vm10, %v2525_v23, %v2529_v24 }
 0x1e5   : > { %v2036_v4 = vpop.f32.mrf.mxu3  ;;  %v2586_v23 = vunpack.c.l.b16 %v2530_v41 }
 0x1e6   : > { %v1401_v22 = vpop.f32.mrf.mxu1  ;;  %v2101_v8 = vadd.f32 %v2036_v4, %v1814_v27  ;;  %v2545_v27 = vshrl.u32 %v4979_v32, 16  ;;  %v2846_v4 = vrot.slane %v5651_v45, 5  ;;  %v7281_v32 = vrot.slane %v2541_v58, 5 }
 0x1e7   : > { %4994 = vmatmul.msk.bf16.gmra.mxu0 %vm1089_vm13, %v2602_v53  ;;  %v5650_v53 = vld [vmem:[%s5873_s9 + $0xbc] sm:$0x1]  ;;  %v1611_v45 = vrot.slane %v1609_v62, 4  ;;  %v1402_v17 = vadd.f32 %v1401_v22, %v7024_v12 }
 0x1e8   : > { %v1751_v28 = vpop.f32.mrf.mxu2  ;;  %v7269_v51 = vadd.f32 %v2690_v7, %v2101_v8  ;;  %v1612_v34 = vrot.slane %v5650_v53, 5  ;;  %v2537_v8 = vrot.slane %v2535_v46, 5  ;;  %v2547_v0 = vrot.slane %v2545_v27, 4 }
 0x1e9   : > { %4787 = vmatmul.msk.bf16.gmra.mxu1 %vm1089_vm13, %v5288_v1  ;;  %v1815_v55 = vadd.f32 %v1751_v28, %v1399_v21  ;;  %v4997_v21 = vld [vmem:[%s5873_s9 + $0xc] sm:$0xe]  ;;  %v4804_v53 = vrot.slane %v1466_v29, 9  ;;  %v2847_v46 = vsel %vm6865_vm0, %v2845_v30, %v2846_v4  ;;  %v5157_v30 = vld [vmem:[%s5873_s9 + $0x18] sm:$0xf] }
 0x1ea   : > { %8162 = vst [vmem:[#allocation25_spill] sm:$0xff] %v7269_v51  ;;  %v5013_v51 = vrot.slane %v4997_v21, 9  ;;  %v2538_v58 = vor.u32 %v2537_v8, %v2534_v38  ;;  %v2956_v29 = vunpack.c.l.b16 %v2847_v46  ;;  %v1613_v22 = vsel %vm6865_vm0, %v1611_v45, %v1612_v34  ;;  %v5289_v38 = vld [vmem:[%s5873_s9 + $0xb4] sm:$0xff]  ;;  %v7304_v8 = vld [vmem:[%s5873_s9 + $0x1c] sm:$0xf] }
 0x1eb   : > { %v1610_v12 = vsel %vm6865_vm0, %v4804_v53, %v1609_v62  ;;  %v2548_v6 = vor.u32 %v2547_v0, %v7281_v32  ;;  %v1647_v62 = vunpack.c.l.b16 %v1613_v22  ;;  %v3511_v45 = vshrl.u32 %v5157_v30, 16 }
 0x1ec   : > { %v2692_v1 = vpop.f32.mrf.mxu0  ;;  %v2844_v3 = vsel %vm6865_vm0, %v5013_v51, %v2843_v47  ;;  %v2603_v47 = vpack.c.b16 %v2586_v23, %v2585_v37  ;;  %v2539_v53 = vrot.slane %v2538_v58, 4  ;;  %v3514_v0 = vshll.u32 %v5157_v30, 16 }
 0x1ed   : > { %v2038_v7 = vpop.f32.mrf.mxu3  ;;  %4819 = vmatmul.msk.bf16.gmra.mxu2 %vm1089_vm13, %v1662_v5  ;;  %v4980_v5 = vld [vmem:[%s5873_s9 + $0xc8] sm:$0x1]  ;;  %v2955_v27 = vunpack.c.l.b16 %v2844_v3  ;;  %v2549_v34 = vrot.slane %v2548_v6, 4  ;;  %v3524_v23 = vshrl.u32 %v7304_v8, 16  ;;  %v3513_v58 = vrot.slane %v3511_v45, 4 }
 0x1ee   : > { %v1403_v16 = vpop.f32.mrf.mxu1  ;;  %v2102_v28 = vadd.f32 %v2038_v7, %v1815_v55  ;;  %v2551_v51 = vshll.u32 %v4980_v5, 16  ;;  %v5159_v6 = vld [vmem:[%s5873_s9 + $0x20] sm:$0x1]  ;;  %v5160_v45 = vld [vmem:[%s5873_s9 + $0x24] sm:$0xf] }
 0x1ef   : > { %v7297_v41 = vpack.c.b16 %v2956_v29, %v2955_v27  ;;  %v1404_v37 = vadd.f32 %v1403_v16, %v7044_v20  ;;  %v3516_v27 = vrot.slane %v3514_v0, 5  ;;  %v2544_v20 = vsel %vm6689_vm10, %v2539_v53, %v7281_v32  ;;  %v7324_v0 = vld [vmem:[%s5873_s9 + $0x28] sm:$0xf] }
 0x1f0   : > { %v1754_v24 = vpop.f32.mrf.mxu2  ;;  %v7300_v4 = vadd.f32 %v2692_v1, %v2102_v28  ;;  %v2553_v1 = vrot.slane %v2551_v51, 5  ;;  %v3520_v28 = vshll.u32 %v7304_v8, 16  ;;  %v3530_v53 = vshll.u32 %v5159_v6, 16 }
 0x1f1   : > { %v1816_v55 = vadd.f32 %v1754_v24, %v1402_v17  ;;  %v1646_v17 = vunpack.c.l.b16 %v1610_v12  ;;  %v3526_v12 = vrot.slane %v3524_v23, 4 }
 0x1f2   : > { %4931 = vmatmul.msk.bf16.gmra.mxu3 %vm1089_vm13, %v5304_v9  ;;  %v2554_v16 = vsel %vm6689_vm10, %v2549_v34, %v2553_v1  ;;  %v3522_v29 = vrot.slane %v3520_v28, 5  ;;  %v3532_v23 = vrot.slane %v3530_v53, 5 }
 0x1f3   : > { %v1663_v46 = vpack.c.b16 %v1647_v62, %v1646_v17  ;;  %v3517_v17 = vor.u32 %v3516_v27, %v3513_v58  ;;  %v3538_v58 = vshll.u32 %v5160_v45, 16  ;;  %v3544_v27 = vshll.u32 %v7324_v0, 16 }
 0x1f4   : > { %v2695_v7 = vpop.f32.mrf.mxu0  ;;  %v3527_v62 = vor.u32 %v3526_v12, %v3522_v29 }
 0x1f5   : > { %v2041_v21 = vpop.f32.mrf.mxu3  ;;  %v3518_v1 = vrot.slane %v3517_v17, 4 }
 0x1f6   : > { %v1406_v9 = vpop.f32.mrf.mxu1  ;;  %v2103_v24 = vadd.f32 %v2041_v21, %v1816_v55  ;;  %v2588_v21 = vunpack.c.l.b16 %v2554_v16  ;;  %v3528_v28 = vrot.slane %v3527_v62, 4 }
 0x1f7   : > { %4995 = vmatmul.msk.bf16.gmra.mxu0 %vm1089_vm13, %v2603_v47  ;;  %v1407_v32 = vadd.f32 %v1406_v9, %v7067_v11 }
 0x1f8   : > { %v1756_v5 = vpop.f32.mrf.mxu2  ;;  %v7311_v55 = vadd.f32 %v2695_v7, %v2103_v24  ;;  %v5305_v7 = vld [vmem:[%s5873_s9 + $0xc0] sm:$0xff]  ;;  %v3533_v62 = vsel %vm6689_vm10, %v3528_v28, %v3532_v23  ;;  %v7350_v23 = vld [vmem:[%s5873_s9 + $0x2c] sm:$0x1] }
 0x1f9   : > { %4788 = vmatmul.msk.bf16.gmra.mxu1 %vm1089_vm13, %v5289_v38  ;;  %v1817_v3 = vadd.f32 %v1756_v5, %v1404_v37  ;;  %v2587_v38 = vunpack.c.l.b16 %v2544_v20  ;;  %v5221_v5 = vld [vmem:[%s5873_s9 + $0x18] sm:$0xe]  ;;  %v3548_v20 = vshrl.u32 %v7324_v0, 16  ;;  %v3897_v28 = vunpack.c.l.b16 %v3533_v62 }
 0x1fb   : > { %v2604_v37 = vpack.c.b16 %v2588_v21, %v2587_v38  ;;  %v5653_v38 = vld [vmem:[%s5873_s9 + $0x20] sm:$0x1] }
 0x1fc   : > { %v2697_v22 = vpop.f32.mrf.mxu0  ;;  %v2853_v21 = vrot.slane %v5653_v38, 5 }
 0x1fd   : > { %v2043_v47 = vpop.f32.mrf.mxu3  ;;  %4820 = vmatmul.msk.bf16.gmra.mxu2 %vm1089_vm13, %v1663_v46  ;;  %v3535_v46 = vshrl.u32 %v5160_v45, 16 }
 0x1fe   : > { %v1408_v51 = vpop.f32.mrf.mxu1  ;;  %v2104_v30 = vadd.f32 %v2043_v47, %v1817_v3  ;;  %v4182_v3 = vrot.slane %v7304_v8, 5  ;;  %v5652_v47 = vld [vmem:[%s5873_s9 + $0x1c] sm:$0xf]  ;;  %v3523_v8 = vsel %vm6689_vm10, %v3518_v1, %v3522_v29  ;;  %v3550_v29 = vrot.slane %v3548_v20, 4 }
 0x200   : > { %v1759_v24 = vpop.f32.mrf.mxu2  ;;  %v7329_v11 = vadd.f32 %v2697_v22, %v2104_v30  ;;  %v5237_v22 = vrot.slane %v5221_v5, 9  ;;  %v4998_v30 = vld [vmem:[%s5873_s9 + $0x18] sm:$0xe]  ;;  %v4184_v53 = vrot.slane %v4182_v3, 4 }
 0x201   : > { %v1818_v34 = vadd.f32 %v1759_v24, %v1407_v32  ;;  %v1409_v32 = vadd.f32 %v1408_v51, %v7087_v54  ;;  %v4185_v24 = vrot.slane %v5159_v6, 5  ;;  %v5306_v5 = vld [vmem:[%s5873_s9 + $0x18] sm:$0xff]  ;;  %v3896_v51 = vunpack.c.l.b16 %v3523_v8 }
 0x202   : > { %4932 = vmatmul.msk.bf16.gmra.mxu3 %vm1089_vm13, %v5305_v7  ;;  %8163 = vst [vmem:[#allocation26_spill] sm:$0xff] %v7329_v11  ;;  %v2850_v7 = vrot.slane %v5652_v47, 5  ;;  %v7344_v47 = vrot.slane %v3544_v27, 5  ;;  %v4183_v11 = vsel %vm6865_vm0, %v5237_v22, %v4182_v3  ;;  %v3554_v3 = vshll.u32 %v7350_v23, 16 }
 0x203   : > { %v3928_v22 = vpack.c.b16 %v3897_v28, %v3896_v51  ;;  %v5654_v51 = vld [vmem:[%s5873_s9 + $0x28] sm:$0xf] }
 0x204   : > { %v2700_v9 = vpop.f32.mrf.mxu0  ;;  %v2852_v38 = vrot.slane %v2850_v7, 4  ;;  %v2857_v28 = vrot.slane %v5654_v51, 5 }
 0x205   : > { %v2046_v16 = vpop.f32.mrf.mxu3 }
 0x206   : > { %v1411_v12 = vpop.f32.mrf.mxu1  ;;  %v2105_v17 = vadd.f32 %v2046_v16, %v1818_v34  ;;  %v3537_v34 = vrot.slane %v3535_v46, 4  ;;  %v3540_v16 = vrot.slane %v3538_v58, 5  ;;  %v2854_v20 = vsel %vm6865_vm0, %v2852_v38, %v2853_v21  ;;  %v7369_v38 = vld [vmem:[%s5873_s9 + $0x34] sm:$0xf] }
 0x207   : > { %4996 = vmatmul.msk.bf16.gmra.mxu0 %vm1089_vm13, %v2604_v37  ;;  %v5014_v37 = vrot.slane %v4998_v30, 9  ;;  %v1412_v30 = vadd.f32 %v1411_v12, %v6967_v39 }
 0x208   : > { %v1761_v45 = vpop.f32.mrf.mxu2  ;;  %v7347_v54 = vadd.f32 %v2700_v9, %v2105_v17  ;;  %v3541_v46 = vor.u32 %v3540_v16, %v3537_v34  ;;  %v3551_v17 = vor.u32 %v3550_v29, %v7344_v47  ;;  %v3556_v16 = vrot.slane %v3554_v3, 5  ;;  %v5222_v29 = vld [vmem:[%s5873_s9 + $0x24] sm:$0xe] }
 0x209   : > { %5029 = vmatmul.msk.bf16.vlgmr.msra.gmra.mxu1 %vm1089_vm13, %v7297_v41  ;;  %v1819_v1 = vadd.f32 %v1761_v45, %v1409_v32  ;;  %v4186_v41 = vsel %vm6865_vm0, %v4184_v53, %v4185_v24  ;;  %v2851_v9 = vsel %vm6865_vm0, %v5014_v37, %v2850_v7  ;;  %v4294_v32 = vunpack.c.l.b16 %v4183_v11 }
 0x20a   : > { %v4295_v62 = vunpack.c.l.b16 %v4186_v41  ;;  %v2957_v24 = vunpack.c.l.b16 %v2851_v9  ;;  %v2958_v7 = vunpack.c.l.b16 %v2854_v20  ;;  %v3542_v34 = vrot.slane %v3541_v46, 4 }
 0x20b   : > { %v3552_v21 = vrot.slane %v3551_v17, 4  ;;  %v4189_v37 = vrot.slane %v7324_v0, 5  ;;  %v5238_v20 = vrot.slane %v5222_v29, 9  ;;  %v4999_v0 = vld [vmem:[%s5873_s9 + $0x24] sm:$0xe] }
 0x20c   : > { %v2702_v6 = vpop.f32.mrf.mxu0  ;;  %v2988_v12 = vpack.c.b16 %v2958_v7, %v2957_v24 }
 0x20d   : > { %v2048_v58 = vpop.f32.mrf.mxu3  ;;  %5141 = vmatmul.msk.bf16.vlgmr.msra.gmra.mxu2 %vm1089_vm13, %v5306_v5  ;;  %v5163_v5 = vld [vmem:[%s5873_s9 + $0x30] sm:$0xf]  ;;  %v3557_v9 = vsel %vm6689_vm10, %v3552_v21, %v3556_v16  ;;  %v5307_v16 = vld [vmem:[%s5873_s9 + $0x24] sm:$0xff] }
 0x20e   : > { %v1413_v27 = vpop.f32.mrf.mxu1  ;;  %v2106_v8 = vadd.f32 %v2048_v58, %v1819_v1  ;;  %v4326_v1 = vpack.c.b16 %v4295_v62, %v4294_v32  ;;  %v3547_v58 = vsel %vm6689_vm10, %v3542_v34, %v7344_v47  ;;  %v3559_v17 = vshrl.u32 %v5163_v5, 16  ;;  %v5655_v62 = vld [vmem:[%s5873_s9 + $0x2c] sm:$0x1] }
 0x20f   : > { %v4191_v32 = vrot.slane %v4189_v37, 4  ;;  %v4192_v47 = vrot.slane %v7350_v23, 5  ;;  %v3898_v7 = vunpack.c.l.b16 %v3547_v58  ;;  %v2859_v34 = vrot.slane %v2857_v28, 4 }
 0x210   : > { %v1764_v53 = vpop.f32.mrf.mxu2  ;;  %v7371_v39 = vadd.f32 %v2702_v6, %v2106_v8  ;;  %v3562_v6 = vshll.u32 %v5163_v5, 16  ;;  %v3568_v8 = vshll.u32 %v7369_v38, 16  ;;  %v3899_v29 = vunpack.c.l.b16 %v3557_v9 }
 0x211   : > { %v1820_v45 = vadd.f32 %v1764_v53, %v1412_v30  ;;  %v1414_v30 = vadd.f32 %v1413_v27, %v6988_v57  ;;  %v2860_v53 = vrot.slane %v5655_v62, 5  ;;  %v4190_v5 = vsel %vm6865_vm0, %v5238_v20, %v4189_v37 }
 0x212   : > { %5205 = vmatmul.msk.bf16.vlgmr.msra.gmra.mxu3 %vm1089_vm13, %v3928_v22  ;;  %v3572_v22 = vshrl.u32 %v7369_v38, 16  ;;  %v3561_v57 = vrot.slane %v3559_v17, 4  ;;  %v3564_v27 = vrot.slane %v3562_v6, 5  ;;  %v7392_v23 = vrot.slane %v3568_v8, 5 }
 0x213   : > { %v2861_v9 = vsel %vm6865_vm0, %v2859_v34, %v2860_v53  ;;  %v4296_v20 = vunpack.c.l.b16 %v4190_v5  ;;  %v5223_v5 = vld [vmem:[%s5873_s9 + $0x30] sm:$0xe] }
 0x214   : > { %v2705_v11 = vpop.f32.mrf.mxu0  ;;  %v3574_v51 = vrot.slane %v3572_v22, 4  ;;  %v3565_v8 = vor.u32 %v3564_v27, %v3561_v57 }
 0x215   : > { %v2051_v41 = vpop.f32.mrf.mxu3 }
 0x216   : > { %v1416_v46 = vpop.f32.mrf.mxu1  ;;  %v2107_v3 = vadd.f32 %v2051_v41, %v1820_v45  ;;  %v5015_v45 = vrot.slane %v4999_v0, 9  ;;  %v7401_v0 = vld [vmem:[%s5873_s9 + $0x38] sm:$0x1]  ;;  %v3575_v22 = vor.u32 %v3574_v51, %v7392_v23  ;;  %v3566_v34 = vrot.slane %v3565_v8, 4 }
 0x217   : > { %5253 = vmatmul.msk.bf16.vlgmr.msra.gmra.mxu0 %vm1089_vm13, %v4326_v1 }
 0x218   : > { %v1766_v24 = vpop.f32.mrf.mxu2  ;;  %v7390_v1 = vadd.f32 %v2705_v11, %v2107_v3  ;;  %v2858_v58 = vsel %vm6865_vm0, %v5015_v45, %v2857_v28  ;;  %v3929_v11 = vpack.c.b16 %v3899_v29, %v3898_v7  ;;  %v1417_v28 = vadd.f32 %v1416_v46, %v7007_v26  ;;  %v7409_v45 = vld [vmem:[%s5873_s9 + $0x40] sm:$0xf] }
 0x219   : > { %5030 = vmatmul.msk.bf16.gmra.mxu1 %vm1089_vm13, %v2988_v12  ;;  %v1821_v21 = vadd.f32 %v1766_v24, %v1414_v30  ;;  %v4193_v12 = vsel %vm6865_vm0, %v4191_v32, %v4192_v47  ;;  %v2959_v30 = vunpack.c.l.b16 %v2858_v58  ;;  %v2960_v32 = vunpack.c.l.b16 %v2861_v9  ;;  %v5166_v24 = vld [vmem:[%s5873_s9 + $0x3c] sm:$0xf] }
 0x21a   : > { %v4297_v6 = vunpack.c.l.b16 %v4193_v12  ;;  %v3578_v47 = vshll.u32 %v7401_v0, 16  ;;  %v4196_v26 = vrot.slane %v7369_v38, 5  ;;  %v3583_v27 = vshrl.u32 %v5166_v24, 16 }
 0x21b   : > { %v3586_v51 = vshll.u32 %v5166_v24, 16  ;;  %v3592_v12 = vshll.u32 %v7409_v45, 16  ;;  %v3596_v58 = vshrl.u32 %v7409_v45, 16  ;;  %v4199_v38 = vrot.slane %v7401_v0, 5 }
 0x21c   : > { %v2707_v41 = vpop.f32.mrf.mxu0  ;;  %v4327_v7 = vpack.c.b16 %v4297_v6, %v4296_v20  ;;  %v3580_v29 = vrot.slane %v3578_v47, 5  ;;  %v5657_v6 = vld [vmem:[%s5873_s9 + $0x38] sm:$0x1]  ;;  %v4198_v47 = vrot.slane %v4196_v26, 4 }
 0x21d   : > { %v2053_v37 = vpop.f32.mrf.mxu3  ;;  %5142 = vmatmul.msk.bf16.gmra.mxu2 %vm1089_vm13, %v5307_v16  ;;  %v2989_v16 = vpack.c.b16 %v2960_v32, %v2959_v30  ;;  %v2867_v8 = vrot.slane %v5657_v6, 5  ;;  %v3571_v30 = vsel %vm6689_vm10, %v3566_v34, %v7392_v23  ;;  %v3588_v24 = vrot.slane %v3586_v51, 5  ;;  %v7436_v6 = vld [vmem:[%s5873_s9 + $0x44] sm:$0x1] }
 0x21e   : > { %v1418_v17 = vpop.f32.mrf.mxu1  ;;  %v2108_v3 = vadd.f32 %v2053_v37, %v1821_v21  ;;  %v3576_v21 = vrot.slane %v3575_v22, 4  ;;  %v7430_v0 = vrot.slane %v3592_v12, 5  ;;  %v3900_v23 = vunpack.c.l.b16 %v3571_v30 }
 0x220   : > { %v1769_v62 = vpop.f32.mrf.mxu2  ;;  %v7414_v46 = vadd.f32 %v2707_v41, %v2108_v3  ;;  %v5000_v41 = vld [vmem:[%s5873_s9 + $0x30] sm:$0xe]  ;;  %v1419_v3 = vadd.f32 %v1418_v17, %v7032_v33  ;;  %v3581_v32 = vsel %vm6689_vm10, %v3576_v21, %v3580_v29 }
 0x221   : > { %v1822_v53 = vadd.f32 %v1769_v62, %v1417_v28  ;;  %v5239_v28 = vrot.slane %v5223_v5, 9  ;;  %v3598_v5 = vrot.slane %v3596_v58, 4  ;;  %v5016_v33 = vrot.slane %v5000_v41, 9 }
 0x222   : > { %5206 = vmatmul.msk.bf16.gmra.mxu3 %vm1089_vm13, %v3929_v11  ;;  %v5656_v11 = vld [vmem:[%s5873_s9 + $0x34] sm:$0xf]  ;;  %v3901_v34 = vunpack.c.l.b16 %v3581_v32 }
 0x223   : > { %v2864_v20 = vrot.slane %v5656_v11, 5  ;;  %v4197_v29 = vsel %vm6865_vm0, %v5239_v28, %v4196_v26  ;;  %v3602_v26 = vshll.u32 %v7436_v6, 16 }
 0x224   : > { %v2710_v57 = vpop.f32.mrf.mxu0  ;;  %v3930_v41 = vpack.c.b16 %v3901_v34, %v3900_v23  ;;  %v5658_v34 = vld [vmem:[%s5873_s9 + $0x40] sm:$0xf] }
 0x225   : > { %v2056_v9 = vpop.f32.mrf.mxu3  ;;  %v2866_v17 = vrot.slane %v2864_v20, 4 }
 0x226   : > { %v1421_v37 = vpop.f32.mrf.mxu1  ;;  %v2109_v22 = vadd.f32 %v2056_v9, %v1822_v53  ;;  %v3585_v53 = vrot.slane %v3583_v27, 4  ;;  %v5308_v9 = vld [vmem:[%s5873_s9 + $0x30] sm:$0xff] }
 0x227   : > { %5254 = vmatmul.msk.bf16.gmra.mxu0 %vm1089_vm13, %v4327_v7  ;;  %v2868_v58 = vsel %vm6865_vm0, %v2866_v17, %v2867_v8  ;;  %v7455_v17 = vld [vmem:[%s5873_s9 + $0x4c] sm:$0xf] }
 0x228   : > { %v1771_v62 = vpop.f32.mrf.mxu2  ;;  %v7433_v11 = vadd.f32 %v2710_v57, %v2109_v22  ;;  %v3589_v27 = vor.u32 %v3588_v24, %v3585_v53  ;;  %v2865_v57 = vsel %vm6865_vm0, %v5016_v33, %v2864_v20  ;;  %v3599_v22 = vor.u32 %v3598_v5, %v7430_v0  ;;  %v5224_v5 = vld [vmem:[%s5873_s9 + $0x3c] sm:$0xe] }
 0x229   : > { %5031 = vmatmul.msk.bf16.gmra.mxu1 %vm1089_vm13, %v2989_v16  ;;  %v1823_v7 = vadd.f32 %v1771_v62, %v1419_v3  ;;  %v4200_v16 = vsel %vm6865_vm0, %v4198_v47, %v4199_v38  ;;  %v1422_v38 = vadd.f32 %v1421_v37, %v7052_v35  ;;  %v4298_v3 = vunpack.c.l.b16 %v4197_v29 }
 0x22a   : > { %v4299_v30 = vunpack.c.l.b16 %v4200_v16  ;;  %v2961_v47 = vunpack.c.l.b16 %v2865_v57  ;;  %v2962_v20 = vunpack.c.l.b16 %v2868_v58  ;;  %v3590_v53 = vrot.slane %v3589_v27, 4 }
 0x22b   : > { %v3600_v8 = vrot.slane %v3599_v22, 4  ;;  %v3604_v24 = vrot.slane %v3602_v26, 5  ;;  %v4203_v33 = vrot.slane %v7409_v45, 5  ;;  %v2871_v29 = vrot.slane %v5658_v34, 5  ;;  %v5001_v45 = vld [vmem:[%s5873_s9 + $0x3c] sm:$0xe] }
 0x22c   : > { %v2712_v21 = vpop.f32.mrf.mxu0  ;;  %v2990_v23 = vpack.c.b16 %v2962_v20, %v2961_v47  ;;  %v5240_v58 = vrot.slane %v5224_v5, 9 }
 0x22d   : > { %v2058_v51 = vpop.f32.mrf.mxu3  ;;  %5143 = vmatmul.msk.bf16.gmra.mxu2 %vm1089_vm13, %v5308_v9  ;;  %v5169_v9 = vld [vmem:[%s5873_s9 + $0x48] sm:$0xf]  ;;  %v3605_v57 = vsel %vm6689_vm10, %v3600_v8, %v3604_v24  ;;  %v5309_v24 = vld [vmem:[%s5873_s9 + $0x3c] sm:$0xff] }
 0x22e   : > { %v1423_v12 = vpop.f32.mrf.mxu1  ;;  %v2110_v28 = vadd.f32 %v2058_v51, %v1823_v7  ;;  %v4328_v7 = vpack.c.b16 %v4299_v30, %v4298_v3  ;;  %v3595_v51 = vsel %vm6689_vm10, %v3590_v53, %v7430_v0  ;;  %v3607_v22 = vshrl.u32 %v5169_v9, 16  ;;  %v5659_v30 = vld [vmem:[%s5873_s9 + $0x44] sm:$0x1] }
 0x22f   : > { %v4205_v3 = vrot.slane %v4203_v33, 4  ;;  %v4206_v0 = vrot.slane %v7436_v6, 5  ;;  %v3902_v20 = vunpack.c.l.b16 %v3595_v51  ;;  %v2873_v53 = vrot.slane %v2871_v29, 4 }
 0x230   : > { %v1774_v32 = vpop.f32.mrf.mxu2  ;;  %v7457_v35 = vadd.f32 %v2712_v21, %v2110_v28  ;;  %v3610_v21 = vshll.u32 %v5169_v9, 16  ;;  %v3616_v28 = vshll.u32 %v7455_v17, 16  ;;  %v3903_v5 = vunpack.c.l.b16 %v3605_v57 }
 0x231   : > { %v1824_v62 = vadd.f32 %v1774_v32, %v1422_v38  ;;  %v1424_v38 = vadd.f32 %v1423_v12, %v7069_v18  ;;  %v2874_v32 = vrot.slane %v5659_v30, 5  ;;  %v4204_v9 = vsel %vm6865_vm0, %v5240_v58, %v4203_v33 }
 0x232   : > { %5207 = vmatmul.msk.bf16.gmra.mxu3 %vm1089_vm13, %v3930_v41  ;;  %v3620_v41 = vshrl.u32 %v7455_v17, 16  ;;  %v3609_v18 = vrot.slane %v3607_v22, 4  ;;  %v3612_v12 = vrot.slane %v3610_v21, 5  ;;  %v7478_v6 = vrot.slane %v3616_v28, 5 }
 0x233   : > { %v2875_v57 = vsel %vm6865_vm0, %v2873_v53, %v2874_v32  ;;  %v4300_v58 = vunpack.c.l.b16 %v4204_v9  ;;  %v5225_v9 = vld [vmem:[%s5873_s9 + $0x48] sm:$0xe] }
 0x234   : > { %v2715_v37 = vpop.f32.mrf.mxu0  ;;  %v3622_v34 = vrot.slane %v3620_v41, 4  ;;  %v3613_v28 = vor.u32 %v3612_v12, %v3609_v18 }
 0x235   : > { %v2061_v16 = vpop.f32.mrf.mxu3 }
 0x236   : > { %v1426_v27 = vpop.f32.mrf.mxu1  ;;  %v2111_v26 = vadd.f32 %v2061_v16, %v1824_v62  ;;  %v5017_v62 = vrot.slane %v5001_v45, 9  ;;  %v7487_v45 = vld [vmem:[%s5873_s9 + $0x50] sm:$0x1]  ;;  %v3623_v41 = vor.u32 %v3622_v34, %v7478_v6  ;;  %v3614_v53 = vrot.slane %v3613_v28, 4 }
 0x237   : > { %5255 = vmatmul.msk.bf16.gmra.mxu0 %vm1089_vm13, %v4328_v7 }
 0x238   : > { %v1776_v47 = vpop.f32.mrf.mxu2  ;;  %v7476_v7 = vadd.f32 %v2715_v37, %v2111_v26  ;;  %v2872_v51 = vsel %vm6865_vm0, %v5017_v62, %v2871_v29  ;;  %v3931_v37 = vpack.c.b16 %v3903_v5, %v3902_v20  ;;  %v1427_v29 = vadd.f32 %v1426_v27, %v7090_v15  ;;  %v7495_v62 = vld [vmem:[%s5873_s9 + $0x58] sm:$0xf] }
 0x239   : > { %5032 = vmatmul.msk.bf16.gmra.mxu1 %vm1089_vm13, %v2990_v23  ;;  %v1825_v8 = vadd.f32 %v1776_v47, %v1424_v38  ;;  %v4207_v23 = vsel %vm6865_vm0, %v4205_v3, %v4206_v0  ;;  %v2963_v38 = vunpack.c.l.b16 %v2872_v51  ;;  %v2964_v3 = vunpack.c.l.b16 %v2875_v57  ;;  %v5172_v47 = vld [vmem:[%s5873_s9 + $0x54] sm:$0xf] }
 0x23a   : > { %v4301_v21 = vunpack.c.l.b16 %v4207_v23  ;;  %v3626_v0 = vshll.u32 %v7487_v45, 16  ;;  %v4210_v15 = vrot.slane %v7455_v17, 5  ;;  %v3631_v12 = vshrl.u32 %v5172_v47, 16 }
 0x23b   : > { %v3634_v34 = vshll.u32 %v5172_v47, 16  ;;  %v3640_v23 = vshll.u32 %v7495_v62, 16  ;;  %v3644_v51 = vshrl.u32 %v7495_v62, 16  ;;  %v4213_v17 = vrot.slane %v7487_v45, 5 }
 0x23c   : > { %v2717_v16 = vpop.f32.mrf.mxu0  ;;  %v4329_v20 = vpack.c.b16 %v4301_v21, %v4300_v58  ;;  %v3628_v5 = vrot.slane %v3626_v0, 5  ;;  %v5661_v21 = vld [vmem:[%s5873_s9 + $0x50] sm:$0x1]  ;;  %v4212_v0 = vrot.slane %v4210_v15, 4 }
 0x23d   : > { %v2063_v33 = vpop.f32.mrf.mxu3  ;;  %5144 = vmatmul.msk.bf16.gmra.mxu2 %vm1089_vm13, %v5309_v24  ;;  %v2991_v24 = vpack.c.b16 %v2964_v3, %v2963_v38  ;;  %v2881_v28 = vrot.slane %v5661_v21, 5  ;;  %v3619_v38 = vsel %vm6689_vm10, %v3614_v53, %v7478_v6  ;;  %v3636_v47 = vrot.slane %v3634_v34, 5  ;;  %v7522_v21 = vld [vmem:[%s5873_s9 + $0x5c] sm:$0x1] }
 0x23e   : > { %v1428_v22 = vpop.f32.mrf.mxu1  ;;  %v2112_v26 = vadd.f32 %v2063_v33, %v1825_v8  ;;  %v3624_v8 = vrot.slane %v3623_v41, 4  ;;  %v7516_v45 = vrot.slane %v3640_v23, 5  ;;  %v3904_v6 = vunpack.c.l.b16 %v3619_v38 }
 0x240   : > { %v1779_v30 = vpop.f32.mrf.mxu2  ;;  %v7500_v27 = vadd.f32 %v2717_v16, %v2112_v26  ;;  %v5002_v16 = vld [vmem:[%s5873_s9 + $0x48] sm:$0xe]  ;;  %v1429_v26 = vadd.f32 %v1428_v22, %v7105_v49  ;;  %v3629_v3 = vsel %vm6689_vm10, %v3624_v8, %v3628_v5 }
 0x241   : > { %v1826_v32 = vadd.f32 %v1779_v30, %v1427_v29  ;;  %v5241_v29 = vrot.slane %v5225_v9, 9  ;;  %v3646_v9 = vrot.slane %v3644_v51, 4  ;;  %v5018_v49 = vrot.slane %v5002_v16, 9 }
 0x242   : > { %5208 = vmatmul.msk.bf16.gmra.mxu3 %vm1089_vm13, %v3931_v37  ;;  %v5660_v37 = vld [vmem:[%s5873_s9 + $0x4c] sm:$0xf]  ;;  %v3905_v53 = vunpack.c.l.b16 %v3629_v3 }
 0x243   : > { %v2878_v58 = vrot.slane %v5660_v37, 5  ;;  %v4211_v5 = vsel %vm6865_vm0, %v5241_v29, %v4210_v15  ;;  %v3650_v15 = vshll.u32 %v7522_v21, 16 }
 0x244   : > { %v2720_v18 = vpop.f32.mrf.mxu0  ;;  %v3932_v16 = vpack.c.b16 %v3905_v53, %v3904_v6  ;;  %v5662_v53 = vld [vmem:[%s5873_s9 + $0x58] sm:$0xf] }
 0x245   : > { %v2066_v57 = vpop.f32.mrf.mxu3  ;;  %v2880_v22 = vrot.slane %v2878_v58, 4 }
 0x246   : > { %v1431_v33 = vpop.f32.mrf.mxu1  ;;  %v2113_v41 = vadd.f32 %v2066_v57, %v1826_v32  ;;  %v3633_v32 = vrot.slane %v3631_v12, 4  ;;  %v5310_v57 = vld [vmem:[%s5873_s9 + $0x48] sm:$0xff] }
 0x247   : > { %5256 = vmatmul.msk.bf16.gmra.mxu0 %vm1089_vm13, %v4329_v20  ;;  %v2882_v51 = vsel %vm6865_vm0, %v2880_v22, %v2881_v28  ;;  %v7541_v22 = vld [vmem:[%s5873_s9 + $0x64] sm:$0xf] }
 0x248   : > { %v1781_v30 = vpop.f32.mrf.mxu2  ;;  %v7519_v37 = vadd.f32 %v2720_v18, %v2113_v41  ;;  %v3637_v12 = vor.u32 %v3636_v47, %v3633_v32  ;;  %v2879_v18 = vsel %vm6865_vm0, %v5018_v49, %v2878_v58  ;;  %v3647_v41 = vor.u32 %v3646_v9, %v7516_v45  ;;  %v5226_v9 = vld [vmem:[%s5873_s9 + $0x54] sm:$0xe] }
 0x249   : > { %5033 = vmatmul.msk.bf16.gmra.mxu1 %vm1089_vm13, %v2991_v24  ;;  %v1827_v20 = vadd.f32 %v1781_v30, %v1429_v26  ;;  %v4214_v24 = vsel %vm6865_vm0, %v4212_v0, %v4213_v17  ;;  %v1432_v17 = vadd.f32 %v1431_v33, %v6982_v50  ;;  %v4302_v26 = vunpack.c.l.b16 %v4211_v5 }
 0x24a   : > { %v4303_v38 = vunpack.c.l.b16 %v4214_v24  ;;  %v2965_v0 = vunpack.c.l.b16 %v2879_v18  ;;  %v2966_v58 = vunpack.c.l.b16 %v2882_v51  ;;  %v3638_v32 = vrot.slane %v3637_v12, 4 }
 0x24b   : > { %v3648_v28 = vrot.slane %v3647_v41, 4  ;;  %v3652_v47 = vrot.slane %v3650_v15, 5  ;;  %v4217_v49 = vrot.slane %v7495_v62, 5  ;;  %v2885_v5 = vrot.slane %v5662_v53, 5  ;;  %v5003_v62 = vld [vmem:[%s5873_s9 + $0x54] sm:$0xe] }
 0x24c   : > { %v2722_v8 = vpop.f32.mrf.mxu0  ;;  %v2992_v6 = vpack.c.b16 %v2966_v58, %v2965_v0  ;;  %v5242_v51 = vrot.slane %v5226_v9, 9 }
 0x24d   : > { %v2068_v34 = vpop.f32.mrf.mxu3  ;;  %5145 = vmatmul.msk.bf16.gmra.mxu2 %vm1089_vm13, %v5310_v57  ;;  %v5175_v57 = vld [vmem:[%s5873_s9 + $0x60] sm:$0xf]  ;;  %v3653_v18 = vsel %vm6689_vm10, %v3648_v28, %v3652_v47  ;;  %v5311_v47 = vld [vmem:[%s5873_s9 + $0x54] sm:$0xff] }
 0x24e   : > { %v1433_v23 = vpop.f32.mrf.mxu1  ;;  %v2114_v29 = vadd.f32 %v2068_v34, %v1827_v20  ;;  %v4330_v20 = vpack.c.b16 %v4303_v38, %v4302_v26  ;;  %v3643_v34 = vsel %vm6689_vm10, %v3638_v32, %v7516_v45  ;;  %v3655_v41 = vshrl.u32 %v5175_v57, 16  ;;  %v5663_v38 = vld [vmem:[%s5873_s9 + $0x5c] sm:$0x1] }
 0x24f   : > { %v4219_v26 = vrot.slane %v4217_v49, 4  ;;  %v4220_v45 = vrot.slane %v7522_v21, 5  ;;  %v3906_v58 = vunpack.c.l.b16 %v3643_v34  ;;  %v2887_v32 = vrot.slane %v2885_v5, 4 }
 0x250   : > { %v1784_v3 = vpop.f32.mrf.mxu2  ;;  %v7543_v50 = vadd.f32 %v2722_v8, %v2114_v29  ;;  %v3658_v8 = vshll.u32 %v5175_v57, 16  ;;  %v3664_v29 = vshll.u32 %v7541_v22, 16  ;;  %v3907_v9 = vunpack.c.l.b16 %v3653_v18 }
 0x251   : > { %v1828_v30 = vadd.f32 %v1784_v3, %v1432_v17  ;;  %v1434_v17 = vadd.f32 %v1433_v23, %v7001_v10  ;;  %v2888_v3 = vrot.slane %v5663_v38, 5  ;;  %v4218_v57 = vsel %vm6865_vm0, %v5242_v51, %v4217_v49 }
 0x252   : > { %5209 = vmatmul.msk.bf16.gmra.mxu3 %vm1089_vm13, %v3932_v16  ;;  %v3668_v16 = vshrl.u32 %v7541_v22, 16  ;;  %v3657_v10 = vrot.slane %v3655_v41, 4  ;;  %v3660_v23 = vrot.slane %v3658_v8, 5  ;;  %v7564_v21 = vrot.slane %v3664_v29, 5 }
 0x253   : > { %v2889_v18 = vsel %vm6865_vm0, %v2887_v32, %v2888_v3  ;;  %v4304_v51 = vunpack.c.l.b16 %v4218_v57  ;;  %v5227_v57 = vld [vmem:[%s5873_s9 + $0x60] sm:$0xe] }
 0x254   : > { %v2725_v33 = vpop.f32.mrf.mxu0  ;;  %v3670_v53 = vrot.slane %v3668_v16, 4  ;;  %v3661_v29 = vor.u32 %v3660_v23, %v3657_v10 }
 0x255   : > { %v2071_v24 = vpop.f32.mrf.mxu3 }
 0x256   : > { %v1436_v12 = vpop.f32.mrf.mxu1  ;;  %v2115_v15 = vadd.f32 %v2071_v24, %v1828_v30  ;;  %v5019_v30 = vrot.slane %v5003_v62, 9  ;;  %v7573_v62 = vld [vmem:[%s5873_s9 + $0x68] sm:$0x1]  ;;  %v3671_v16 = vor.u32 %v3670_v53, %v7564_v21  ;;  %v3662_v32 = vrot.slane %v3661_v29, 4 }
 0x257   : > { %5257 = vmatmul.msk.bf16.gmra.mxu0 %vm1089_vm13, %v4330_v20 }
 0x258   : > { %v1786_v0 = vpop.f32.mrf.mxu2  ;;  %v7562_v20 = vadd.f32 %v2725_v33, %v2115_v15  ;;  %v2886_v34 = vsel %vm6865_vm0, %v5019_v30, %v2885_v5  ;;  %v3933_v33 = vpack.c.b16 %v3907_v9, %v3906_v58  ;;  %v1437_v5 = vadd.f32 %v1436_v12, %v7022_v36  ;;  %v7581_v30 = vld [vmem:[%s5873_s9 + $0x70] sm:$0xf] }
 0x259   : > { %5034 = vmatmul.msk.bf16.gmra.mxu1 %vm1089_vm13, %v2992_v6  ;;  %v1829_v28 = vadd.f32 %v1786_v0, %v1434_v17  ;;  %v4221_v6 = vsel %vm6865_vm0, %v4219_v26, %v4220_v45  ;;  %v2967_v17 = vunpack.c.l.b16 %v2886_v34  ;;  %v2968_v26 = vunpack.c.l.b16 %v2889_v18  ;;  %v5178_v0 = vld [vmem:[%s5873_s9 + $0x6c] sm:$0xf] }
 0x25a   : > { %v4305_v8 = vunpack.c.l.b16 %v4221_v6  ;;  %v3674_v45 = vshll.u32 %v7573_v62, 16  ;;  %v4224_v36 = vrot.slane %v7541_v22, 5  ;;  %v3679_v23 = vshrl.u32 %v5178_v0, 16 }
 0x25b   : > { %v3682_v53 = vshll.u32 %v5178_v0, 16  ;;  %v3688_v6 = vshll.u32 %v7581_v30, 16  ;;  %v3692_v34 = vshrl.u32 %v7581_v30, 16  ;;  %v4227_v22 = vrot.slane %v7573_v62, 5 }
 0x25c   : > { %v2727_v24 = vpop.f32.mrf.mxu0  ;;  %v4331_v58 = vpack.c.b16 %v4305_v8, %v4304_v51  ;;  %v3676_v9 = vrot.slane %v3674_v45, 5  ;;  %v5665_v8 = vld [vmem:[%s5873_s9 + $0x68] sm:$0x1]  ;;  %v4226_v45 = vrot.slane %v4224_v36, 4 }
 0x25d   : > { %v2073_v49 = vpop.f32.mrf.mxu3  ;;  %5146 = vmatmul.msk.bf16.gmra.mxu2 %vm1089_vm13, %v5311_v47  ;;  %v2993_v47 = vpack.c.b16 %v2968_v26, %v2967_v17  ;;  %v2895_v29 = vrot.slane %v5665_v8, 5  ;;  %v3667_v17 = vsel %vm6689_vm10, %v3662_v32, %v7564_v21  ;;  %v3684_v0 = vrot.slane %v3682_v53, 5  ;;  %v7606_v32 = vld [vmem:[%s5873_s9 + $0x74] sm:$0x1] }
 0x25e   : > { %v1438_v41 = vpop.f32.mrf.mxu1  ;;  %v2116_v15 = vadd.f32 %v2073_v49, %v1829_v28  ;;  %v3672_v28 = vrot.slane %v3671_v16, 4  ;;  %v3690_v62 = vrot.slane %v3688_v6, 5  ;;  %v3908_v8 = vunpack.c.l.b16 %v3667_v17 }
 0x260   : > { %v1789_v38 = vpop.f32.mrf.mxu2  ;;  %v7586_v12 = vadd.f32 %v2727_v24, %v2116_v15  ;;  %v5004_v24 = vld [vmem:[%s5873_s9 + $0x60] sm:$0xe]  ;;  %v1439_v15 = vadd.f32 %v1438_v41, %v7040_v25  ;;  %v3677_v26 = vsel %vm6689_vm10, %v3672_v28, %v3676_v9 }
 0x261   : > { %v1830_v3 = vadd.f32 %v1789_v38, %v1437_v5  ;;  %v5243_v5 = vrot.slane %v5227_v57, 9  ;;  %v3694_v57 = vrot.slane %v3692_v34, 4  ;;  %v3909_v21 = vunpack.c.l.b16 %v3677_v26 }
 0x262   : > { %5210 = vmatmul.msk.bf16.gmra.mxu3 %vm1089_vm13, %v3933_v33  ;;  %8164 = vst [vmem:[#allocation27_spill] sm:$0xff] %v7586_v12  ;;  %v5664_v33 = vld [vmem:[%s5873_s9 + $0x64] sm:$0xf] }
 0x263   : > { %v2892_v51 = vrot.slane %v5664_v33, 5  ;;  %v5020_v33 = vrot.slane %v5004_v24, 9  ;;  %v4225_v28 = vsel %vm6865_vm0, %v5243_v5, %v4224_v36  ;;  %v3695_v34 = vor.u32 %v3694_v57, %v3690_v62 }
 0x264   : > { %v2730_v10 = vpop.f32.mrf.mxu0  ;;  %v3934_v5 = vpack.c.b16 %v3909_v21, %v3908_v8  ;;  %v4306_v24 = vunpack.c.l.b16 %v4225_v28 }
 0x265   : > { %v2076_v18 = vpop.f32.mrf.mxu3  ;;  %v2894_v25 = vrot.slane %v2892_v51, 4 }
 0x266   : > { %v1441_v49 = vpop.f32.mrf.mxu1  ;;  %v2117_v16 = vadd.f32 %v2076_v18, %v1830_v3  ;;  %v3681_v3 = vrot.slane %v3679_v23, 4 }
 0x267   : > { %5258 = vmatmul.msk.bf16.gmra.mxu0 %vm1089_vm13, %v4331_v58  ;;  %v5312_v58 = vld [vmem:[%s5873_s9 + $0x60] sm:$0xff]  ;;  %v2896_v6 = vsel %vm6865_vm0, %v2894_v25, %v2895_v29  ;;  %v4231_v25 = vrot.slane %v7581_v30, 5 }
 0x268   : > { %v1791_v38 = vpop.f32.mrf.mxu2  ;;  %v7603_v41 = vadd.f32 %v2730_v10, %v2117_v16  ;;  %v3685_v9 = vor.u32 %v3684_v0, %v3681_v3  ;;  %v2893_v10 = vsel %vm6865_vm0, %v5020_v33, %v2892_v51  ;;  %v3698_v16 = vshll.u32 %v7606_v32, 16  ;;  %v5181_v0 = vld [vmem:[%s5873_s9 + $0x78] sm:$0xf]  ;;  %v5228_v33 = vld [vmem:[%s5873_s9 + $0x6c] sm:$0xe] }
 0x269   : > { %5035 = vmatmul.msk.bf16.gmra.mxu1 %vm1089_vm13, %v2993_v47  ;;  %v1831_v18 = vadd.f32 %v1791_v38, %v1439_v15  ;;  %v4228_v47 = vsel %vm6865_vm0, %v4226_v45, %v4227_v22  ;;  %v1442_v22 = vadd.f32 %v1441_v49, %v7059_v31  ;;  %v2969_v26 = vunpack.c.l.b16 %v2893_v10 }
 0x26a   : > { %v4307_v15 = vunpack.c.l.b16 %v4228_v47  ;;  %v2970_v45 = vunpack.c.l.b16 %v2896_v6  ;;  %v3686_v51 = vrot.slane %v3685_v9, 4  ;;  %v3696_v3 = vrot.slane %v3695_v34, 4  ;;  %v5005_v9 = vld [vmem:[%s5873_s9 + $0x6c] sm:$0xe] }
 0x26b   : > { %v3700_v29 = vrot.slane %v3698_v16, 5  ;;  %v3703_v6 = vshrl.u32 %v5181_v0, 16  ;;  %v3706_v34 = vshll.u32 %v5181_v0, 16 }
 0x26c   : > { %v2732_v12 = vpop.f32.mrf.mxu0  ;;  %v4332_v57 = vpack.c.b16 %v4307_v15, %v4306_v24  ;;  %v2994_v49 = vpack.c.b16 %v2970_v45, %v2969_v26  ;;  %v3691_v28 = vsel %vm6689_vm10, %v3686_v51, %v3690_v62  ;;  %v5244_v62 = vrot.slane %v5228_v33, 9  ;;  %v7647_v33 = vld [vmem:[%s5873_s9 + $0x80] sm:$0x1] }
 0x26d   : > { %v2078_v23 = vpop.f32.mrf.mxu3  ;;  %5147 = vmatmul.msk.bf16.gmra.mxu2 %vm1089_vm13, %v5312_v58  ;;  %v3701_v47 = vsel %vm6689_vm10, %v3696_v3, %v3700_v29  ;;  %v3910_v24 = vunpack.c.l.b16 %v3691_v28  ;;  %v5021_v26 = vrot.slane %v5005_v9, 9  ;;  %v5667_v3 = vld [vmem:[%s5873_s9 + $0x74] sm:$0x1] }
 0x26e   : > { %v1443_v53 = vpop.f32.mrf.mxu1  ;;  %v2118_v36 = vadd.f32 %v2078_v23, %v1831_v18  ;;  %v7622_v18 = vld [vmem:[%s5873_s9 + $0x7c] sm:$0xf]  ;;  %v5666_v23 = vld [vmem:[%s5873_s9 + $0x70] sm:$0xf]  ;;  %v3911_v15 = vunpack.c.l.b16 %v3701_v47  ;;  %v2902_v29 = vrot.slane %v5667_v3, 5 }
 0x26f   : > { %v2899_v10 = vrot.slane %v5666_v23, 5  ;;  %v3712_v16 = vshll.u32 %v7622_v18, 16  ;;  %v3716_v30 = vshrl.u32 %v7622_v18, 16  ;;  %v4238_v3 = vrot.slane %v7622_v18, 5 }
 0x270   : > { %v1794_v17 = vpop.f32.mrf.mxu2  ;;  %v7624_v58 = vadd.f32 %v2732_v12, %v2118_v36  ;;  %v1444_v36 = vadd.f32 %v1443_v53, %v7082_v43  ;;  %v3708_v43 = vrot.slane %v3706_v34, 5 }
 0x271   : > { %v1832_v38 = vadd.f32 %v1794_v17, %v1442_v22  ;;  %v4233_v17 = vrot.slane %v4231_v25, 4  ;;  %v2901_v51 = vrot.slane %v2899_v10, 4  ;;  %v7644_v53 = vrot.slane %v3712_v16, 5 }
 0x272   : > { %5211 = vmatmul.msk.bf16.gmra.mxu3 %vm1089_vm13, %v3934_v5  ;;  %v4234_v5 = vrot.slane %v7606_v32, 5  ;;  %v3718_v32 = vrot.slane %v3716_v30, 4  ;;  %v2900_v23 = vsel %vm6865_vm0, %v5021_v26, %v2899_v10  ;;  %v3722_v16 = vshll.u32 %v7647_v33, 16  ;;  %v5184_v10 = vld [vmem:[%s5873_s9 + $0x84] sm:$0xf] }
 0x274   : > { %v2735_v31 = vpop.f32.mrf.mxu0  ;;  %v4235_v28 = vsel %vm6865_vm0, %v4233_v17, %v4234_v5 }
 0x275   : > { %v2081_v8 = vpop.f32.mrf.mxu3 }
 0x276   : > { %v1446_v21 = vpop.f32.mrf.mxu1  ;;  %v2119_v12 = vadd.f32 %v2081_v8, %v1832_v38  ;;  %v5313_v38 = vld [vmem:[%s5873_s9 + $0x6c] sm:$0xff] }
 0x277   : > { %5259 = vmatmul.msk.bf16.gmra.mxu0 %vm1089_vm13, %v4332_v57  ;;  %v3705_v57 = vrot.slane %v3703_v6, 4  ;;  %v2903_v6 = vsel %vm6865_vm0, %v2901_v51, %v2902_v29  ;;  %v1447_v30 = vadd.f32 %v1446_v21, %v7101_v44 }
 0x278   : > { %v1796_v22 = vpop.f32.mrf.mxu2  ;;  %v7642_v0 = vadd.f32 %v2735_v31, %v2119_v12  ;;  %v3935_v31 = vpack.c.b16 %v3911_v15, %v3910_v24  ;;  %v2972_v24 = vunpack.c.l.b16 %v2903_v6 }
 0x279   : > { %5036 = vmatmul.msk.bf16.gmra.mxu1 %vm1089_vm13, %v2994_v49  ;;  %v1833_v45 = vadd.f32 %v1796_v22, %v1444_v36  ;;  %v4232_v49 = vsel %vm6865_vm0, %v5244_v62, %v4231_v25  ;;  %v3709_v34 = vor.u32 %v3708_v43, %v3705_v57  ;;  %v3719_v25 = vor.u32 %v3718_v32, %v7644_v53  ;;  %v7668_v57 = vld [vmem:[%s5873_s9 + $0x88] sm:$0xf] }
 0x27a   : > { %v4308_v36 = vunpack.c.l.b16 %v4232_v49  ;;  %v4309_v62 = vunpack.c.l.b16 %v4235_v28  ;;  %v2971_v22 = vunpack.c.l.b16 %v2900_v23  ;;  %v3727_v43 = vshrl.u32 %v5184_v10, 16  ;;  %v5668_v23 = vld [vmem:[%s5873_s9 + $0x7c] sm:$0xf] }
 0x27b   : > { %v3710_v17 = vrot.slane %v3709_v34, 4  ;;  %v3720_v26 = vrot.slane %v3719_v25, 4  ;;  %v3730_v32 = vshll.u32 %v5184_v10, 16  ;;  %v2906_v6 = vrot.slane %v5668_v23, 5 }
 0x27c   : > { %v2737_v8 = vpop.f32.mrf.mxu0  ;;  %v4333_v51 = vpack.c.b16 %v4309_v62, %v4308_v36  ;;  %v2995_v29 = vpack.c.b16 %v2972_v24, %v2971_v22  ;;  %v3740_v36 = vshrl.u32 %v7668_v57, 16 }
 0x27d   : > { %v2083_v47 = vpop.f32.mrf.mxu3  ;;  %5148 = vmatmul.msk.bf16.gmra.mxu2 %vm1089_vm13, %v5313_v38  ;;  %v5229_v38 = vld [vmem:[%s5873_s9 + $0x78] sm:$0xe]  ;;  %v3715_v18 = vsel %vm6689_vm10, %v3710_v17, %v7644_v53  ;;  %v3729_v53 = vrot.slane %v3727_v43, 4  ;;  %v3732_v22 = vrot.slane %v3730_v32, 5  ;;  %v2908_v10 = vrot.slane %v2906_v6, 4 }
 0x27e   : > { %v1448_v9 = vpop.f32.mrf.mxu1  ;;  %v2120_v12 = vadd.f32 %v2083_v47, %v1833_v45  ;;  %v3724_v45 = vrot.slane %v3722_v16, 5  ;;  %v5245_v47 = vrot.slane %v5229_v38, 9  ;;  %v4240_v16 = vrot.slane %v4238_v3, 4  ;;  %v7692_v43 = vld [vmem:[%s5873_s9 + $0x8c] sm:$0x1] }
 0x27f   : > { %v1449_v25 = vadd.f32 %v1448_v9, %v7118_v2  ;;  %v3912_v2 = vunpack.c.l.b16 %v3715_v18 }
 0x280   : > { %v1799_v5 = vpop.f32.mrf.mxu2  ;;  %v7665_v44 = vadd.f32 %v2737_v8, %v2120_v12  ;;  %v3725_v8 = vsel %vm6689_vm10, %v3720_v26, %v3724_v45  ;;  %v4241_v12 = vrot.slane %v7647_v33, 5  ;;  %v5669_v33 = vld [vmem:[%s5873_s9 + $0x80] sm:$0x1]  ;;  %v4239_v45 = vsel %vm6865_vm0, %v5245_v47, %v4238_v3 }
 0x281   : > { %v1834_v15 = vadd.f32 %v1799_v5, %v1447_v30  ;;  %v3736_v30 = vshll.u32 %v7668_v57, 16  ;;  %v2909_v17 = vrot.slane %v5669_v33, 5  ;;  %v3913_v9 = vunpack.c.l.b16 %v3725_v8  ;;  %v5187_v33 = vld [vmem:[%s5873_s9 + $0x90] sm:$0xf] }
 0x282   : > { %5212 = vmatmul.msk.bf16.gmra.mxu3 %vm1089_vm13, %v3935_v31  ;;  %v5006_v31 = vld [vmem:[%s5873_s9 + $0x78] sm:$0xe]  ;;  %v4242_v38 = vsel %vm6865_vm0, %v4240_v16, %v4241_v12  ;;  %v3733_v3 = vor.u32 %v3732_v22, %v3729_v53  ;;  %v4310_v18 = vunpack.c.l.b16 %v4239_v45  ;;  %v5230_v22 = vld [vmem:[%s5873_s9 + $0x84] sm:$0xe] }
 0x283   : > { %v5022_v5 = vrot.slane %v5006_v31, 9  ;;  %v2910_v23 = vsel %vm6865_vm0, %v2908_v10, %v2909_v17  ;;  %v4311_v8 = vunpack.c.l.b16 %v4242_v38  ;;  %v4245_v10 = vrot.slane %v7668_v57, 5  ;;  %v5007_v57 = vld [vmem:[%s5873_s9 + $0x84] sm:$0xe] }
 0x284   : > { %v2740_v21 = vpop.f32.mrf.mxu0 }
 0x285   : > { %v2086_v49 = vpop.f32.mrf.mxu3 }
 0x286   : > { %v3063_v28 = vpop.f32.mrf.mxu1  ;;  %v2121_v34 = vadd.f32 %v2086_v49, %v1834_v15  ;;  %v5314_v15 = vld [vmem:[%s5873_s9 + $0x78] sm:$0xff] }
 0x287   : > { %5260 = vmatmul.msk.bf16.gmra.mxu0 %vm1089_vm13, %v4333_v51  ;;  %v3738_v51 = vrot.slane %v3736_v30, 5  ;;  %v3143_v16 = vadd.f32 %v3063_v28, %v7135_v52 }
 0x288   : > { %v1801_v62 = vpop.f32.mrf.mxu2  ;;  %v7685_v26 = vadd.f32 %v2740_v21, %v2121_v34  ;;  %v2907_v21 = vsel %vm6865_vm0, %v5022_v5, %v2906_v6  ;;  %v3936_v34 = vpack.c.b16 %v3913_v9, %v3912_v2  ;;  %v3734_v6 = vrot.slane %v3733_v3, 4  ;;  %v7708_v2 = vld [vmem:[%s5873_s9 + $0x94] sm:$0xf] }
 0x289   : > { %5037 = vmatmul.msk.bf16.gmra.mxu1 %vm1089_vm13, %v2995_v29  ;;  %v1835_v24 = vadd.f32 %v1801_v62, %v1449_v25  ;;  %v3742_v29 = vrot.slane %v3740_v36, 4  ;;  %v3746_v25 = vshll.u32 %v7692_v43, 16  ;;  %v2973_v36 = vunpack.c.l.b16 %v2907_v21 }
 0x28a   : > { %v2974_v62 = vunpack.c.l.b16 %v2910_v23  ;;  %v4334_v5 = vpack.c.b16 %v4311_v8, %v4310_v18  ;;  %v3739_v38 = vsel %vm6689_vm10, %v3734_v6, %v3738_v51  ;;  %v4248_v3 = vrot.slane %v7692_v43, 5 }
 0x28b   : > { %v3743_v12 = vor.u32 %v3742_v29, %v3738_v51  ;;  %v5246_v29 = vrot.slane %v5230_v22, 9  ;;  %v4247_v18 = vrot.slane %v4245_v10, 4  ;;  %v3760_v51 = vshll.u32 %v7708_v2, 16 }
 0x28c   : > { %v2742_v49 = vpop.f32.mrf.mxu0  ;;  %v2996_v28 = vpack.c.b16 %v2974_v62, %v2973_v36  ;;  %v3764_v8 = vshrl.u32 %v7708_v2, 16  ;;  %v3914_v43 = vunpack.c.l.b16 %v3739_v38  ;;  %v5023_v62 = vrot.slane %v5007_v57, 9 }
 0x28d   : > { %v2088_v32 = vpop.f32.mrf.mxu3  ;;  %5149 = vmatmul.msk.bf16.gmra.mxu2 %vm1089_vm13, %v5314_v15  ;;  %v3748_v15 = vrot.slane %v3746_v25, 5  ;;  %v4246_v36 = vsel %vm6865_vm0, %v5246_v29, %v4245_v10 }
 0x28e   : > { %v3065_v31 = vpop.f32.mrf.mxu1  ;;  %v2122_v47 = vadd.f32 %v2088_v32, %v1835_v24  ;;  %v3744_v24 = vrot.slane %v3743_v12, 4  ;;  %v5670_v32 = vld [vmem:[%s5873_s9 + $0x88] sm:$0xf]  ;;  %v4312_v10 = vunpack.c.l.b16 %v4246_v36 }
 0x28f   : > { %v2913_v21 = vrot.slane %v5670_v32, 5  ;;  %v3144_v25 = vadd.f32 %v3065_v31, %v7148_v13  ;;  %v4249_v13 = vsel %vm6865_vm0, %v4247_v18, %v4248_v3  ;;  %v7729_v31 = vrot.slane %v3760_v51, 5 }
 0x290   : > { %v3350_v30 = vpop.f32.mrf.mxu2  ;;  %v7705_v17 = vadd.f32 %v2742_v49, %v2122_v47  ;;  %v3754_v49 = vshll.u32 %v5187_v33, 16  ;;  %v3749_v47 = vsel %vm6689_vm10, %v3744_v24, %v3748_v15 }
 0x291   : > { %v3430_v53 = vadd.f32 %v3350_v30, %v3143_v16  ;;  %v5315_v30 = vld [vmem:[%s5873_s9 + $0x84] sm:$0xff]  ;;  %v2915_v6 = vrot.slane %v2913_v21, 4  ;;  %v3915_v24 = vunpack.c.l.b16 %v3749_v47  ;;  %v2914_v32 = vsel %vm6865_vm0, %v5023_v62, %v2913_v21  ;;  %v7744_v21 = vld [vmem:[%s5873_s9 + $0xa0] sm:$0xf] }
 0x292   : > { %5213 = vmatmul.msk.bf16.gmra.mxu3 %vm1089_vm13, %v3936_v34  ;;  %v3751_v34 = vshrl.u32 %v5187_v33, 16  ;;  %v3756_v33 = vrot.slane %v3754_v49, 5 }
 0x293   : > { %v3937_v57 = vpack.c.b16 %v3915_v24, %v3914_v43 }
 0x294   : > { %v4402_v52 = vpop.f32.mrf.mxu0  ;;  %v3753_v15 = vrot.slane %v3751_v34, 4  ;;  %v4313_v34 = vunpack.c.l.b16 %v4249_v13 }
 0x295   : > { %v4004_v9 = vpop.f32.mrf.mxu3 }
 0x296   : > { %v3068_v45 = vpop.f32.mrf.mxu1  ;;  %v4084_v23 = vadd.f32 %v4004_v9, %v3430_v53  ;;  %v7732_v9 = vld [vmem:[%s5873_s9 + $0x98] sm:$0x1]  ;;  %v3757_v49 = vor.u32 %v3756_v33, %v3753_v15  ;;  %v4335_v43 = vpack.c.b16 %v4313_v34, %v4312_v10  ;;  %v4252_v15 = vrot.slane %v7708_v2, 5 }
 0x297   : > { %5261 = vmatmul.msk.bf16.gmra.mxu0 %vm1089_vm13, %v4334_v5  ;;  %v5671_v5 = vld [vmem:[%s5873_s9 + $0x8c] sm:$0x1]  ;;  %v3770_v18 = vshll.u32 %v7732_v9, 16  ;;  %v3784_v33 = vshll.u32 %v7744_v21, 16  ;;  %v3788_v10 = vshrl.u32 %v7744_v21, 16 }
 0x298   : > { %v4482_v12 = vadd.f32 %v4402_v52, %v4084_v23  ;;  %v3352_v16 = vpop.f32.mrf.mxu2  ;;  %v2916_v53 = vrot.slane %v5671_v5, 5  ;;  %v3766_v52 = vrot.slane %v3764_v8, 4  ;;  %v3145_v8 = vadd.f32 %v3068_v45, %v7161_v14 }
 0x299   : > { %5038 = vmatmul.msk.bf16.gmra.mxu1 %vm1089_vm13, %v2996_v28  ;;  %v3431_v22 = vadd.f32 %v3352_v16, %v3144_v25  ;;  %v2975_v25 = vunpack.c.l.b16 %v2914_v32  ;;  %v3758_v62 = vrot.slane %v3757_v49, 4  ;;  %v3772_v5 = vrot.slane %v3770_v18, 5 }
 0x29a   : > { %4514 = vst [vmem:[%s5875_s10] sm:$0xff] %v4482_v12  ;;  %v2917_v23 = vsel %vm6865_vm0, %v2915_v6, %v2916_v53  ;;  %v3767_v47 = vor.u32 %v3766_v52, %v7729_v31  ;;  %v5231_v53 = vld [vmem:[%s5873_s9 + $0x90] sm:$0xe] }
 0x29b   : > { %v2976_v16 = vunpack.c.l.b16 %v2917_v23  ;;  %v5247_v23 = vrot.slane %v5231_v53, 9  ;;  %v3763_v2 = vsel %vm6689_vm10, %v3758_v62, %v7729_v31  ;;  %v5192_v53 = vld [vmem:[%s5873_s9 + $0xa4] sm:$0x1] }
 0x29c   : > { %v4404_v28 = vpop.f32.mrf.mxu0  ;;  %v3768_v6 = vrot.slane %v3767_v47, 4 }
 0x29d   : > { %v4006_v38 = vpop.f32.mrf.mxu3  ;;  %5150 = vmatmul.msk.bf16.gmra.mxu2 %vm1089_vm13, %v5315_v30  ;;  %v5190_v30 = vld [vmem:[%s5873_s9 + $0x9c] sm:$0xf]  ;;  %v2997_v45 = vpack.c.b16 %v2976_v16, %v2975_v25  ;;  %v5316_v25 = vld [vmem:[%s5873_s9 + $0x90] sm:$0xff] }
 0x29e   : > { %v3070_v29 = vpop.f32.mrf.mxu1  ;;  %v4085_v3 = vadd.f32 %v4006_v38, %v3431_v22  ;;  %v3775_v22 = vshrl.u32 %v5190_v30, 16  ;;  %v3778_v24 = vshll.u32 %v5190_v30, 16  ;;  %v3773_v34 = vsel %vm6689_vm10, %v3768_v6, %v3772_v5 }
 0x29f   : > { %v3916_v6 = vunpack.c.l.b16 %v3763_v2  ;;  %v3917_v5 = vunpack.c.l.b16 %v3773_v34  ;;  %v4259_v2 = vrot.slane %v7744_v21, 5 }
 0x2a0   : > { %v4483_v51 = vadd.f32 %v4404_v28, %v4085_v3  ;;  %v3355_v12 = vpop.f32.mrf.mxu2  ;;  %v5672_v28 = vld [vmem:[%s5873_s9 + $0x94] sm:$0xf]  ;;  %v4255_v3 = vrot.slane %v7732_v9, 5  ;;  %v3777_v49 = vrot.slane %v3775_v22, 4  ;;  %v3780_v47 = vrot.slane %v3778_v24, 5 }
 0x2a1   : > { %v3432_v36 = vadd.f32 %v3355_v12, %v3145_v8  ;;  %v2920_v38 = vrot.slane %v5672_v28, 5  ;;  %v4254_v9 = vrot.slane %v4252_v15, 4  ;;  %v3786_v12 = vrot.slane %v3784_v33, 5 }
 0x2a2   : > { %4515 = vst [vmem:[%s5875_s10 + $0x8] sm:$0xff] %v4483_v51  ;;  %5214 = vmatmul.msk.bf16.gmra.mxu3 %vm1089_vm13, %v3937_v57  ;;  %v5008_v57 = vld [vmem:[%s5873_s9 + $0x90] sm:$0xe]  ;;  %v3146_v51 = vadd.f32 %v3070_v29, %v7174_v63  ;;  %v3781_v22 = vor.u32 %v3780_v47, %v3777_v49  ;;  %v4253_v63 = vsel %vm6865_vm0, %v5247_v23, %v4252_v15 }
 0x2a3   : > { %v5024_v16 = vrot.slane %v5008_v57, 9  ;;  %v2922_v30 = vrot.slane %v2920_v38, 4  ;;  %v4256_v29 = vsel %vm6865_vm0, %v4254_v9, %v4255_v3  ;;  %v3938_v57 = vpack.c.b16 %v3917_v5, %v3916_v6 }
 0x2a4   : > { %v4407_v14 = vpop.f32.mrf.mxu0  ;;  %v4314_v15 = vunpack.c.l.b16 %v4253_v63  ;;  %v4315_v23 = vunpack.c.l.b16 %v4256_v29  ;;  %v3782_v3 = vrot.slane %v3781_v22, 4 }
 0x2a5   : > { %v4009_v13 = vpop.f32.mrf.mxu3  ;;  %v2921_v33 = vsel %vm6865_vm0, %v5024_v16, %v2920_v38  ;;  %v5193_v16 = vld [vmem:[%s5873_s9 + $0xa8] sm:$0xf] }
 0x2a6   : > { %v3073_v52 = vpop.f32.mrf.mxu1  ;;  %v4086_v32 = vadd.f32 %v4009_v13, %v3432_v36  ;;  %v3790_v36 = vrot.slane %v3788_v10, 4  ;;  %v3794_v10 = vshll.u32 %v5192_v53, 16  ;;  %v2977_v38 = vunpack.c.l.b16 %v2921_v33  ;;  %v5009_v33 = vld [vmem:[%s5873_s9 + $0x9c] sm:$0xe] }
 0x2a7   : > { %5262 = vmatmul.msk.bf16.gmra.mxu0 %vm1089_vm13, %v4335_v43  ;;  %v5673_v43 = vld [vmem:[%s5873_s9 + $0x98] sm:$0x1]  ;;  %v3147_v49 = vadd.f32 %v3073_v52, %v7187_v42  ;;  %v3787_v42 = vsel %vm6689_vm10, %v3782_v3, %v3786_v12  ;;  %v4261_v52 = vrot.slane %v4259_v2, 4  ;;  %v3799_v29 = vshrl.u32 %v5193_v16, 16 }
 0x2a8   : > { %v4484_v18 = vadd.f32 %v4407_v14, %v4086_v32  ;;  %v3357_v8 = vpop.f32.mrf.mxu2  ;;  %v2923_v31 = vrot.slane %v5673_v43, 5  ;;  %v3791_v28 = vor.u32 %v3790_v36, %v3786_v12  ;;  %v3796_v9 = vrot.slane %v3794_v10, 5 }
 0x2a9   : > { %5039 = vmatmul.msk.bf16.gmra.mxu1 %vm1089_vm13, %v2997_v45  ;;  %v3433_v62 = vadd.f32 %v3357_v8, %v3146_v51  ;;  %v5232_v51 = vld [vmem:[%s5873_s9 + $0x9c] sm:$0xe]  ;;  %v3918_v12 = vunpack.c.l.b16 %v3787_v42 }
 0x2aa   : > { %4516 = vst [vmem:[%s5875_s10 + $0x10] sm:$0xff] %v4484_v18  ;;  %v2924_v13 = vsel %vm6865_vm0, %v2922_v30, %v2923_v31  ;;  %v3792_v8 = vrot.slane %v3791_v28, 4  ;;  %v4336_v30 = vpack.c.b16 %v4315_v23, %v4314_v15  ;;  %v5248_v43 = vrot.slane %v5232_v51, 9  ;;  %v7783_v31 = vld [vmem:[%s5873_s9 + $0xac] sm:$0xf] }
 0x2ab   : > { %v2978_v18 = vunpack.c.l.b16 %v2924_v13  ;;  %v3802_v13 = vshll.u32 %v5193_v16, 16  ;;  %v3808_v28 = vshll.u32 %v7783_v31, 16  ;;  %v3812_v10 = vshrl.u32 %v7783_v31, 16 }
 0x2ac   : > { %v4409_v24 = vpop.f32.mrf.mxu0  ;;  %v3797_v22 = vsel %vm6689_vm10, %v3792_v8, %v3796_v9  ;;  %v3801_v51 = vrot.slane %v3799_v29, 4 }
 0x2ad   : > { %v4011_v14 = vpop.f32.mrf.mxu3  ;;  %5151 = vmatmul.msk.bf16.gmra.mxu2 %vm1089_vm13, %v5316_v25  ;;  %v2998_v36 = vpack.c.b16 %v2978_v18, %v2977_v38  ;;  %v3919_v23 = vunpack.c.l.b16 %v3797_v22  ;;  %v5675_v38 = vld [vmem:[%s5873_s9 + $0xa4] sm:$0x1]  ;;  %v7803_v9 = vrot.slane %v3808_v28, 5 }
 0x2ae   : > { %v3075_v45 = vpop.f32.mrf.mxu1  ;;  %v4087_v32 = vadd.f32 %v4011_v14, %v3433_v62  ;;  %v4262_v62 = vrot.slane %v5192_v53, 5  ;;  %v4260_v53 = vsel %vm6865_vm0, %v5248_v43, %v4259_v2  ;;  %v2930_v18 = vrot.slane %v5675_v38, 5 }
 0x2af   : > { %v3804_v2 = vrot.slane %v3802_v13, 5  ;;  %v4316_v16 = vunpack.c.l.b16 %v4260_v53  ;;  %v3939_v43 = vpack.c.b16 %v3919_v23, %v3918_v12  ;;  %v7818_v12 = vld [vmem:[%s5873_s9 + $0xb8] sm:$0xf]  ;;  %v5233_v23 = vld [vmem:[%s5873_s9 + $0xa8] sm:$0xe]  ;;  %v4266_v38 = vrot.slane %v7783_v31, 5 }
 0x2b0   : > { %v4485_v34 = vadd.f32 %v4409_v24, %v4087_v32  ;;  %v3360_v47 = vpop.f32.mrf.mxu2  ;;  %v5674_v24 = vld [vmem:[%s5873_s9 + $0xa0] sm:$0xf]  ;;  %v4263_v3 = vsel %vm6865_vm0, %v4261_v52, %v4262_v62 }
 0x2b1   : > { %v3434_v25 = vadd.f32 %v3360_v47, %v3147_v49  ;;  %v2927_v63 = vrot.slane %v5674_v24, 5  ;;  %v5025_v49 = vrot.slane %v5009_v33, 9 }
 0x2b2   : > { %4517 = vst [vmem:[%s5875_s10 + $0x18] sm:$0xff] %v4485_v34  ;;  %5215 = vmatmul.msk.bf16.gmra.mxu3 %vm1089_vm13, %v3938_v57  ;;  %v3148_v57 = vadd.f32 %v3075_v45, %v7200_v56  ;;  %v5317_v34 = vld [vmem:[%s5873_s9 + $0x9c] sm:$0xff]  ;;  %v3814_v56 = vrot.slane %v3812_v10, 4  ;;  %v7806_v45 = vld [vmem:[%s5873_s9 + $0xb0] sm:$0x1] }
 0x2b3   : > { %v2929_v47 = vrot.slane %v2927_v63, 4  ;;  %v2928_v42 = vsel %vm6865_vm0, %v5025_v49, %v2927_v63  ;;  %v3818_v24 = vshll.u32 %v7806_v45, 16  ;;  %v5196_v10 = vld [vmem:[%s5873_s9 + $0xb4] sm:$0xf] }
 0x2b4   : > { %v4412_v21 = vpop.f32.mrf.mxu0  ;;  %v3815_v22 = vor.u32 %v3814_v56, %v7803_v9  ;;  %v2979_v13 = vunpack.c.l.b16 %v2928_v42 }
 0x2b5   : > { %v4014_v6 = vpop.f32.mrf.mxu3  ;;  %v2931_v52 = vsel %vm6865_vm0, %v2929_v47, %v2930_v18 }
 0x2b6   : > { %v3078_v5 = vpop.f32.mrf.mxu1  ;;  %v4088_v14 = vadd.f32 %v4014_v6, %v3434_v25  ;;  %v3805_v6 = vor.u32 %v3804_v2, %v3801_v51  ;;  %v2980_v28 = vunpack.c.l.b16 %v2931_v52 }
 0x2b7   : > { %5263 = vmatmul.msk.bf16.gmra.mxu0 %vm1089_vm13, %v4336_v30 }
 0x2b8   : > { %v4486_v32 = vadd.f32 %v4412_v21, %v4088_v14  ;;  %v3362_v15 = vpop.f32.mrf.mxu2  ;;  %v4317_v21 = vunpack.c.l.b16 %v4263_v3  ;;  %v3149_v14 = vadd.f32 %v3078_v5, %v7213_v61  ;;  %v3823_v3 = vshrl.u32 %v5196_v10, 16 }
 0x2b9   : > { %5040 = vmatmul.msk.bf16.gmra.mxu1 %vm1089_vm13, %v2998_v36  ;;  %v3435_v8 = vadd.f32 %v3362_v15, %v3148_v57  ;;  %v3816_v57 = vrot.slane %v3815_v22, 4  ;;  %v3820_v15 = vrot.slane %v3818_v24, 5  ;;  %v3832_v61 = vshll.u32 %v7818_v12, 16 }
 0x2ba   : > { %4518 = vst [vmem:[%s5875_s10 + $0x20] sm:$0xff] %v4486_v32  ;;  %v4337_v63 = vpack.c.b16 %v4317_v21, %v4316_v16  ;;  %v3806_v32 = vrot.slane %v3805_v6, 4  ;;  %v3836_v5 = vshrl.u32 %v7818_v12, 16  ;;  %v2999_v47 = vpack.c.b16 %v2980_v28, %v2979_v13  ;;  %v5677_v28 = vld [vmem:[%s5873_s9 + $0xb0] sm:$0x1] }
 0x2bb   : > { %v3821_v16 = vsel %vm6689_vm10, %v3816_v57, %v3820_v15  ;;  %v3825_v31 = vrot.slane %v3823_v3, 4  ;;  %v7834_v42 = vrot.slane %v3832_v61, 5  ;;  %v4269_v24 = vrot.slane %v7806_v45, 5 }
 0x2bc   : > { %v4414_v25 = vpop.f32.mrf.mxu0  ;;  %v3838_v52 = vrot.slane %v3836_v5, 4 }
 0x2bd   : > { %v4016_v30 = vpop.f32.mrf.mxu3  ;;  %5152 = vmatmul.msk.bf16.gmra.mxu2 %vm1089_vm13, %v5317_v34  ;;  %v3826_v34 = vshll.u32 %v5196_v10, 16  ;;  %v2937_v10 = vrot.slane %v5677_v28, 5  ;;  %v5678_v28 = vld [vmem:[%s5873_s9 + $0xb8] sm:$0xf] }
 0x2be   : > { %v3080_v36 = vpop.f32.mrf.mxu1  ;;  %v4089_v62 = vadd.f32 %v4016_v30, %v3435_v8  ;;  %v5676_v8 = vld [vmem:[%s5873_s9 + $0xac] sm:$0xf]  ;;  %v5249_v30 = vrot.slane %v5233_v23, 9  ;;  %v3839_v57 = vor.u32 %v3838_v52, %v7834_v42  ;;  %v5199_v52 = vld [vmem:[%s5873_s9 + $0xc0] sm:$0xf] }
 0x2bf   : > { %v2934_v2 = vrot.slane %v5676_v8, 5  ;;  %v3828_v21 = vrot.slane %v3826_v34, 5  ;;  %v3150_v6 = vadd.f32 %v3080_v36, %v7226_v60 }
 0x2c0   : > { %v4487_v29 = vadd.f32 %v4414_v25, %v4089_v62  ;;  %v3365_v33 = vpop.f32.mrf.mxu2  ;;  %v3811_v25 = vsel %vm6689_vm10, %v3806_v32, %v7803_v9  ;;  %v4268_v9 = vrot.slane %v4266_v38, 4  ;;  %v3921_v32 = vunpack.c.l.b16 %v3821_v16 }
 0x2c1   : > { %v3436_v53 = vadd.f32 %v3365_v33, %v3149_v14  ;;  %v5318_v14 = vld [vmem:[%s5873_s9 + $0xa8] sm:$0xff]  ;;  %v2936_v13 = vrot.slane %v2934_v2, 4  ;;  %v4267_v60 = vsel %vm6865_vm0, %v5249_v30, %v4266_v38  ;;  %v3829_v36 = vor.u32 %v3828_v21, %v3825_v31 }
 0x2c2   : > { %4519 = vst [vmem:[%s5875_s10 + $0x28] sm:$0xff] %v4487_v29  ;;  %5216 = vmatmul.msk.bf16.gmra.mxu3 %vm1089_vm13, %v3939_v43  ;;  %v5010_v43 = vld [vmem:[%s5873_s9 + $0xa8] sm:$0xe]  ;;  %v7840_v29 = vld [vmem:[%s5873_s9 + $0xbc] sm:$0x1]  ;;  %v4270_v23 = vsel %vm6865_vm0, %v4268_v9, %v4269_v24  ;;  %v4318_v38 = vunpack.c.l.b16 %v4267_v60  ;;  %v3850_v60 = vshll.u32 %v5199_v52, 16 }
 0x2c3   : > { %v5026_v33 = vrot.slane %v5010_v43, 9  ;;  %v3842_v15 = vshll.u32 %v7840_v29, 16  ;;  %v2938_v5 = vsel %vm6865_vm0, %v2936_v13, %v2937_v10  ;;  %v3830_v8 = vrot.slane %v3829_v36, 4 }
 0x2c4   : > { %v4417_v49 = vpop.f32.mrf.mxu0  ;;  %v2941_v10 = vrot.slane %v5678_v28, 5 }
 0x2c5   : > { %v4019_v18 = vpop.f32.mrf.mxu3  ;;  %v2935_v61 = vsel %vm6865_vm0, %v5026_v33, %v2934_v2  ;;  %v2982_v2 = vunpack.c.l.b16 %v2938_v5  ;;  %v3835_v24 = vsel %vm6689_vm10, %v3830_v8, %v7834_v42  ;;  %v4276_v5 = vrot.slane %v7840_v29, 5 }
 0x2c6   : > { %v3083_v51 = vpop.f32.mrf.mxu1  ;;  %v4090_v56 = vadd.f32 %v4019_v18, %v3436_v53  ;;  %v3920_v53 = vunpack.c.l.b16 %v3811_v25  ;;  %v4319_v18 = vunpack.c.l.b16 %v4270_v23  ;;  %v3844_v25 = vrot.slane %v3842_v15, 5 }
 0x2c7   : > { %5264 = vmatmul.msk.bf16.gmra.mxu0 %vm1089_vm13, %v4337_v63  ;;  %v3151_v30 = vadd.f32 %v3083_v51, %v7239_v59  ;;  %v2981_v31 = vunpack.c.l.b16 %v2935_v61  ;;  %v5234_v51 = vld [vmem:[%s5873_s9 + $0xb4] sm:$0xe] }
 0x2c8   : > { %v4488_v62 = vadd.f32 %v4417_v49, %v4090_v56  ;;  %v3367_v22 = vpop.f32.mrf.mxu2  ;;  %v3840_v56 = vrot.slane %v3839_v57, 4  ;;  %v3922_v57 = vunpack.c.l.b16 %v3835_v24 }
 0x2c9   : > { %5041 = vmatmul.msk.bf16.gmra.mxu1 %vm1089_vm13, %v2999_v47  ;;  %v3437_v63 = vadd.f32 %v3367_v22, %v3150_v6  ;;  %v3940_v47 = vpack.c.b16 %v3921_v32, %v3920_v53  ;;  %v7861_v6 = vld [vmem:[%s5873_s9 + $0xc4] sm:$0xf]  ;;  %v3000_v9 = vpack.c.b16 %v2982_v2, %v2981_v31  ;;  %v5011_v32 = vld [vmem:[%s5873_s9 + $0xb4] sm:$0xe] }
 0x2ca   : > { %4520 = vst [vmem:[%s5875_s10 + $0x30] sm:$0xff] %v4488_v62  ;;  %v4338_v62 = vpack.c.b16 %v4319_v18, %v4318_v38  ;;  %v3845_v59 = vsel %vm6689_vm10, %v3840_v56, %v3844_v25  ;;  %v3856_v36 = vshll.u32 %v7861_v6, 16  ;;  %v3860_v42 = vshrl.u32 %v7861_v6, 16  ;;  %v5679_v18 = vld [vmem:[%s5873_s9 + $0xbc] sm:$0x1] }
 0x2cb   : > { %v3923_v15 = vunpack.c.l.b16 %v3845_v59  ;;  %v2943_v38 = vrot.slane %v2941_v10, 4  ;;  %v2944_v8 = vrot.slane %v5679_v18, 5 }
 0x2cc   : > { %v4419_v45 = vpop.f32.mrf.mxu0 }
 0x2cd   : > { %v4021_v3 = vpop.f32.mrf.mxu3  ;;  %5153 = vmatmul.msk.bf16.gmra.mxu2 %vm1089_vm13, %v5318_v14  ;;  %v4273_v14 = vrot.slane %v7818_v12, 5  ;;  %v5250_v12 = vrot.slane %v5234_v51, 9 }
 0x2ce   : > { %v3085_v34 = vpop.f32.mrf.mxu1  ;;  %v4091_v49 = vadd.f32 %v4021_v3, %v3437_v63  ;;  %v3847_v63 = vshrl.u32 %v5199_v52, 16 }
 0x2cf   : > { %v3152_v23 = vadd.f32 %v3085_v34, %v7253_v40  ;;  %v4275_v61 = vrot.slane %v4273_v14, 4  ;;  %v7884_v40 = vld [vmem:[%s5873_s9 + $0xc8] sm:$0x1]  ;;  %v4274_v31 = vsel %vm6865_vm0, %v5250_v12, %v4273_v14 }
 0x2d0   : > { %v4489_v16 = vadd.f32 %v4419_v45, %v4091_v49  ;;  %v3370_v43 = vpop.f32.mrf.mxu2  ;;  %v5319_v49 = vld [vmem:[%s5873_s9 + $0xb4] sm:$0xff]  ;;  %v3849_v56 = vrot.slane %v3847_v63, 4  ;;  %v3866_v51 = vshll.u32 %v7884_v40, 16  ;;  %v4320_v14 = vunpack.c.l.b16 %v4274_v31 }
 0x2d1   : > { %v3438_v21 = vadd.f32 %v3370_v43, %v3151_v30  ;;  %v7881_v30 = vrot.slane %v3856_v36, 5  ;;  %v3862_v43 = vrot.slane %v3860_v42, 4  ;;  %v4277_v29 = vsel %vm6865_vm0, %v4275_v61, %v4276_v5  ;;  %v8165_v63 = vld [vmem:[#allocation25_spill] sm:$0xff] }
 0x2d2   : > { %4521 = vst [vmem:[%s5875_s10 + $0x38] sm:$0xff] %v4489_v16  ;;  %5217 = vmatmul.msk.bf16.gmra.mxu3 %vm1089_vm13, %v3940_v47  ;;  %v5027_v47 = vrot.slane %v5011_v32, 9  ;;  %v3852_v16 = vrot.slane %v3850_v60, 5  ;;  %v4280_v61 = vrot.slane %v7861_v6, 5  ;;  %v7904_v5 = vld [vmem:[%s5873_s9 + $0xd0] sm:$0xf] }
 0x2d3   : > { %v3863_v59 = vor.u32 %v3862_v43, %v7881_v30  ;;  %v5012_v43 = vld [vmem:[%s5873_s9 + $0xc0] sm:$0xe]  ;;  %v3880_v31 = vshll.u32 %v7904_v5, 16 }
 0x2d4   : > { %v4422_v22 = vpop.f32.mrf.mxu0  ;;  %v3853_v24 = vor.u32 %v3852_v16, %v3849_v56 }
 0x2d5   : > { %v4024_v33 = vpop.f32.mrf.mxu3 }
 0x2d6   : > { %v3088_v13 = vpop.f32.mrf.mxu1  ;;  %v4092_v53 = vadd.f32 %v4024_v33, %v3438_v21  ;;  %v3941_v21 = vpack.c.b16 %v3923_v15, %v3922_v57  ;;  %v4321_v33 = vunpack.c.l.b16 %v4277_v29  ;;  %v3854_v42 = vrot.slane %v3853_v24, 4 }
 0x2d7   : > { %5265 = vmatmul.msk.bf16.gmra.mxu0 %vm1089_vm13, %v4338_v62  ;;  %v2942_v62 = vsel %vm6865_vm0, %v5027_v47, %v2941_v10  ;;  %v3864_v57 = vrot.slane %v3863_v59, 4  ;;  %v3868_v15 = vrot.slane %v3866_v51, 5  ;;  %v3884_v29 = vshrl.u32 %v7904_v5, 16  ;;  %v5681_v51 = vld [vmem:[%s5873_s9 + $0xc8] sm:$0x1] }
 0x2d8   : > { %v4490_v45 = vadd.f32 %v4422_v22, %v4092_v53  ;;  %v3372_v3 = vpop.f32.mrf.mxu2  ;;  %v2945_v22 = vsel %vm6865_vm0, %v2943_v38, %v2944_v8  ;;  %v3153_v53 = vadd.f32 %v3088_v13, %v8165_v63  ;;  %v2983_v60 = vunpack.c.l.b16 %v2942_v62  ;;  %v5202_v13 = vld [vmem:[%s5873_s9 + $0xcc] sm:$0xf]  ;;  %v5680_v38 = vld [vmem:[%s5873_s9 + $0xc4] sm:$0xf] }
 0x2d9   : > { %5042 = vmatmul.msk.bf16.gmra.mxu1 %vm1089_vm13, %v3000_v9  ;;  %v3439_v25 = vadd.f32 %v3372_v3, %v3152_v23  ;;  %v2984_v10 = vunpack.c.l.b16 %v2945_v22  ;;  %v4339_v12 = vpack.c.b16 %v4321_v33, %v4320_v14  ;;  %v2948_v18 = vrot.slane %v5680_v38, 5 }
 0x2da   : > { %4522 = vst [vmem:[%s5875_s10 + $0x40] sm:$0xff] %v4490_v45  ;;  %v5235_v45 = vld [vmem:[%s5873_s9 + $0xc0] sm:$0xe]  ;;  %v3859_v56 = vsel %vm6689_vm10, %v3854_v42, %v7881_v30  ;;  %v3871_v6 = vshrl.u32 %v5202_v13, 16  ;;  %v4282_v30 = vrot.slane %v4280_v61, 4  ;;  %v4283_v22 = vrot.slane %v7884_v40, 5 }
 0x2db   : > { %v3001_v3 = vpack.c.b16 %v2984_v10, %v2983_v60  ;;  %v5251_v16 = vrot.slane %v5235_v45, 9  ;;  %v5028_v24 = vrot.slane %v5012_v43, 9  ;;  %v2950_v59 = vrot.slane %v2948_v18, 4 }
 0x2dc   : > { %v4424_v34 = vpop.f32.mrf.mxu0  ;;  %v2951_v14 = vrot.slane %v5681_v51, 5  ;;  %v3886_v60 = vrot.slane %v3884_v29, 4  ;;  %v4284_v40 = vsel %vm6865_vm0, %v4282_v30, %v4283_v22  ;;  %v4287_v30 = vrot.slane %v7904_v5, 5 }
 0x2dd   : > { %v4026_v2 = vpop.f32.mrf.mxu3  ;;  %5154 = vmatmul.msk.bf16.gmra.mxu2 %vm1089_vm13, %v5319_v49 }
 0x2de   : > { %v3090_v52 = vpop.f32.mrf.mxu1  ;;  %v4093_v9 = vadd.f32 %v4026_v2, %v3439_v25  ;;  %v3869_v25 = vsel %vm6689_vm10, %v3864_v57, %v3868_v15  ;;  %v2949_v15 = vsel %vm6865_vm0, %v5028_v24, %v2948_v18 }
 0x2df   : > { %v3925_v63 = vunpack.c.l.b16 %v3869_v25 }
 0x2e0   : > { %v4491_v28 = vadd.f32 %v4424_v34, %v4093_v9  ;;  %v3375_v32 = vpop.f32.mrf.mxu2  ;;  %v3874_v34 = vshll.u32 %v5202_v13, 16  ;;  %v5320_v9 = vld [vmem:[%s5873_s9 + $0xc0] sm:$0xff] }
 0x2e1   : > { %v3440_v36 = vadd.f32 %v3375_v32, %v3153_v53  ;;  %v4281_v53 = vsel %vm6865_vm0, %v5251_v16, %v4280_v61  ;;  %v3882_v32 = vrot.slane %v3880_v31, 5  ;;  %v4323_v61 = vunpack.c.l.b16 %v4284_v40 }
 0x2e2   : > { %4523 = vst [vmem:[%s5875_s10 + $0x48] sm:$0xff] %v4491_v28  ;;  %5218 = vmatmul.msk.bf16.gmra.mxu3 %vm1089_vm13, %v3941_v21  ;;  %v3154_v21 = vadd.f32 %v3090_v52, %v7300_v4  ;;  %v3924_v28 = vunpack.c.l.b16 %v3859_v56  ;;  %v3873_v4 = vrot.slane %v3871_v6, 4  ;;  %v3876_v52 = vrot.slane %v3874_v34, 5 }
 0x2e3   : > { %v2985_v16 = vunpack.c.l.b16 %v2949_v15 }
 0x2e4   : > { %v4427_v23 = vpop.f32.mrf.mxu0  ;;  %v3877_v13 = vor.u32 %v3876_v52, %v3873_v4 }
 0x2e5   : > { %v4029_v49 = vpop.f32.mrf.mxu3 }
 0x2e6   : > { %v3093_v47 = vpop.f32.mrf.mxu1  ;;  %v4094_v8 = vadd.f32 %v4029_v49, %v3440_v36  ;;  %v5204_v36 = vld [vmem:[%s5873_s9 + $0xd4] sm:$0x1]  ;;  %v3887_v49 = vor.u32 %v3886_v60, %v3882_v32  ;;  %v3878_v34 = vrot.slane %v3877_v13, 4 }
 0x2e7   : > { %5266 = vmatmul.msk.bf16.gmra.mxu0 %vm1089_vm13, %v4339_v12  ;;  %v2952_v12 = vsel %vm6865_vm0, %v2950_v59, %v2951_v14  ;;  %v3890_v38 = vshll.u32 %v5204_v36, 16  ;;  %v3155_v56 = vadd.f32 %v3093_v47, %v7311_v55  ;;  %v8166_v14 = vld [vmem:[#allocation26_spill] sm:$0xff]  ;;  %v4290_v5 = vrot.slane %v5204_v36, 5 }
 0x2e8   : > { %v4492_v2 = vadd.f32 %v4427_v23, %v4094_v8  ;;  %v3377_v62 = vpop.f32.mrf.mxu2  ;;  %v3942_v23 = vpack.c.b16 %v3925_v63, %v3924_v28  ;;  %v2986_v43 = vunpack.c.l.b16 %v2952_v12  ;;  %v3888_v31 = vrot.slane %v3887_v49, 4 }
 0x2e9   : > { %5043 = vmatmul.msk.bf16.gmra.mxu1 %vm1089_vm13, %v3001_v3  ;;  %v3441_v33 = vadd.f32 %v3377_v62, %v3154_v21  ;;  %v4322_v3 = vunpack.c.l.b16 %v4281_v53  ;;  %v3892_v29 = vrot.slane %v3890_v38, 5  ;;  %v5236_v62 = vld [vmem:[%s5873_s9 + $0xcc] sm:$0xe]  ;;  %v4289_v63 = vrot.slane %v4287_v30, 4 }
 0x2ea   : > { %4524 = vst [vmem:[%s5875_s10 + $0x50] sm:$0xff] %v4492_v2  ;;  %v3002_v21 = vpack.c.b16 %v2986_v43, %v2985_v16  ;;  %v5252_v59 = vrot.slane %v5236_v62, 9  ;;  %v5321_v53 = vld [vmem:[%s5873_s9 + $0xcc] sm:$0xff]  ;;  %s5322_s9 = sshll.u32 %s5771_s15, 8  ;;  %s4547_s15 = scalar_lea.sflag [#allocation4], %s202_s30 }
 0x2eb   : > { %v4340_v6 = vpack.c.b16 %v4323_v61, %v4322_v3  ;;  %v3893_v24 = vsel %vm6689_vm10, %v3888_v31, %v3892_v29  ;;  %s4559_s4 = scalar_lea.hbm %s8032_s3, %s5322_s9 }
 0x2ec   : > { %v4429_v10 = vpop.f32.mrf.mxu0  ;;  %v3927_v60 = vunpack.c.l.b16 %v3893_v24  ;;  %v4288_v48 = vsel %vm6865_vm0, %v5252_v59, %v4287_v30  ;;  %s4562_s6 = sshll.u32 %s4559_s4, 4  ;;  %s4563_s6 = int_to_ptr.hbm [resolvable:$true] %s4562_s6 }
 0x2ed   : > { %v4031_v42 = vpop.f32.mrf.mxu3  ;;  %5155 = vmatmul.msk.bf16.gmra.mxu2 %vm1089_vm13, %v5320_v9  ;;  %v3883_v9 = vsel %vm6689_vm10, %v3878_v34, %v3882_v32  ;;  %v4291_v32 = vsel %vm6865_vm0, %v4289_v63, %v4290_v5  ;;  %v4324_v36 = vunpack.c.l.b16 %v4288_v48  ;;  %s5711_s7 = sshra.s32 %s4563_s6, 4  ;;  %s5712_s7 = int_to_ptr.hbm [resolvable:$true] %s5711_s7 }
 0x2ee   : > { %v3095_v57 = vpop.f32.mrf.mxu1  ;;  %v4095_v45 = vadd.f32 %v4031_v42, %v3441_v33  ;;  %v3926_v52 = vunpack.c.l.b16 %v3883_v9  ;;  %v4325_v12 = vunpack.c.l.b16 %v4291_v32  ;;  %s5713_s8 = scalar_lea.hbm %s5712_s7, 256  ;;  %p5718_p6 = scmp.lt.s32.totalorder %s5712_s7, %s8032_s3 }
 0x2ef   : > { %v3156_v33 = vadd.f32 %v3095_v57, %v8166_v14  ;;  %p5714_p2 = scmp.ne.s32.totalorder %s5712_s7, %s5713_s8  ;;  %p5719_p7 = scmp.lt.s32.totalorder %s5717_s19, %s5713_s8 }
 0x2f0   : > { %v4493_v8 = vadd.f32 %v4429_v10, %v4095_v45  ;;  %v3380_v25 = vpop.f32.mrf.mxu2  ;;  %v3943_v15 = vpack.c.b16 %v3927_v60, %v3926_v52  ;;  %v4341_v13 = vpack.c.b16 %v4325_v12, %v4324_v36 }
 0x2f1   : > { %v3442_v18 = vadd.f32 %v3380_v25, %v3155_v56  ;;  %p5715_p3 = pnand %p5714_p2, %p5847_p4  ;;  %p5720_p9 = por %p5719_p7, %p5718_p6 }
 0x2f2   : > { %4525 = vst [vmem:[%s5875_s10 + $0x58] sm:$0xff] %v4493_v8  ;;  %5219 = vmatmul.msk.bf16.gmra.mxu3 %vm1089_vm13, %v3942_v23 }
 0x2f3   : > { %p5716_p5 = pneg %p5715_p3 }
 0x2f4   : > { %v4432_v2 = vpop.f32.mrf.mxu0 }
 0x2f5   : > { %v4034_v22 = vpop.f32.mrf.mxu3  ;;  %p5721_p10 = pnand %p5720_p9, %p5716_p5 }
 0x2f6   : > { %v3098_v55 = vpop.f32.mrf.mxu1  ;;  %v4096_v47 = vadd.f32 %v4034_v22, %v3442_v18 }
 0x2f7   : > { %5267 = vmatmul.msk.bf16.gmra.mxu0 %vm1089_vm13, %v4340_v6  ;;  %v3157_v23 = vadd.f32 %v3098_v55, %v7347_v54 }
 0x2f8   : > { %v4494_v51 = vadd.f32 %v4432_v2, %v4096_v47  ;;  %v3382_v28 = vpop.f32.mrf.mxu2 }
 0x2f9   : > { %5044 = vmatmul.msk.bf16.gmra.mxu1 %vm1089_vm13, %v3002_v21  ;;  %v3443_v4 = vadd.f32 %v3382_v28, %v3156_v33 }
 0x2fa   : > { %4526 = vst [vmem:[%s5875_s10 + $0x60] sm:$0xff] %v4494_v51 }
 0x2fc   : > { %v4434_v10 = vpop.f32.mrf.mxu0 }
 0x2fd   : > { %v4036_v40 = vpop.f32.mrf.mxu3  ;;  %5156 = vmatmul.msk.bf16.gmra.mxu2 %vm1089_vm13, %v5321_v53 }
 0x2fe   : > { %v3100_v42 = vpop.f32.mrf.mxu1  ;;  %v4097_v57 = vadd.f32 %v4036_v40, %v3443_v4 }
 0x2ff   : > { %v3158_v25 = vadd.f32 %v3100_v42, %v7371_v39 }
 0x300   : > { %v4495_v45 = vadd.f32 %v4434_v10, %v4097_v57  ;;  %v3385_v3 = vpop.f32.mrf.mxu2 }
 0x301   : > { %v3444_v61 = vadd.f32 %v3385_v3, %v3157_v23 }
 0x302   : > { %4527 = vst [vmem:[%s5875_s10 + $0x68] sm:$0xff] %v4495_v45  ;;  %5220 = vmatmul.msk.bf16.gmra.mxu3 %vm1089_vm13, %v3943_v15 }
 0x304   : > { %v4437_v19 = vpop.f32.mrf.mxu0 }
 0x305   : > { %v4039_v49 = vpop.f32.mrf.mxu3 }
 0x306   : > { %v3103_v38 = vpop.f32.mrf.mxu1  ;;  %v4098_v8 = vadd.f32 %v4039_v49, %v3444_v61 }
 0x307   : > { %5268 = vmatmul.msk.bf16.gmra.mxu0 %vm1089_vm13, %v4341_v13  ;;  %v3159_v29 = vadd.f32 %v3103_v38, %v7390_v1 }
 0x308   : > { %v4496_v56 = vadd.f32 %v4437_v19, %v4098_v8  ;;  %v3387_v16 = vpop.f32.mrf.mxu2 }
 0x309   : > { %v3445_v43 = vadd.f32 %v3387_v16, %v3158_v25 }
 0x30a   : > { %4528 = vst [vmem:[%s5875_s10 + $0x70] sm:$0xff] %v4496_v56 }
 0x30c   : > { %v4439_v54 = vpop.f32.mrf.mxu0 }
 0x30d   : > { %v4041_v18 = vpop.f32.mrf.mxu3 }
 0x30e   : > { %v3105_v6 = vpop.f32.mrf.mxu1  ;;  %v4099_v34 = vadd.f32 %v4041_v18, %v3445_v43 }
 0x30f   : > { %v3160_v47 = vadd.f32 %v3105_v6, %v7414_v46 }
 0x310   : > { %v4497_v31 = vadd.f32 %v4439_v54, %v4099_v34  ;;  %v3390_v2 = vpop.f32.mrf.mxu2 }
 0x311   : > { %v3446_v21 = vadd.f32 %v3390_v2, %v3159_v29 }
 0x312   : > { %4529 = vst [vmem:[%s5875_s10 + $0x78] sm:$0xff] %v4497_v31 }
 0x314   : > { %v4442_v62 = vpop.f32.mrf.mxu0 }
 0x315   : > { %v4044_v30 = vpop.f32.mrf.mxu3 }
 0x316   : > { %v3108_v22 = vpop.f32.mrf.mxu1  ;;  %v4100_v55 = vadd.f32 %v4044_v30, %v3446_v21 }
 0x317   : > { %v3161_v28 = vadd.f32 %v3108_v22, %v7433_v11 }
 0x318   : > { %v4498_v39 = vadd.f32 %v4442_v62, %v4100_v55  ;;  %v3392_v9 = vpop.f32.mrf.mxu2 }
 0x319   : > { %v3447_v24 = vadd.f32 %v3392_v9, %v3160_v47 }
 0x31a   : > { %4530 = vst [vmem:[%s5875_s10 + $0x80] sm:$0xff] %v4498_v39 }
 0x31c   : > { %v4444_v59 = vpop.f32.mrf.mxu0 }
 0x31d   : > { %v4046_v51 = vpop.f32.mrf.mxu3 }
 0x31e   : > { %v3110_v14 = vpop.f32.mrf.mxu1  ;;  %v4101_v33 = vadd.f32 %v4046_v51, %v3447_v24 }
 0x31f   : > { %v3162_v10 = vadd.f32 %v3110_v14, %v7457_v35 }
 0x320   : > { %v4499_v1 = vadd.f32 %v4444_v59, %v4101_v33  ;;  %v3395_v63 = vpop.f32.mrf.mxu2 }
 0x321   : > { %v3448_v5 = vadd.f32 %v3395_v63, %v3161_v28 }
 0x322   : > { %4531 = vst [vmem:[%s5875_s10 + $0x88] sm:$0xff] %v4499_v1  ;;  %v8167_v1 = vld [vmem:[#allocation27_spill] sm:$0xff] }
 0x324   : > { %v4447_v53 = vpop.f32.mrf.mxu0 }
 0x325   : > { %v4049_v4 = vpop.f32.mrf.mxu3 }
 0x326   : > { %v3113_v52 = vpop.f32.mrf.mxu1  ;;  %v4102_v60 = vadd.f32 %v4049_v4, %v3448_v5 }
 0x327   : > { %v3163_v36 = vadd.f32 %v3113_v52, %v7476_v7 }
 0x328   : > { %v4500_v46 = vadd.f32 %v4447_v53, %v4102_v60  ;;  %v3397_v48 = vpop.f32.mrf.mxu2 }
 0x329   : > { %v3449_v32 = vadd.f32 %v3397_v48, %v3162_v10 }
 0x32a   : > { %4532 = vst [vmem:[%s5875_s10 + $0x90] sm:$0xff] %v4500_v46 }
 0x32c   : > { %v4449_v40 = vpop.f32.mrf.mxu0 }
 0x32d   : > { %v4051_v42 = vpop.f32.mrf.mxu3 }
 0x32e   : > { %v3115_v57 = vpop.f32.mrf.mxu1  ;;  %v4103_v15 = vadd.f32 %v4051_v42, %v3449_v32 }
 0x32f   : > { %v3164_v19 = vadd.f32 %v3115_v57, %v7500_v27 }
 0x330   : > { %v4501_v11 = vadd.f32 %v4449_v40, %v4103_v15  ;;  %v3400_v12 = vpop.f32.mrf.mxu2 }
 0x331   : > { %v3450_v45 = vadd.f32 %v3400_v12, %v3163_v36 }
 0x332   : > { %4533 = vst [vmem:[%s5875_s10 + $0x98] sm:$0xff] %v4501_v11 }
 0x334   : > { %v4452_v23 = vpop.f32.mrf.mxu0 }
 0x335   : > { %v4054_v3 = vpop.f32.mrf.mxu3 }
 0x336   : > { %v3118_v61 = vpop.f32.mrf.mxu1  ;;  %v4104_v13 = vadd.f32 %v4054_v3, %v3450_v45 }
 0x337   : > { %v3165_v43 = vadd.f32 %v3118_v61, %v7519_v37 }
 0x338   : > { %v4502_v35 = vadd.f32 %v4452_v23, %v4104_v13  ;;  %v3402_v49 = vpop.f32.mrf.mxu2 }
 0x339   : > { %v3451_v38 = vadd.f32 %v3402_v49, %v3164_v19 }
 0x33a   : > { %4534 = vst [vmem:[%s5875_s10 + $0xa0] sm:$0xff] %v4502_v35 }
 0x33c   : > { %v4454_v8 = vpop.f32.mrf.mxu0 }
 0x33d   : > { %v4056_v56 = vpop.f32.mrf.mxu3 }
 0x33e   : > { %v3120_v25 = vpop.f32.mrf.mxu1  ;;  %v4105_v16 = vadd.f32 %v4056_v56, %v3451_v38 }
 0x33f   : > { %v3166_v2 = vadd.f32 %v3120_v25, %v7543_v50 }
 0x340   : > { %v4503_v7 = vadd.f32 %v4454_v8, %v4105_v16  ;;  %v3405_v54 = vpop.f32.mrf.mxu2 }
 0x341   : > { %v3452_v18 = vadd.f32 %v3405_v54, %v3165_v43 }
 0x342   : > { %4535 = vst [vmem:[%s5875_s10 + $0xa8] sm:$0xff] %v4503_v7 }
 0x344   : > { %v4457_v6 = vpop.f32.mrf.mxu0 }
 0x345   : > { %v4059_v34 = vpop.f32.mrf.mxu3 }
 0x346   : > { %v3123_v31 = vpop.f32.mrf.mxu1  ;;  %v4106_v29 = vadd.f32 %v4059_v34, %v3452_v18 }
 0x347   : > { %v3167_v47 = vadd.f32 %v3123_v31, %v7562_v20 }
 0x348   : > { %v4504_v27 = vadd.f32 %v4457_v6, %v4106_v29  ;;  %v3407_v21 = vpop.f32.mrf.mxu2 }
 0x349   : > { %v3453_v62 = vadd.f32 %v3407_v21, %v3166_v2 }
 0x34a   : > { %4536 = vst [vmem:[%s5875_s10 + $0xb0] sm:$0xff] %v4504_v27 }
 0x34c   : > { %v4459_v30 = vpop.f32.mrf.mxu0 }
 0x34d   : > { %v4061_v22 = vpop.f32.mrf.mxu3 }
 0x34e   : > { %v3125_v55 = vpop.f32.mrf.mxu1  ;;  %v4107_v39 = vadd.f32 %v4061_v22, %v3453_v62 }
 0x34f   : > { %v3168_v28 = vadd.f32 %v3125_v55, %v8167_v1 }
 0x350   : > { %v4505_v37 = vadd.f32 %v4459_v30, %v4107_v39  ;;  %v3410_v9 = vpop.f32.mrf.mxu2 }
 0x351   : > { %v3454_v24 = vadd.f32 %v3410_v9, %v3167_v47 }
 0x352   : > { %4537 = vst [vmem:[%s5875_s10 + $0xb8] sm:$0xff] %v4505_v37 }
 0x354   : > { %v4462_v59 = vpop.f32.mrf.mxu0 }
 0x355   : > { %v4064_v51 = vpop.f32.mrf.mxu3 }
 0x356   : > { %v3128_v14 = vpop.f32.mrf.mxu1  ;;  %v4108_v33 = vadd.f32 %v4064_v51, %v3454_v24 }
 0x357   : > { %v3169_v46 = vadd.f32 %v3128_v14, %v7603_v41 }
 0x358   : > { %v4506_v50 = vadd.f32 %v4462_v59, %v4108_v33  ;;  %v3412_v63 = vpop.f32.mrf.mxu2 }
 0x359   : > { %v3455_v5 = vadd.f32 %v3412_v63, %v3168_v28 }
 0x35a   : > { %4538 = vst [vmem:[%s5875_s10 + $0xc0] sm:$0xff] %v4506_v50 }
 0x35c   : > { %v4464_v53 = vpop.f32.mrf.mxu0 }
 0x35d   : > { %v4066_v4 = vpop.f32.mrf.mxu3 }
 0x35e   : > { %v3130_v52 = vpop.f32.mrf.mxu1  ;;  %v4109_v60 = vadd.f32 %v4066_v4, %v3455_v5 }
 0x35f   : > { %v3170_v11 = vadd.f32 %v3130_v52, %v7624_v58 }
 0x360   : > { %v4507_v20 = vadd.f32 %v4464_v53, %v4109_v60  ;;  %v3415_v10 = vpop.f32.mrf.mxu2 }
 0x361   : > { %v3456_v48 = vadd.f32 %v3415_v10, %v3169_v46 }
 0x362   : > { %4539 = vst [vmem:[%s5875_s10 + $0xc8] sm:$0xff] %v4507_v20 }
 0x364   : > { %v4467_v32 = vpop.f32.mrf.mxu0 }
 0x365   : > { %v4069_v40 = vpop.f32.mrf.mxu3 }
 0x366   : > { %v4110_v42 = vadd.f32 %v4069_v40, %v3456_v48  ;;  %v3133_v57 = vpop.f32.mrf.mxu1 }
 0x367   : > { %v3171_v41 = vadd.f32 %v3133_v57, %v7642_v0 }
 0x368   : > { %v4508_v15 = vadd.f32 %v4467_v32, %v4110_v42  ;;  %v3417_v36 = vpop.f32.mrf.mxu2 }
 0x369   : > { %v3457_v12 = vadd.f32 %v3417_v36, %v3170_v11 }
 0x36a   : > { %4540 = vst [vmem:[%s5875_s10 + $0xd0] sm:$0xff] %v4508_v15 }
 0x36c   : > { %v4469_v45 = vpop.f32.mrf.mxu0 }
 0x36d   : > { %v4071_v23 = vpop.f32.mrf.mxu3 }
 0x36e   : > { %v4111_v3 = vadd.f32 %v4071_v23, %v3457_v12  ;;  %v3135_v35 = vpop.f32.mrf.mxu1 }
 0x36f   : > { %v3172_v58 = vadd.f32 %v3135_v35, %v7665_v44 }
 0x370   : > { %v4509_v61 = vadd.f32 %v4469_v45, %v4111_v3  ;;  %v3420_v13 = vpop.f32.mrf.mxu2 }
 0x371   : > { %v3458_v19 = vadd.f32 %v3420_v13, %v3171_v41 }
 0x372   : > { %4541 = vst [vmem:[%s5875_s10 + $0xd8] sm:$0xff] %v4509_v61 }
 0x374   : > { %v4472_v49 = vpop.f32.mrf.mxu0 }
 0x375   : > { %v4074_v38 = vpop.f32.mrf.mxu3 }
 0x376   : > { %v4112_v8 = vadd.f32 %v4074_v38, %v3458_v19  ;;  %v3138_v7 = vpop.f32.mrf.mxu1 }
 0x377   : > { %v3173_v6 = vadd.f32 %v3138_v7, %v7685_v26 }
 0x378   : > { %v4510_v56 = vadd.f32 %v4472_v49, %v4112_v8  ;;  %v3422_v25 = vpop.f32.mrf.mxu2 }
 0x379   : > { %v3459_v16 = vadd.f32 %v3422_v25, %v3172_v58 }
 0x37a   : > { %4542 = vst [vmem:[%s5875_s10 + $0xe0] sm:$0xff] %v4510_v56 }
 0x37c   : > { %v4474_v43 = vpop.f32.mrf.mxu0 }
 0x37d   : > { %v4076_v54 = vpop.f32.mrf.mxu3 }
 0x37e   : > { %v4113_v0 = vadd.f32 %v4076_v54, %v3459_v16  ;;  %v3140_v29 = vpop.f32.mrf.mxu1 }
 0x37f   : > { %v3174_v62 = vadd.f32 %v3140_v29, %v7705_v17 }
 0x380   : > { %v4511_v18 = vadd.f32 %v4474_v43, %v4113_v0  ;;  %v3425_v34 = vpop.f32.mrf.mxu2 }
 0x381   : > { %v3460_v31 = vadd.f32 %v3425_v34, %v3173_v6 }
 0x382   : > { %4543 = vst [vmem:[%s5875_s10 + $0xe8] sm:$0xff] %v4511_v18 }
 0x384   : > { %v4477_v27 = vpop.f32.mrf.mxu0 }
 0x385   : > { %v4079_v2 = vpop.f32.mrf.mxu3 }
 0x386   : > { %v4114_v44 = vadd.f32 %v4079_v2, %v3460_v31 }
 0x388   : > { %v4512_v21 = vadd.f32 %v4477_v27, %v4114_v44  ;;  %v3427_v30 = vpop.f32.mrf.mxu2 }
 0x389   : > { %v3461_v26 = vadd.f32 %v3427_v30, %v3174_v62 }
 0x38a   : > { %4544 = vst [vmem:[%s5875_s10 + $0xf0] sm:$0xff] %v4512_v21 }
 0x38c   : > { %v4479_v39 = vpop.f32.mrf.mxu0 }
 0x38d   : > { %v4081_v22 = vpop.f32.mrf.mxu3 }
 0x38e   : > { %v4115_v55 = vadd.f32 %v4081_v22, %v3461_v26 }
 0x390   : > { %v4513_v37 = vadd.f32 %v4479_v39, %v4115_v55 }
 0x392   : > { %4545 = vst [vmem:[%s5875_s10 + $0xf8] sm:$0xff] %v4513_v37 }
 0x393   : > { %5724 = shalt.err (!%p5721_p10)
}
 0x394   : > { %s5785_s30 = smov 128   ;;  %s5786_s10 = smov 8  }
 0x395   : > { %5553 = dma.vmem_to_hbm [thread:$0]  (%p5847_p4), %s4561_s5, 4096, %s4563_s6, %s4547_s15, %s5785_s30, %s5785_s30, %s5786_s10  }
 0x396 PF: > { %p5565_p11 = scmp.ge.s32.totalorder %s5779_s17, 2  ;;  %s4577_s26 = sand.u32 1, %s5759_s12  }
 0x397   : > { %s4578_s27 = scalar_lea.sflag [#allocation4], %s4577_s26 }
 0x398   : > { %p5560_p12 = pnand %p5565_p11, %p5854_p8 }
 0x39a   : > { %p5561_p13 = pneg %p5560_p12 }
 0x39c   : > { %5754 = dma.done.wait (%p5561_p13), %s4578_s27, 4096  }
 0x39d   : > { %5756 = vsyncadd (%p5561_p13), %s4578_s27, 4294963200  ;;  %s17_s17 = sadd.s32 1, %s5779_s17   ;;  %s8168_s12 = smov %s5763_s13 }
 0x39e   : > { %p14_p0 = scmp.ge.s32.totalorder %s17_s17, 4   ;;  %s8169_s13 = smov %s5767_s14 }
 0x39f   : > { %s8170_s14 = smov %s5860_s25  ;;  %s8171_s15 = smov %s5775_s16 }
 0x3a0   : > { %s8172_s16 = smov %s8174_s20  ;;  %16 = sbr.rel (!%p14_p0) target bundleno = 5 (0x5), region = 91 }
 0x3a5   :  { %4584 = vsyncpa [#allocation4], 1 }
 0x3a6   :  { %4586 = vsyncpa [#allocation4 + $0x1], 1 }
 0x3a7   :  { %4587 = vsyncpa [#allocation5], 1 }
 0x3a8   :  { %4589 = vsyncpa [#allocation5 + $0x1], 1 }

</bundles_post_ra>
